<compile_context>
chip_gen: v7x
topology: tpu7x:2x2x1
jax: 0.10.0
libtpu: 0.0.40
codegen_flags: <defaults>
</compile_context>

<pallas_src>
import functools

import jax
import jax.numpy as jnp
import numpy as np
from jax.experimental import pallas as pl
from jax.experimental.pallas import tpu as pltpu


def _round_up(x, m):
    return -(-x // m) * m


# ---------------------------------------------------------------------------
# Relative position index (identical to the PyTorch buffer). Cached: it only
# depends on the static window size.
# ---------------------------------------------------------------------------
@functools.lru_cache(maxsize=None)
def make_relative_position_index(window_size):
    Wh, Ww = window_size
    coords = np.stack(np.meshgrid(np.arange(Wh), np.arange(Ww), indexing="ij"))
    coords_flatten = coords.reshape(2, -1)                             # (2, N)
    rel = coords_flatten[:, :, None] - coords_flatten[:, None, :]      # (2, N, N)
    rel = rel.transpose(1, 2, 0).copy()                                # (N, N, 2)
    rel[:, :, 0] += Wh - 1
    rel[:, :, 1] += Ww - 1
    rel[:, :, 0] *= 2 * Ww - 1
    return rel.sum(-1)                                                 # (N, N)


def precompute_relative_position_bias(rpb_table, window_size, num_heads):
    """One-time gather of the relative position bias -> (H, N, N) f32."""
    N = window_size[0] * window_size[1]
    idx = jnp.asarray(make_relative_position_index(window_size).reshape(-1))
    rpb = rpb_table[idx].reshape(N, N, num_heads)
    return jnp.transpose(rpb, (2, 0, 1)).astype(jnp.float32)


# ---------------------------------------------------------------------------
# One-time weight preparation: q-scale folding, head-major QKV column order,
# lane padding (C -> Cp via all-zero heads), relative-position-bias gather.
# ---------------------------------------------------------------------------
def prepare_window_attention_params(params, *, dim, window_size, num_heads,
                                     qk_scale=None,
                                     compute_dtype=jnp.bfloat16):
    C, H = dim, num_heads
    Dh = C // H
    scale = qk_scale if qk_scale is not None else Dh ** (-0.5)

    # Pad channels to a multiple of 128 lanes by adding all-zero heads
    # (possible whenever head_dim divides 128, true for Swin and the demo).
    if C % 128 != 0 and 128 % Dh == 0:
        Cp = _round_up(C, 128)
    else:
        Cp = C
    Hp = Cp // Dh

    wqkv = params["wqkv"].astype(jnp.float32)          # (C, 3C), used as x @ wqkv
    bqkv = params["bqkv"].astype(jnp.float32)          # (3C,)
    wq, wk, wv = wqkv[:, :C], wqkv[:, C:2 * C], wqkv[:, 2 * C:]
    bq, bk, bv = bqkv[:C], bqkv[C:2 * C], bqkv[2 * C:]
    wq = wq * scale                                    # fold q-scale into weights
    bq = bq * scale

    # Head-major column order [head, (q|k|v), d]; zero-pad rows C->Cp and
    # head count H->Hp.
    w4 = jnp.stack([wq.reshape(C, H, Dh), wk.reshape(C, H, Dh),
                    wv.reshape(C, H, Dh)], axis=2)     # (C, H, 3, Dh)
    w4 = jnp.pad(w4, ((0, Cp - C), (0, Hp - H), (0, 0), (0, 0)))
    wqkv_hm = w4.reshape(Cp, 3 * Cp)

    b3 = jnp.stack([bq.reshape(H, Dh), bk.reshape(H, Dh),
                    bv.reshape(H, Dh)], axis=1)        # (H, 3, Dh)
    b3 = jnp.pad(b3, ((0, Hp - H), (0, 0), (0, 0)))
    bqkv_hm = b3.reshape(1, 3 * Cp)

    wproj = params["wproj"].astype(jnp.float32)        # (C, C)
    bproj = params["bproj"].astype(jnp.float32)        # (C,)
    wproj_p = jnp.pad(wproj.reshape(H, Dh, C),
                      ((0, Hp - H), (0, 0), (0, Cp - C))).reshape(Cp, Cp)
    bproj_p = jnp.pad(bproj, (0, Cp - C)).reshape(1, Cp)

    rpb = precompute_relative_position_bias(params["rpb_table"], window_size, H)
    rpb_p = jnp.pad(rpb, ((0, Hp - H), (0, 0), (0, 0)))     # (Hp, N, N)

    return {
        "wqkv": wqkv_hm.astype(compute_dtype),
        "bqkv": bqkv_hm,                                    # f32
        "wproj": wproj_p.astype(compute_dtype),
        "bproj": bproj_p,                                   # f32
        "rpb": rpb_p.astype(jnp.float32),
        "Cp": Cp, "Hp": Hp, "Dh": Dh, "C": C, "H": H,
        "compute_dtype": compute_dtype,
    }


# ---------------------------------------------------------------------------
# Pallas kernel: one block of `bwin` windows per grid step.
# ---------------------------------------------------------------------------
def _window_attn_kernel(x_ref, wqkv_ref, bqkv_ref, wproj_ref, bproj_ref,
                        bias_ref, o_ref, *, num_heads, head_dim, seq_n, bwin):
    Hp, Dh, N = num_heads, head_dim, seq_n
    rows = x_ref.shape[0]                       # bwin * N
    cdt = x_ref.dtype                           # MXU input dtype (bf16 or f32)

    # 1) Fused QKV projection for all windows of the block (one MXU matmul);
    #    the q-scale is already folded into the weight/bias, columns are
    #    head-major [head, (q|k|v), d].
    qkv = jnp.dot(x_ref[...], wqkv_ref[...], preferred_element_type=jnp.float32)
    qkv = (qkv + bqkv_ref[...]).astype(cdt)                       # (rows, 3*Cp)

    # 2) Head-batch relayout: (rows, Hp*3*Dh) -> (Hp*bwin, N, 3*Dh), head-major.
    qkv_h = jnp.concatenate(
        [qkv[:, h * 3 * Dh:(h + 1) * 3 * Dh].reshape(bwin, N, 3 * Dh)
         for h in range(Hp)], axis=0)                             # (Hp*bwin, N, 3Dh)
    q = qkv_h[:, :, :Dh]
    k = qkv_h[:, :, Dh:2 * Dh]
    v = qkv_h[:, :, 2 * Dh:]

    # 3) Scores for every (head, window) pair in one batched MXU matmul.
    s = jnp.einsum("bqd,bkd->bqk", q, k,
                   preferred_element_type=jnp.float32)            # (Hp*bwin, N, N)

    # 4) Relative-position bias (+ shifted-window mask), pre-combined in the
    #    wrapper and resident in VMEM: a single f32 add.
    s = s + bias_ref[...]

    # 5) Softmax in f32; normalization via the EUP approximate reciprocal.
    s = s - jnp.max(s, axis=-1, keepdims=True)
    p = jnp.exp(s)
    p = p * pl.reciprocal(jnp.sum(p, axis=-1, keepdims=True), approx=True)

    # TODO(synk): attn_drop / proj_drop omitted (p = 0.0 -> identity at inference)

    # 6) Attention-weighted values, batched over (head, window); reassemble a
    #    lane-dense (rows, Cp) slab (no scratch, no masked stripe stores).
    o = jnp.einsum("bqk,bkd->bqd", p.astype(cdt), v,
                   preferred_element_type=jnp.float32).astype(cdt)  # (Hp*bwin, N, Dh)
    o_rows = jnp.concatenate(
        [o[h * bwin:(h + 1) * bwin].reshape(rows, Dh) for h in range(Hp)],
        axis=-1)                                                  # (rows, Cp)

    # 7) Output projection (single MXU matmul) + one lane-dense store.
    y = jnp.dot(o_rows, wproj_ref[...], preferred_element_type=jnp.float32)
    o_ref[...] = (y + bproj_ref[...]).astype(o_ref.dtype)


# ---------------------------------------------------------------------------
# Block sizing: multiple of nW (resident mask alignment), rows % 8 == 0,
# VMEM-budget aware, and >= 2 grid steps when the input allows (v7x megacore).
# ---------------------------------------------------------------------------
def _pick_window_block(B_, N, nW, *, row_bytes, resident_bytes,
                       target_rows=512, vmem_budget=40 << 20, min_blocks=2):
    g = max(1, int(nW))
    m = g
    while (m * N) % 8 != 0:                     # unit: multiple of nW, rows%8==0
        m += g
    total_units = -(-B_ // m)
    k = min(max(1, target_rows // (m * N)), total_units)
    budget = max(vmem_budget - resident_bytes, m * N * row_bytes)
    while k > 1 and k * m * N * row_bytes > budget:
        k -= 1
    while k > 1 and -(-total_units // k) < min_blocks:
        k -= 1
    return m * k


# ---------------------------------------------------------------------------
# Wrapper
# ---------------------------------------------------------------------------
def window_attention(x, params, *, window_size, num_heads, mask=None,
                     qk_scale=None, compute_dtype=jnp.bfloat16, prepared=None,
                     target_rows=512):
    """x: (B_, N, C); mask: (nW, N, N) additive (0 / -100) or None."""
    B_, N, C = x.shape
    assert N == window_size[0] * window_size[1]
    if prepared is None:
        prepared = prepare_window_attention_params(
            params, dim=C, window_size=window_size, num_heads=num_heads,
            qk_scale=qk_scale, compute_dtype=compute_dtype)
    compute_dtype = prepared["compute_dtype"]
    Cp, Hp, Dh = prepared["Cp"], prepared["Hp"], prepared["Dh"]

    nW = int(mask.shape[0]) if mask is not None else 1

    # --- block sizing (rows per grid step) ----------------------------------
    cb = jnp.dtype(compute_dtype).itemsize
    ob = jnp.dtype(x.dtype).itemsize
    row_bytes = (Cp * (2 * cb + 2 * ob)          # double-buffered x / out blocks
                 + 3 * Cp * (4 + cb)             # qkv activation (f32 + cast)
                 + Cp * (4 + cb)                 # o_rows / y temporaries
                 + 4 * Hp * N * 4)               # score/prob rows (f32)
    resident_bytes = 4 * Cp * Cp * cb + 4 * Cp * 4 + 2 * Hp * N * N * 4
    bwin = _pick_window_block(B_, N, nW, row_bytes=row_bytes,
                              resident_bytes=resident_bytes,
                              target_rows=target_rows)
    rows_blk = bwin * N
    n_blocks = -(-B_ // bwin)
    B_pad = n_blocks * bwin

    # --- operands ------------------------------------------------------------
    x2d = x.reshape(B_ * N, C)
    if B_pad != B_ or Cp != C:
        x2d = jnp.pad(x2d, ((0, (B_pad - B_) * N), (0, Cp - C)))
    x2d = x2d.astype(compute_dtype)

    # Combined additive term: relative-position bias (per head) + window mask
    # (per window), laid out head-major to match the kernel's (Hp*bwin, N, N)
    # score tensor.  Resident in VMEM across all grid steps (bwin % nW == 0).
    bias = jnp.broadcast_to(prepared["rpb"][:, None], (Hp, bwin, N, N))
    if mask is not None:
        mask_blk = jnp.tile(mask.astype(jnp.float32), (bwin // nW, 1, 1))
        bias = bias + mask_blk[None]
    bias = bias.reshape(Hp * bwin, N, N)

    kernel = functools.partial(_window_attn_kernel, num_heads=Hp, head_dim=Dh,
                               seq_n=N, bwin=bwin)

    # Constant-index BlockSpecs (weights / combined bias) are fetched once and
    # stay resident across grid steps.
    in_specs = [
        pl.BlockSpec((rows_blk, Cp), lambda b: (b, 0)),            # x rows
        pl.BlockSpec((Cp, 3 * Cp), lambda b: (0, 0)),              # wqkv
        pl.BlockSpec((1, 3 * Cp), lambda b: (0, 0)),               # bqkv
        pl.BlockSpec((Cp, Cp), lambda b: (0, 0)),                  # wproj
        pl.BlockSpec((1, Cp), lambda b: (0, 0)),                   # bproj
        pl.BlockSpec((Hp * bwin, N, N), lambda b: (0, 0, 0)),      # rpb (+ mask)
    ]
    inputs = [x2d, prepared["wqkv"], prepared["bqkv"], prepared["wproj"],
              prepared["bproj"], bias]

    flops_blk = (2 * rows_blk * Cp * 3 * Cp           # QKV projection
                 + 4 * Hp * bwin * N * N * Dh         # QK^T + PV
                 + 2 * rows_blk * Cp * Cp)            # output projection
    bytes_acc = (x2d.size * cb + B_pad * N * Cp * ob
                 + 4 * Cp * Cp * cb + 4 * Cp * 4 + Hp * bwin * N * N * 4)
    cost = pl.CostEstimate(flops=int(n_blocks * flops_blk),
                           transcendentals=int(n_blocks * Hp * bwin * N * N),
                           bytes_accessed=int(bytes_acc))

    vmem_limit = int(min(48 << 20,
                         max(24 << 20,
                             2 * (resident_bytes + Hp * bwin * N * N * 4
                                  + rows_blk * row_bytes))))

    out2d = pl.pallas_call(
        kernel,
        out_shape=jax.ShapeDtypeStruct((B_pad * N, Cp), x.dtype),
        grid=(n_blocks,),
        in_specs=in_specs,
        out_specs=pl.BlockSpec((rows_blk, Cp), lambda b: (b, 0)),
        compiler_params=pltpu.CompilerParams(
            dimension_semantics=("parallel",),
            vmem_limit_bytes=vmem_limit),
        cost_estimate=cost,
    )(*inputs)

    return out2d[:B_ * N, :C].reshape(B_, N, C)


# ---------------------------------------------------------------------------
# Pure-JAX reference (mirrors the PyTorch forward) for verification
# ---------------------------------------------------------------------------
def window_attention_ref(x, params, *, window_size, num_heads, mask=None,
                         qk_scale=None):
    B_, N, C = x.shape
    head_dim = C // num_heads
    scale = qk_scale if qk_scale is not None else head_dim ** (-0.5)

    qkv = x @ params["wqkv"] + params["bqkv"]                          # (B_, N, 3C)
    qkv = qkv.reshape(B_, N, 3, num_heads, head_dim).transpose(2, 0, 3, 1, 4)
    q, k, v = qkv[0], qkv[1], qkv[2]                                   # (B_, H, N, Dh)
    q = q * scale
    attn = jnp.einsum("bhnd,bhmd->bhnm", q, k)                         # (B_, H, N, N)

    rpb = precompute_relative_position_bias(params["rpb_table"], window_size,
                                            num_heads)
    attn = attn + rpb[None]

    if mask is not None:
        nW = mask.shape[0]
        attn = attn.reshape(B_ // nW, nW, num_heads, N, N) + mask[None, :, None]
        attn = attn.reshape(-1, num_heads, N, N)
    attn = jax.nn.softmax(attn, axis=-1)

    out = jnp.einsum("bhnm,bhmd->bhnd", attn, v)
    out = out.transpose(0, 2, 1, 3).reshape(B_, N, C)
    out = out @ params["wproj"] + params["bproj"]
    return out


# ---------------------------------------------------------------------------
# Main
# ---------------------------------------------------------------------------
if __name__ == "__main__":
    dim = 32
    window_size = (4, 4)
    num_heads = 4
    N = window_size[0] * window_size[1]          # 16
    batch = 2
    nW = 2                                       # number of distinct window masks
    B_ = batch * nW                              # 4

    key = jax.random.PRNGKey(0)
    k1, k2, k3, k4, k5, k6, k7 = jax.random.split(key, 7)

    num_rel = (2 * window_size[0] - 1) * (2 * window_size[1] - 1)
    params = {
        "rpb_table": 0.02 * jax.random.truncated_normal(
            k1, -2.0, 2.0, (num_rel, num_heads), jnp.float32),
        "wqkv": 0.02 * jax.random.normal(k2, (dim, 3 * dim), jnp.float32),
        "bqkv": 0.02 * jax.random.normal(k3, (3 * dim,), jnp.float32),
        "wproj": 0.02 * jax.random.normal(k4, (dim, dim), jnp.float32),
        "bproj": 0.02 * jax.random.normal(k5, (dim,), jnp.float32),
    }

    x = jax.random.normal(k6, (B_, N, dim), jnp.float32)

    # Shifted-window style additive mask: 0 where allowed, -100 where blocked.
    pattern = jax.random.bernoulli(k7, 0.7, (nW, N, N))
    mask = jnp.where(pattern, 0.0, -100.0).astype(jnp.float32)

    # Weight prep (padding, scale folding, rpb gather) done once per dtype.
    prep_f32 = prepare_window_attention_params(
        params, dim=dim, window_size=window_size, num_heads=num_heads,
        compute_dtype=jnp.float32)
    prep_bf16 = prepare_window_attention_params(
        params, dim=dim, window_size=window_size, num_heads=num_heads,
        compute_dtype=jnp.bfloat16)

    # --- masked path, f32 MXU inputs ---
    out = jax.block_until_ready(
        window_attention(x, params, window_size=window_size,
                         num_heads=num_heads, mask=mask, prepared=prep_f32))
    ref = window_attention_ref(x, params, window_size=window_size,
                               num_heads=num_heads, mask=mask)
    np.testing.assert_allclose(np.asarray(out), np.asarray(ref),
                               rtol=1e-2, atol=2e-4)

    # --- unmasked path ---
    out2 = jax.block_until_ready(
        window_attention(x, params, window_size=window_size,
                         num_heads=num_heads, mask=None, prepared=prep_f32))
    ref2 = window_attention_ref(x, params, window_size=window_size,
                                num_heads=num_heads, mask=None)
    np.testing.assert_allclose(np.asarray(out2), np.asarray(ref2),
                               rtol=1e-2, atol=2e-4)

    # --- masked path, bf16 MXU inputs (default on all gens; f32 accumulate) ---
    out3 = jax.block_until_ready(
        window_attention(x, params, window_size=window_size,
                         num_heads=num_heads, mask=mask, prepared=prep_bf16))
    np.testing.assert_allclose(np.asarray(out3), np.asarray(ref),
                               rtol=5e-2, atol=2e-3)

    print("KERNEL_OK")
</pallas_src>

<mosaic_0001>
module attributes {stable_mosaic.version = 11 : i64} {
  func.func @_window_attn_kernel(%arg0: i32, %arg1: memref<32x128xf32, #tpu.memory_space<vmem>>, %arg2: memref<128x384xf32, #tpu.memory_space<vmem>>, %arg3: memref<1x384xf32, #tpu.memory_space<vmem>>, %arg4: memref<128x128xf32, #tpu.memory_space<vmem>>, %arg5: memref<1x128xf32, #tpu.memory_space<vmem>>, %arg6: memref<32x16x16xf32, #tpu.memory_space<vmem>>, %arg7: memref<32x128xf32, #tpu.memory_space<vmem>>) attributes {dimension_semantics = [#tpu.dimension_semantics<parallel>], iteration_bounds = array<i64: 2>, scalar_prefetch = 0 : i64, scratch_operands = 0 : i64, tpu.core_type = #tpu.core_type<tc>, window_params = [{transform_indices = @transform_0, window_bounds = array<i64: 32, 128>}, {pipeline_mode = #tpu.pipeline_mode<synchronous>, transform_indices = @transform_1, window_bounds = array<i64: 128, 384>}, {pipeline_mode = #tpu.pipeline_mode<synchronous>, transform_indices = @transform_2, window_bounds = array<i64: 1, 384>}, {pipeline_mode = #tpu.pipeline_mode<synchronous>, transform_indices = @transform_3, window_bounds = array<i64: 128, 128>}, {pipeline_mode = #tpu.pipeline_mode<synchronous>, transform_indices = @transform_4, window_bounds = array<i64: 1, 128>}, {pipeline_mode = #tpu.pipeline_mode<synchronous>, transform_indices = @transform_5, window_bounds = array<i64: 32, 16, 16>}, {transform_indices = @transform_6, window_bounds = array<i64: 32, 128>}]} {
    %c0 = arith.constant 0 : index
    %c0_0 = arith.constant 0 : index
    %0 = vector.load %arg1[%c0, %c0_0] : memref<32x128xf32, #tpu.memory_space<vmem>>, vector<32x128xf32>
    %c0_1 = arith.constant 0 : index
    %c0_2 = arith.constant 0 : index
    %1 = vector.load %arg2[%c0_1, %c0_2] : memref<128x384xf32, #tpu.memory_space<vmem>>, vector<128x384xf32>
    %cst = arith.constant dense<0.000000e+00> : vector<32x384xf32>
    %2 = tpu.matmul %0, %1, %cst {dimension_numbers = #tpu.dot_dimension_numbers<[1], [0], [0], [1], [0, 0, 1, 1], [], []>} : vector<32x128xf32>, vector<128x384xf32>, vector<32x384xf32> -> vector<32x384xf32>
    %c0_3 = arith.constant 0 : index
    %c0_4 = arith.constant 0 : index
    %3 = vector.load %arg3[%c0_3, %c0_4] : memref<1x384xf32, #tpu.memory_space<vmem>>, vector<1x384xf32>
    %4 = vector.broadcast %3 : vector<1x384xf32> to vector<32x384xf32>
    %5 = arith.addf %2, %4 : vector<32x384xf32>
    %6 = vector.extract_strided_slice %5 {offsets = [0, 0], sizes = [32, 24], strides = [1, 1]} : vector<32x384xf32> to vector<32x24xf32>
    %7 = vector.shape_cast %6 : vector<32x24xf32> to vector<2x16x24xf32>
    %8 = vector.extract_strided_slice %5 {offsets = [0, 24], sizes = [32, 24], strides = [1, 1]} : vector<32x384xf32> to vector<32x24xf32>
    %9 = vector.shape_cast %8 : vector<32x24xf32> to vector<2x16x24xf32>
    %10 = vector.extract_strided_slice %5 {offsets = [0, 48], sizes = [32, 24], strides = [1, 1]} : vector<32x384xf32> to vector<32x24xf32>
    %11 = vector.shape_cast %10 : vector<32x24xf32> to vector<2x16x24xf32>
    %12 = vector.extract_strided_slice %5 {offsets = [0, 72], sizes = [32, 24], strides = [1, 1]} : vector<32x384xf32> to vector<32x24xf32>
    %13 = vector.shape_cast %12 : vector<32x24xf32> to vector<2x16x24xf32>
    %14 = vector.extract_strided_slice %5 {offsets = [0, 96], sizes = [32, 24], strides = [1, 1]} : vector<32x384xf32> to vector<32x24xf32>
    %15 = vector.shape_cast %14 : vector<32x24xf32> to vector<2x16x24xf32>
    %16 = vector.extract_strided_slice %5 {offsets = [0, 120], sizes = [32, 24], strides = [1, 1]} : vector<32x384xf32> to vector<32x24xf32>
    %17 = vector.shape_cast %16 : vector<32x24xf32> to vector<2x16x24xf32>
    %18 = vector.extract_strided_slice %5 {offsets = [0, 144], sizes = [32, 24], strides = [1, 1]} : vector<32x384xf32> to vector<32x24xf32>
    %19 = vector.shape_cast %18 : vector<32x24xf32> to vector<2x16x24xf32>
    %20 = vector.extract_strided_slice %5 {offsets = [0, 168], sizes = [32, 24], strides = [1, 1]} : vector<32x384xf32> to vector<32x24xf32>
    %21 = vector.shape_cast %20 : vector<32x24xf32> to vector<2x16x24xf32>
    %22 = vector.extract_strided_slice %5 {offsets = [0, 192], sizes = [32, 24], strides = [1, 1]} : vector<32x384xf32> to vector<32x24xf32>
    %23 = vector.shape_cast %22 : vector<32x24xf32> to vector<2x16x24xf32>
    %24 = vector.extract_strided_slice %5 {offsets = [0, 216], sizes = [32, 24], strides = [1, 1]} : vector<32x384xf32> to vector<32x24xf32>
    %25 = vector.shape_cast %24 : vector<32x24xf32> to vector<2x16x24xf32>
    %26 = vector.extract_strided_slice %5 {offsets = [0, 240], sizes = [32, 24], strides = [1, 1]} : vector<32x384xf32> to vector<32x24xf32>
    %27 = vector.shape_cast %26 : vector<32x24xf32> to vector<2x16x24xf32>
    %28 = vector.extract_strided_slice %5 {offsets = [0, 264], sizes = [32, 24], strides = [1, 1]} : vector<32x384xf32> to vector<32x24xf32>
    %29 = vector.shape_cast %28 : vector<32x24xf32> to vector<2x16x24xf32>
    %30 = vector.extract_strided_slice %5 {offsets = [0, 288], sizes = [32, 24], strides = [1, 1]} : vector<32x384xf32> to vector<32x24xf32>
    %31 = vector.shape_cast %30 : vector<32x24xf32> to vector<2x16x24xf32>
    %32 = vector.extract_strided_slice %5 {offsets = [0, 312], sizes = [32, 24], strides = [1, 1]} : vector<32x384xf32> to vector<32x24xf32>
    %33 = vector.shape_cast %32 : vector<32x24xf32> to vector<2x16x24xf32>
    %34 = vector.extract_strided_slice %5 {offsets = [0, 336], sizes = [32, 24], strides = [1, 1]} : vector<32x384xf32> to vector<32x24xf32>
    %35 = vector.shape_cast %34 : vector<32x24xf32> to vector<2x16x24xf32>
    %36 = vector.extract_strided_slice %5 {offsets = [0, 360], sizes = [32, 24], strides = [1, 1]} : vector<32x384xf32> to vector<32x24xf32>
    %37 = vector.shape_cast %36 : vector<32x24xf32> to vector<2x16x24xf32>
    %38 = tpu.concatenate %7, %9, %11, %13, %15, %17, %19, %21, %23, %25, %27, %29, %31, %33, %35, %37 in 0 : vector<2x16x24xf32>, vector<2x16x24xf32>, vector<2x16x24xf32>, vector<2x16x24xf32>, vector<2x16x24xf32>, vector<2x16x24xf32>, vector<2x16x24xf32>, vector<2x16x24xf32>, vector<2x16x24xf32>, vector<2x16x24xf32>, vector<2x16x24xf32>, vector<2x16x24xf32>, vector<2x16x24xf32>, vector<2x16x24xf32>, vector<2x16x24xf32>, vector<2x16x24xf32> -> vector<32x16x24xf32>
    %39 = vector.extract_strided_slice %38 {offsets = [0, 0, 0], sizes = [32, 16, 8], strides = [1, 1, 1]} : vector<32x16x24xf32> to vector<32x16x8xf32>
    %40 = vector.extract_strided_slice %38 {offsets = [0, 0, 8], sizes = [32, 16, 8], strides = [1, 1, 1]} : vector<32x16x24xf32> to vector<32x16x8xf32>
    %41 = vector.extract_strided_slice %38 {offsets = [0, 0, 16], sizes = [32, 16, 8], strides = [1, 1, 1]} : vector<32x16x24xf32> to vector<32x16x8xf32>
    "tpu.trace_start"() <{level = 10 : i32, message = "bqd,bkd->bqk"}> : () -> ()
    %cst_5 = arith.constant dense<0.000000e+00> : vector<32x16x16xf32>
    %42 = tpu.matmul %39, %40, %cst_5 {dimension_numbers = #tpu.dot_dimension_numbers<[2], [2], [1], [1], [0, 0, 0, 1, 1, 1], [0], [0]>} : vector<32x16x8xf32>, vector<32x16x8xf32>, vector<32x16x16xf32> -> vector<32x16x16xf32>
    "tpu.trace_stop"() : () -> ()
    %c0_6 = arith.constant 0 : index
    %c0_7 = arith.constant 0 : index
    %c0_8 = arith.constant 0 : index
    %43 = vector.load %arg6[%c0_6, %c0_7, %c0_8] : memref<32x16x16xf32, #tpu.memory_space<vmem>>, vector<32x16x16xf32>
    %44 = arith.addf %42, %43 : vector<32x16x16xf32>
    %cst_9 = arith.constant dense<0xFF800000> : vector<32x16xf32>
    %45 = vector.multi_reduction <maximumf>, %44, %cst_9 [2] : vector<32x16x16xf32> to vector<32x16xf32>
    %46 = vector.shape_cast %45 : vector<32x16xf32> to vector<32x16x1xf32>
    %47 = vector.broadcast %46 : vector<32x16x1xf32> to vector<32x16x16xf32>
    %48 = arith.subf %44, %47 : vector<32x16x16xf32>
    %49 = math.exp %48 : vector<32x16x16xf32>
    %cst_10 = arith.constant dense<0.000000e+00> : vector<32x16xf32>
    %50 = vector.multi_reduction <add>, %49, %cst_10 [2] : vector<32x16x16xf32> to vector<32x16xf32>
    %51 = vector.shape_cast %50 : vector<32x16xf32> to vector<32x16x1xf32>
    %52 = tpu.reciprocal %51 {approx = true} : vector<32x16x1xf32> -> vector<32x16x1xf32>
    %53 = vector.broadcast %52 : vector<32x16x1xf32> to vector<32x16x16xf32>
    %54 = arith.mulf %49, %53 : vector<32x16x16xf32>
    "tpu.trace_start"() <{level = 10 : i32, message = "bqk,bkd->bqd"}> : () -> ()
    %cst_11 = arith.constant dense<0.000000e+00> : vector<32x16x8xf32>
    %55 = tpu.matmul %54, %41, %cst_11 {dimension_numbers = #tpu.dot_dimension_numbers<[2], [1], [1], [2], [0, 0, 0, 1, 1, 2], [0], [0]>} : vector<32x16x16xf32>, vector<32x16x8xf32>, vector<32x16x8xf32> -> vector<32x16x8xf32>
    "tpu.trace_stop"() : () -> ()
    %56 = vector.extract_strided_slice %55 {offsets = [0, 0, 0], sizes = [2, 16, 8], strides = [1, 1, 1]} : vector<32x16x8xf32> to vector<2x16x8xf32>
    %57 = vector.shape_cast %56 : vector<2x16x8xf32> to vector<32x8xf32>
    %58 = vector.extract_strided_slice %55 {offsets = [2, 0, 0], sizes = [2, 16, 8], strides = [1, 1, 1]} : vector<32x16x8xf32> to vector<2x16x8xf32>
    %59 = vector.shape_cast %58 : vector<2x16x8xf32> to vector<32x8xf32>
    %60 = vector.extract_strided_slice %55 {offsets = [4, 0, 0], sizes = [2, 16, 8], strides = [1, 1, 1]} : vector<32x16x8xf32> to vector<2x16x8xf32>
    %61 = vector.shape_cast %60 : vector<2x16x8xf32> to vector<32x8xf32>
    %62 = vector.extract_strided_slice %55 {offsets = [6, 0, 0], sizes = [2, 16, 8], strides = [1, 1, 1]} : vector<32x16x8xf32> to vector<2x16x8xf32>
    %63 = vector.shape_cast %62 : vector<2x16x8xf32> to vector<32x8xf32>
    %64 = vector.extract_strided_slice %55 {offsets = [8, 0, 0], sizes = [2, 16, 8], strides = [1, 1, 1]} : vector<32x16x8xf32> to vector<2x16x8xf32>
    %65 = vector.shape_cast %64 : vector<2x16x8xf32> to vector<32x8xf32>
    %66 = vector.extract_strided_slice %55 {offsets = [10, 0, 0], sizes = [2, 16, 8], strides = [1, 1, 1]} : vector<32x16x8xf32> to vector<2x16x8xf32>
    %67 = vector.shape_cast %66 : vector<2x16x8xf32> to vector<32x8xf32>
    %68 = vector.extract_strided_slice %55 {offsets = [12, 0, 0], sizes = [2, 16, 8], strides = [1, 1, 1]} : vector<32x16x8xf32> to vector<2x16x8xf32>
    %69 = vector.shape_cast %68 : vector<2x16x8xf32> to vector<32x8xf32>
    %70 = vector.extract_strided_slice %55 {offsets = [14, 0, 0], sizes = [2, 16, 8], strides = [1, 1, 1]} : vector<32x16x8xf32> to vector<2x16x8xf32>
    %71 = vector.shape_cast %70 : vector<2x16x8xf32> to vector<32x8xf32>
    %72 = vector.extract_strided_slice %55 {offsets = [16, 0, 0], sizes = [2, 16, 8], strides = [1, 1, 1]} : vector<32x16x8xf32> to vector<2x16x8xf32>
    %73 = vector.shape_cast %72 : vector<2x16x8xf32> to vector<32x8xf32>
    %74 = vector.extract_strided_slice %55 {offsets = [18, 0, 0], sizes = [2, 16, 8], strides = [1, 1, 1]} : vector<32x16x8xf32> to vector<2x16x8xf32>
    %75 = vector.shape_cast %74 : vector<2x16x8xf32> to vector<32x8xf32>
    %76 = vector.extract_strided_slice %55 {offsets = [20, 0, 0], sizes = [2, 16, 8], strides = [1, 1, 1]} : vector<32x16x8xf32> to vector<2x16x8xf32>
    %77 = vector.shape_cast %76 : vector<2x16x8xf32> to vector<32x8xf32>
    %78 = vector.extract_strided_slice %55 {offsets = [22, 0, 0], sizes = [2, 16, 8], strides = [1, 1, 1]} : vector<32x16x8xf32> to vector<2x16x8xf32>
    %79 = vector.shape_cast %78 : vector<2x16x8xf32> to vector<32x8xf32>
    %80 = vector.extract_strided_slice %55 {offsets = [24, 0, 0], sizes = [2, 16, 8], strides = [1, 1, 1]} : vector<32x16x8xf32> to vector<2x16x8xf32>
    %81 = vector.shape_cast %80 : vector<2x16x8xf32> to vector<32x8xf32>
    %82 = vector.extract_strided_slice %55 {offsets = [26, 0, 0], sizes = [2, 16, 8], strides = [1, 1, 1]} : vector<32x16x8xf32> to vector<2x16x8xf32>
    %83 = vector.shape_cast %82 : vector<2x16x8xf32> to vector<32x8xf32>
    %84 = vector.extract_strided_slice %55 {offsets = [28, 0, 0], sizes = [2, 16, 8], strides = [1, 1, 1]} : vector<32x16x8xf32> to vector<2x16x8xf32>
    %85 = vector.shape_cast %84 : vector<2x16x8xf32> to vector<32x8xf32>
    %86 = vector.extract_strided_slice %55 {offsets = [30, 0, 0], sizes = [2, 16, 8], strides = [1, 1, 1]} : vector<32x16x8xf32> to vector<2x16x8xf32>
    %87 = vector.shape_cast %86 : vector<2x16x8xf32> to vector<32x8xf32>
    %88 = tpu.concatenate %57, %59, %61, %63, %65, %67, %69, %71, %73, %75, %77, %79, %81, %83, %85, %87 in 1 : vector<32x8xf32>, vector<32x8xf32>, vector<32x8xf32>, vector<32x8xf32>, vector<32x8xf32>, vector<32x8xf32>, vector<32x8xf32>, vector<32x8xf32>, vector<32x8xf32>, vector<32x8xf32>, vector<32x8xf32>, vector<32x8xf32>, vector<32x8xf32>, vector<32x8xf32>, vector<32x8xf32>, vector<32x8xf32> -> vector<32x128xf32>
    %c0_12 = arith.constant 0 : index
    %c0_13 = arith.constant 0 : index
    %89 = vector.load %arg4[%c0_12, %c0_13] : memref<128x128xf32, #tpu.memory_space<vmem>>, vector<128x128xf32>
    %cst_14 = arith.constant dense<0.000000e+00> : vector<32x128xf32>
    %90 = tpu.matmul %88, %89, %cst_14 {dimension_numbers = #tpu.dot_dimension_numbers<[1], [0], [0], [1], [0, 0, 1, 1], [], []>} : vector<32x128xf32>, vector<128x128xf32>, vector<32x128xf32> -> vector<32x128xf32>
    %c0_15 = arith.constant 0 : index
    %c0_16 = arith.constant 0 : index
    %91 = vector.load %arg5[%c0_15, %c0_16] : memref<1x128xf32, #tpu.memory_space<vmem>>, vector<1x128xf32>
    %92 = vector.broadcast %91 : vector<1x128xf32> to vector<32x128xf32>
    %93 = arith.addf %90, %92 : vector<32x128xf32>
    %c0_17 = arith.constant 0 : index
    %c0_18 = arith.constant 0 : index
    %94 = vector.load %arg7[%c0_17, %c0_18] : memref<32x128xf32, #tpu.memory_space<vmem>>, vector<32x128xf32>
    tpu.vector_store %arg7[%c0_17, %c0_18], %93 {strides = array<i32>} : memref<32x128xf32, #tpu.memory_space<vmem>>, vector<32x128xf32>,
    return
  }
  func.func @transform_0(%arg0: i32) -> (i32, i32) {
    %c0_i32 = arith.constant 0 : i32
    %c0_i32_0 = arith.constant 0 : i32
    return %arg0, %c0_i32 : i32, i32
  }
  func.func @transform_1(%arg0: i32) -> (i32, i32) {
    %c0_i32 = arith.constant 0 : i32
    %c0_i32_0 = arith.constant 0 : i32
    %c0_i32_1 = arith.constant 0 : i32
    return %c0_i32, %c0_i32_0 : i32, i32
  }
  func.func @transform_2(%arg0: i32) -> (i32, i32) {
    %c0_i32 = arith.constant 0 : i32
    %c0_i32_0 = arith.constant 0 : i32
    %c0_i32_1 = arith.constant 0 : i32
    return %c0_i32, %c0_i32_0 : i32, i32
  }
  func.func @transform_3(%arg0: i32) -> (i32, i32) {
    %c0_i32 = arith.constant 0 : i32
    %c0_i32_0 = arith.constant 0 : i32
    %c0_i32_1 = arith.constant 0 : i32
    return %c0_i32, %c0_i32_0 : i32, i32
  }
  func.func @transform_4(%arg0: i32) -> (i32, i32) {
    %c0_i32 = arith.constant 0 : i32
    %c0_i32_0 = arith.constant 0 : i32
    %c0_i32_1 = arith.constant 0 : i32
    return %c0_i32, %c0_i32_0 : i32, i32
  }
  func.func @transform_5(%arg0: i32) -> (i32, i32, i32) {
    %c0_i32 = arith.constant 0 : i32
    %c0_i32_0 = arith.constant 0 : i32
    %c0_i32_1 = arith.constant 0 : i32
    %c0_i32_2 = arith.constant 0 : i32
    return %c0_i32, %c0_i32_0, %c0_i32_1 : i32, i32, i32
  }
  func.func @transform_6(%arg0: i32) -> (i32, i32) {
    %c0_i32 = arith.constant 0 : i32
    %c0_i32_0 = arith.constant 0 : i32
    return %arg0, %c0_i32 : i32, i32
  }
}

</mosaic_0001>

<bundles_post_ra>
// kernel: tpu_custom_call.1
= control target key start
LH: loop header
LB: loop body
LE: loop exit
PB: predicated region body
PF: predicated region fallthrough
CT: control target
= control target key end

     0   :  { %11 = vsyncpa [#allocation3], 0  ;;  %s12133_s0 = inlined_call_operand.vmem [shape: f32[64,128], index: 0, kind: input, shape index: {}]   ;;  %s12134_s1 = inlined_call_operand.vmem [shape: f32[128,384], index: 1, kind: input, shape index: {}]   ;;  %s12135_s2 = inlined_call_operand.vmem [shape: f32[1,384], index: 2, kind: input, shape index: {}]   ;;  %s12136_s3 = inlined_call_operand.vmem [shape: f32[128,128], index: 3, kind: input, shape index: {}]   ;;  %s12137_s4 = inlined_call_operand.vmem [shape: f32[1,128], index: 4, kind: input, shape index: {}]   ;;  %s12138_s5 = inlined_call_operand.vmem [shape: f32[32,16,16], index: 5, kind: input, shape index: {}]   ;;  %s12139_s6 = inlined_call_operand.hbm [shape: f32[64,128], index: 6, kind: output, shape index: {}]  }
   0x1   :  { %13 = vsyncpa [#allocation3 + $0x1], 0  ;;  %s9832_s21 = smov 0   ;;  %s9834_s22 = smov 0  }
   0x2   :  { %s9836_s23 = smov 0   ;;  %s9838_s24 = smov 0  }
   0x3 LB: > { %s9853_s25 = sadd.s32 4294967295, %s9777_s24   ;;  %s7491_s26 = sadd.s32 4294967294, %s9777_s24   ;;  %s9777_s24 = sphi %s9838_s24, %s12384_s24   ;;  %s9773_s23 = sphi %s9836_s23, %s12383_s23   ;;  %s9769_s22 = sphi %s9834_s22, %s12382_s22   ;;  %s9765_s21 = sphi %s9832_s21, %s12381_s21  }
   0x4   : > { %s9857_s27 = sadd.s32 1, %s9777_s24   ;;  %s157_s28 = sadd.s32 1, %s9773_s23 }
   0x5   : > { %s154_s29 = ssub.s32 %s9777_s24, %s9857_s27  ;;  %p167_p0 = scmp.ne.s32.totalorder %s9773_s23, %s9769_s22 }
   0x6   : > { %p155_p1 = scmp.eq.s32.totalorder %s154_s29, 0  ;;  %p168_p2 = scmp.eq.s32.totalorder %s9853_s25, 1 }
   0x7   : > { %p173_p3 = scmp.ne.s32.totalorder %s9769_s22, %s9765_s21  ;;  %p174_p4 = scmp.eq.s32.totalorder %s7491_s26, 1 }
   0x8   : > { %s9868_s30 = scalar_select %p155_p1, %s9773_s23, %s157_s28  }
   0x9   : > { %p9870_p5 = por %p168_p2, %p167_p0  ;;  %p9874_p6 = por %p174_p4, %p173_p3 }
   0xa   : > { %p7494_p7 = scmp.ge.s32.totalorder %s9777_s24, 1  ;;  %p216_p8 = scmp.lt.s32.totalorder %s9777_s24, 3 }
   0xc   : > { %p217_p9 = pnand %p7494_p7, %p216_p8 }
   0xe   : > { %220 = sbr.rel (%p217_p9) target bundleno = 1875 (0x753), region = 44 }
  0x15   : > { %v258_v0 = vld [vmem:[%s12134_s1 + $0x8] sm:$0xff]  ;;  %v261_v1 = vld [vmem:[%s12134_s1 + $0x20] sm:$0xff]  ;;  %s7496_s15 = sshll.u32 %s9853_s25, 2  ;;  %v260_v4 = vld [vmem:[%s12134_s1 + $0x18] sm:$0xff]  ;;  %v9779_v7 = vmov 0.0   ;;  %vm552_vm0 = vcmask 64512  }
  0x16   : > { %v257_v2 = vld [vmem:[%s12134_s1] sm:$0xff]  ;;  %v8517_v3 = vpack.c.bf16 %v261_v1, %v258_v0  ;;  %v264_v5 = vld [vmem:[%s12134_s1 + $0x38] sm:$0xff]  ;;  %v267_v6 = vld [vmem:[%s12134_s1 + $0x50] sm:$0xff]  ;;  %386 = vmatprep.mubr.f32.mxu0 %v9779_v7  ;;  %p247_p10 = scmp.lt.s32.totalorder %s7496_s15, 7  ;;  %s9781_s13 = smov 8   ;;  %vm609_vm2 = vcmask 130048  }
  0x17   : > { %v8519_v8 = vpack.c.bf16 %v260_v4, %v257_v2  ;;  %v8521_v9 = vpack.c.bf16 %v267_v6, %v264_v5  ;;  %v263_v10 = vld [vmem:[%s12134_s1 + $0x30] sm:$0xff]  ;;  %v266_v11 = vld [vmem:[%s12134_s1 + $0x48] sm:$0xff]  ;;  %v273_v13 = vld [vmem:[%s12134_s1 + $0x80] sm:$0xff]  ;;  %s9783_s14 = smov 112   ;;  %s9784_s16 = smov 56   ;;  %vm7238_vm3 = vcmask 195584  }
  0x18   : > { %v270_v12 = vld [vmem:[%s12134_s1 + $0x68] sm:$0xff]  ;;  %8518 = vmatprep.subr.bf16.mxu0 %v8517_v3  ;;  %s12386_s15 = smov (!%p247_p10, %s7496_s15), 7  ;;  %v8523_v14 = vpack.c.bf16 %v266_v11, %v263_v10  ;;  %v269_v16 = vld [vmem:[%s12134_s1 + $0x60] sm:$0xff]  ;;  %v272_v17 = vld [vmem:[%s12134_s1 + $0x78] sm:$0xff]  ;;  %s9785_s17 = smov 64   ;;  %vm7243_vm4 = vcmask 261120  }
  0x19   : > { %8520 = vmatpush1.bf16.msra.mxu0 %v8519_v8  ;;  %v8525_v15 = vpack.c.bf16 %v273_v13, %v270_v12  ;;  %s7497_s20 = sshll.u32 %s12386_s15, 3  ;;  %v276_v18 = vld [vmem:[%s12134_s1 + $0x98] sm:$0xff]  ;;  %v279_v19 = vld [vmem:[%s12134_s1 + $0xb0] sm:$0xff]  ;;  %v8527_v20 = vpack.c.bf16 %v272_v17, %v269_v16  ;;  %v278_v23 = vld [vmem:[%s12134_s1 + $0xa8] sm:$0xff]  ;;  %s12168_s15 = smov 80   ;;  %vm7248_vm5 = vcmask 326656  }
  0x1a   : > { %8522 = vmatprep.subr.bf16.mxu0 %v8521_v9  ;;  %s9927_s12 = scalar_lea.vmem %s12133_s0, %s7497_s20  ;;  %v8529_v21 = vpack.c.bf16 %v279_v19, %v276_v18  ;;  %v275_v22 = vld [vmem:[%s12134_s1 + $0x90] sm:$0xff]  ;;  %v282_v24 = vld [vmem:[%s12134_s1 + $0xc8] sm:$0xff]  ;;  %v285_v25 = vld [vmem:[%s12134_s1 + $0xe0] sm:$0xff]  ;;  %s9786_s18 = smov 32   ;;  %vm7253_vm6 = vcmask 392192   ;;  %vm7258_vm7 = vcmask 457728  }
  0x1b   : > { %v9942_v26 = vld [vmem:[%s9927_s12] sm:$0xff]  ;;  %v259_v27 = vld [vmem:[%s12134_s1 + $0x10] sm:$0xff]  ;;  %v262_v28 = vld [vmem:[%s12134_s1 + $0x28] sm:$0xff]  ;;  %v8531_v29 = vpack.c.bf16 %v278_v23, %v275_v22  ;;  %v8533_v34 = vpack.c.bf16 %v285_v25, %v282_v24  ;;  %s12166_s19 = smov 88   ;;  %s9788_s20 = smov 40   ;;  %vm7263_vm8 = vcmask 523264  }
  0x1c   : > { %8025 = vmatprep.mubr.f32.mxu1 %v9942_v26  ;;  %v281_v30 = vld [vmem:[%s12134_s1 + $0xc0] sm:$0xff]  ;;  %v8549_v31 = vpack.c.bf16 %v262_v28, %v259_v27  ;;  %v268_v33 = vld [vmem:[%s12134_s1 + $0x58] sm:$0xff]  ;;  %v271_v37 = vld [vmem:[%s12134_s1 + $0x70] sm:$0xff]  ;;  %s12160_s26 = smov 120   ;;  %s9790_s28 = smov 16   ;;  %vm7268_vm9 = vcmask 588800  }
  0x1d   : > { %8524 = vmatpush1.bf16.msra.mxu0 %v8523_v14  ;;  %v265_v32 = vld [vmem:[%s12134_s1 + $0x40] sm:$0xff]  ;;  %v284_v35 = vld [vmem:[%s12134_s1 + $0xd8] sm:$0xff]  ;;  %v274_v38 = vld [vmem:[%s12134_s1 + $0x88] sm:$0xff]  ;;  %v307_v14 = vlaneseq  ;;  %s12164_s29 = smov 96   ;;  %s12170_s9 = smov 72   ;;  %vm7273_vm10 = vcmask 654336  }
  0x1e   : > { %8526 = vmatprep.subr.bf16.mxu0 %v8525_v15  ;;  %v8553_v36 = vpack.c.bf16 %v268_v33, %v265_v32  ;;  %v288_v39 = vld [vmem:[%s12134_s1 + $0xf8] sm:$0xff]  ;;  %v291_v40 = vld [vmem:[%s12134_s1 + $0x110] sm:$0xff]  ;;  %8550 = vmatprep.subr.bf16.mxu1 %v8549_v31  ;;  %v8535_v41 = vpack.c.bf16 %v284_v35, %v281_v30  ;;  %v8557_v43 = vpack.c.bf16 %v274_v38, %v271_v37  ;;  %v290_v45 = vld [vmem:[%s12134_s1 + $0x108] sm:$0xff]  ;;  %s9793_s10 = smov 48   ;;  %s9794_s11 = smov 24   ;;  %vm7278_vm11 = vcmask 719872  }
  0x1f   : > { %8552 = vmatpush3.bf16.msra.mxu1 %v8549_v31  ;;  %v287_v42 = vld [vmem:[%s12134_s1 + $0xf0] sm:$0xff]  ;;  %v8537_v44 = vpack.c.bf16 %v291_v40, %v288_v39  ;;  %v277_v46 = vld [vmem:[%s12134_s1 + $0xa0] sm:$0xff]  ;;  %v280_v47 = vld [vmem:[%s12134_s1 + $0xb8] sm:$0xff]  ;;  %v10042_v15 = vshrl.u32 %v307_v14, 7  ;;  %vm7283_vm12 = vcmask 785408   ;;  %vm7288_vm13 = vcmask 850944  }
  0x20   : > { %8554 = vmatprep.subr.bf16.mxu1 %v8553_v36  ;;  %v294_v48 = vld [vmem:[%s12134_s1 + $0x128] sm:$0xff]  ;;  %v297_v49 = vld [vmem:[%s12134_s1 + $0x140] sm:$0xff]  ;;  %v8539_v50 = vpack.c.bf16 %v290_v45, %v287_v42  ;;  %v8561_v52 = vpack.c.bf16 %v280_v47, %v277_v46  ;;  %v296_v54 = vld [vmem:[%s12134_s1 + $0x138] sm:$0xff]  ;;  %vm7298_vm14 = vcmask 982016   ;;  %vm7293_vm15 = vcmask 916480  }
  0x21   : > { %8528 = vmatpush1.bf16.msra.mxu0 %v8527_v20  ;;  %v293_v51 = vld [vmem:[%s12134_s1 + $0x120] sm:$0xff]  ;;  %v8541_v53 = vpack.c.bf16 %v297_v49, %v294_v48  ;;  %v283_v55 = vld [vmem:[%s12134_s1 + $0xd0] sm:$0xff]  ;;  %v286_v56 = vld [vmem:[%s12134_s1 + $0xe8] sm:$0xff]  ;;  %v309_v16 = vsub.s32 0, %v10042_v15  ;;  %v313_v18 = vsub.s32 1, %v10042_v15  ;;  %v317_v40 = vsub.s32 2, %v10042_v15 }
  0x22   : > { %8530 = vmatprep.subr.bf16.mxu0 %v8529_v21  ;;  %v300_v57 = vld [vmem:[%s12134_s1 + $0x158] sm:$0xff]  ;;  %v303_v58 = vld [vmem:[%s12134_s1 + $0x170] sm:$0xff]  ;;  %v8543_v59 = vpack.c.bf16 %v296_v54, %v293_v51  ;;  %v8565_v61 = vpack.c.bf16 %v286_v56, %v283_v55  ;;  %v302_v63 = vld [vmem:[%s12134_s1 + $0x168] sm:$0xff] }
  0x23   : > { %8556 = vmatpush3.bf16.msra.mxu1 %v8553_v36  ;;  %v299_v60 = vld [vmem:[%s12134_s1 + $0x150] sm:$0xff]  ;;  %v8545_v62 = vpack.c.bf16 %v303_v58, %v300_v57  ;;  %v289_v0 = vld [vmem:[%s12134_s1 + $0x100] sm:$0xff]  ;;  %v292_v1 = vld [vmem:[%s12134_s1 + $0x118] sm:$0xff] }
  0x24   : > { %8558 = vmatprep.subr.bf16.mxu1 %v8557_v43  ;;  %v8547_v2 = vpack.c.bf16 %v302_v63, %v299_v60  ;;  %v8569_v3 = vpack.c.bf16 %v292_v1, %v289_v0  ;;  %v295_v4 = vld [vmem:[%s12134_s1 + $0x130] sm:$0xff]  ;;  %v298_v5 = vld [vmem:[%s12134_s1 + $0x148] sm:$0xff]  ;;  %v301_v8 = vld [vmem:[%s12134_s1 + $0x160] sm:$0xff] }
  0x25   : > { %8532 = vmatpush1.bf16.msra.mxu0 %v8531_v29  ;;  %v8573_v6 = vpack.c.bf16 %v298_v5, %v295_v4  ;;  %v304_v9 = vld [vmem:[%s12134_s1 + $0x178] sm:$0xff]  ;;  %v254_v10 = vld [vmem:[%s9927_s12 + $0x8] sm:$0xff]  ;;  %v255_v12 = vld [vmem:[%s9927_s12 + $0x10] sm:$0xff] }
  0x26   : > { %8534 = vmatprep.subr.bf16.mxu0 %v8533_v34  ;;  %v8577_v11 = vpack.c.bf16 %v304_v9, %v301_v8  ;;  %v256_v13 = vld [vmem:[%s9927_s12 + $0x18] sm:$0xff]  ;;  %v10048_v17 = vld [vmem:[%s12135_s2] sm:$0x7]  ;;  %s12162_s12 = smov 104   ;;  %vm10200_vm1 = vmpackc.low %vm552_vm0, %vm552_vm0 }
  0x27   : > { %8560 = vmatpush3.bf16.msra.mxu1 %v8557_v43  ;;  %v310_v19 = vrot.slane %v10048_v17, %v309_v16  ;;  %v318_v42 = vrot.slane %v10048_v17, %v317_v40 }
  0x28   : > { %8562 = vmatprep.subr.bf16.mxu1 %v8561_v52 }
  0x29   : > { %8536 = vmatpush1.bf16.msra.mxu0 %v8535_v41 }
  0x2a   : > { %8538 = vmatprep.subr.bf16.mxu0 %v8537_v44 }
  0x2b   : > { %8564 = vmatpush3.bf16.msra.mxu1 %v8561_v52 }
  0x2c   : > { %8566 = vmatprep.subr.bf16.mxu1 %v8565_v61 }
  0x2d   : > { %8540 = vmatpush1.bf16.msra.mxu0 %v8539_v50 }
  0x2e   : > { %8542 = vmatprep.subr.bf16.mxu0 %v8541_v53 }
  0x2f   : > { %8568 = vmatpush3.bf16.msra.mxu1 %v8565_v61 }
  0x30   : > { %8570 = vmatprep.subr.bf16.mxu1 %v8569_v3 }
  0x31   : > { %8544 = vmatpush1.bf16.msra.mxu0 %v8543_v59 }
  0x32   : > { %8546 = vmatprep.subr.bf16.mxu0 %v8545_v62 }
  0x33   : > { %8572 = vmatpush3.bf16.msra.mxu1 %v8569_v3 }
  0x34   : > { %8574 = vmatprep.subr.bf16.mxu1 %v8573_v6 }
  0x35   : > { %8548 = vmatpush1.bf16.msra.mxu0 %v8547_v2 }
  0x37   : > { %8576 = vmatpush3.bf16.msra.mxu1 %v8573_v6 }
  0x38   : > { %387 = vmatmul.mubr.f32.vlgmr.msra.gmra.mrb[0].mxu0 %v9942_v26  ;;  %8578 = vmatprep.subr.bf16.mxu1 %v8577_v11 }
  0x39   : > { %392 = vmatprep.mubr.f32.mxu0 %v9779_v7 }
  0x3b   : > { %8580 = vmatpush3.bf16.msra.mxu1 %v8577_v11 }
  0x3c   : > { %393 = vmatmul.mubr.f32.gmra.mrb[2].mxu0 %v254_v10 }
  0x3d   : > { %398 = vmatprep.mubr.f32.mxu0 %v9779_v7 }
  0x3e   : > { %8026 = vmatmul.mubr.f32.vlgmr.msra.gmra.mrb[0].mxu1 %v254_v10 }
  0x3f   : > { %8028 = vmatprep.mubr.f32.mxu1 %v255_v12 }
  0x40   : > { %399 = vmatmul.mubr.f32.gmra.mrb[4].mxu0 %v255_v12 }
  0x41   : > { %404 = vmatprep.mubr.f32.mxu0 %v9779_v7  ;;  %v314_v7 = vrot.slane %v10048_v17, %v313_v18 }
  0x42   : > { %8029 = vmatmul.mubr.f32.gmra.mrb[2].mxu1 %v256_v13 }
  0x44   : > { %405 = vmatmul.mubr.f32.gmra.mrb[6].mxu0 %v256_v13 }
 0x10b   : > { %v388_v20 = vpop.f32.mrb[0].mxu0 }
 0x10c   : > { %v389_v21 = vadd.f32 %v388_v20, %v310_v19  ;;  %v390_v22 = vpop.f32.mrb[1].mxu0 }
 0x10d   : > { %v10053_v23 = vadd.f32 %v390_v22, %v314_v7 }
 0x10e   : > { %500 = vrot.lane.b32.xlu0 %v389_v21, %s12162_s12  ;;  %8035 = vmatprep.mubr.msk.f32.mxu1 %vm552_vm0, %v389_v21 }
 0x10f   : > { %v394_v24 = vpop.f32.mrb[2].mxu0  ;;  %538 = vrot.lane.b32.xlu1 %v10053_v23, %s9781_s13 }
 0x110   : > { %v396_v25 = vpop.f32.mrb[3].mxu0  ;;  %v10065_v32 = vadd.f32 %v394_v24, %v310_v19 }
 0x111   : > { %v8027_v28 = vpop.f32.mrb[0].mxu1  ;;  %v397_v36 = vadd.f32 %v396_v25, %v314_v7 }
 0x112   : > { %508 = vrot.lane.b32.xlu0 %v389_v21, %s12168_s15  ;;  %v477_v30 = vpop.f32.mrb[1].mxu1  ;;  %v10089_v38 = vpack.i.bf16 %v10065_v32, %v389_v21  ;;  %v10120_v44 = vadd.f32 %v8027_v28, %v318_v42 }
 0x113   : > { %557 = vrot.lane.b32.xlu1 %v10053_v23, %s9783_s14  ;;  %v400_v26 = vpop.f32.mrb[4].mxu0  ;;  %v10110_v43 = vadd.f32 %v477_v30, %v318_v42 }
 0x114   : > { %v402_v27 = vpop.f32.mrb[5].mxu0  ;;  %v10085_v37 = vadd.f32 %v400_v26, %v310_v19 }
 0x115   : > { %v8030_v34 = vpop.f32.mrb[2].mxu1  ;;  %v403_v39 = vadd.f32 %v402_v27, %v314_v7 }
 0x116   : > { %516 = vrot.lane.b32.xlu0 %v389_v21, %s9784_s16  ;;  %v487_v35 = vpop.f32.mrb[3].mxu1  ;;  %v10144_v47 = vadd.f32 %v8030_v34, %v318_v42 }
 0x117   : > { %573 = vrot.lane.b32.xlu1 %v10053_v23, %s9785_s17  ;;  %v406_v29 = vpop.f32.mrb[6].mxu0  ;;  %v10132_v45 = vadd.f32 %v487_v35, %v318_v42 }
 0x118   : > { %v408_v31 = vpop.f32.mrb[7].mxu0  ;;  %v10101_v41 = vadd.f32 %v406_v29, %v310_v19 }
 0x119   : > { %v409_v33 = vadd.f32 %v408_v31, %v314_v7 }
 0x11a   : > { %524 = vrot.lane.b32.xlu0 %v389_v21, %s9786_s18  ;;  %v10142_v46 = vpack.i.bf16 %v10101_v41, %v10085_v37 }
 0x11b   : > { %510 = vrot.lane.b32.xlu1 %v10065_v32, %s12168_s15 }
 0x11e   : > { %536 = vrot.lane.b32.xlu0 %v389_v21, %s9781_s13 }
 0x11f   : > { %518 = vrot.lane.b32.xlu1 %v10065_v32, %s9784_s16 }
 0x122   : > { %565 = vrot.lane.b32.xlu0 %v10053_v23, %s12166_s19 }
 0x123   : > { %526 = vrot.lane.b32.xlu1 %v10065_v32, %s9786_s18 }
 0x126   : > { %581 = vrot.lane.b32.xlu0 %v10053_v23, %s9788_s20 }
 0x127   : > { %542 = vrot.lane.b32.xlu1 %v397_v36, %s9781_s13 }
 0x12a   : > { %502 = vrot.lane.b32.xlu0 %v10065_v32, %s12162_s12 }
 0x12b   : > { %567 = vrot.lane.b32.xlu1 %v397_v36, %s12166_s19 }
 0x12e   : > { %540 = vrot.lane.b32.xlu0 %v10065_v32, %s9781_s13 }
 0x12f   : > { %583 = vrot.lane.b32.xlu1 %v397_v36, %s9788_s20 }
 0x132   : > { %8990 = vrot.lane.b32.xlu0 %v10089_v38, %s12160_s26 }
 0x133   : > { %504 = vrot.lane.b32.xlu1 %v10085_v37, %s12162_s12 }
 0x136   : > { %559 = vrot.lane.b32.xlu0 %v397_v36, %s9783_s14 }
 0x137   : > { %544 = vrot.lane.b32.xlu1 %v10085_v37, %s9781_s13 }
 0x13a   : > { %575 = vrot.lane.b32.xlu0 %v397_v36, %s9785_s17 }
 0x13b   : > { %569 = vrot.lane.b32.xlu1 %v403_v39, %s12166_s19 }
 0x13e   : > { %512 = vrot.lane.b32.xlu0 %v10085_v37, %s12168_s15 }
 0x13f   : > { %506 = vrot.lane.b32.xlu1 %v10101_v41, %s12162_s12  ;;  %s12379_s12 = smov 104  }
 0x142   : > { %520 = vrot.lane.b32.xlu0 %v10085_v37, %s9784_s16 }
 0x143   : > { %585 = vrot.lane.b32.xlu1 %v403_v39, %s9788_s20 }
 0x146   : > { %528 = vrot.lane.b32.xlu0 %v10085_v37, %s9786_s18 }
 0x147   : > { %595 = vrot.lane.b32.xlu1 %v10110_v43, %s9790_s28 }
 0x14a   : > { %546 = vrot.lane.b32.xlu0 %v403_v39, %s9781_s13 }
 0x14b   : > { %514 = vrot.lane.b32.xlu1 %v10101_v41, %s12168_s15  ;;  %s12380_s15 = smov 120  }
 0x14e   : > { %561 = vrot.lane.b32.xlu0 %v403_v39, %s9783_s14 }
 0x14f   : > { %599 = vrot.lane.b32.xlu1 %v10120_v44, %s9790_s28 }
 0x152   : > { %577 = vrot.lane.b32.xlu0 %v403_v39, %s9785_s17 }
 0x153   : > { %522 = vrot.lane.b32.xlu1 %v10101_v41, %s9784_s16 }
 0x156   : > { %593 = vrot.lane.b32.xlu0 %v10053_v23, %s9790_s28 }
 0x157   : > { %601 = vrot.lane.b32.xlu1 %v403_v39, %s9790_s28 }
 0x15a   : > { %597 = vrot.lane.b32.xlu0 %v397_v36, %s9790_s28 }
 0x15b   : > { %530 = vrot.lane.b32.xlu1 %v10101_v41, %s9786_s18 }
 0x15e   : > { %603 = vrot.lane.b32.xlu0 %v10132_v45, %s9790_s28 }
 0x15f   : > { %548 = vrot.lane.b32.xlu1 %v10101_v41, %s9781_s13 }
 0x162   : > { %550 = vrot.lane.b32.xlu0 %v409_v33, %s9781_s13 }
 0x163   : > { %8995 = vrot.lane.b32.xlu1 %v10142_v46, %s12160_s26 }
 0x166   : > { %607 = vrot.lane.b32.xlu0 %v10144_v47, %s9790_s28 }
 0x167   : > { %563 = vrot.lane.b32.xlu1 %v409_v33, %s9783_s14 }
 0x16a   : > { %571 = vrot.lane.b32.xlu0 %v409_v33, %s12166_s19 }
 0x16b   : > { %579 = vrot.lane.b32.xlu1 %v409_v33, %s9785_s17 }
 0x16e   : > { %587 = vrot.lane.b32.xlu0 %v409_v33, %s9788_s20 }
 0x16f   : > { %605 = vrot.lane.b32.xlu1 %v409_v33, %s9790_s28 }
 0x173   : > { %616 = vrot.lane.b32.xlu1 %v10120_v44, %s12160_s26 }
 0x177   : > { %618 = vrot.lane.b32.xlu1 %v10132_v45, %s12160_s26 }
 0x180   : > { %v10160_v48 = vpop.permute.xlu0 %500 }
 0x181   : > { %v539_v49 = vpop.permute.xlu1 %538 }
 0x184   : > { %v10162_v50 = vpop.permute.xlu0 %508 }
 0x185   : > { %v10164_v51 = vpop.permute.xlu1 %557 }
 0x188   : > { %v10166_v52 = vpop.permute.xlu0 %516 }
 0x189   : > { %v10168_v53 = vpop.permute.xlu1 %573 }
 0x18c   : > { %v10170_v54 = vpop.permute.xlu0 %524 }
 0x18d   : > { %v10172_v55 = vpop.permute.xlu1 %510 }
 0x18e   : > { %v10222_v14 = vpack.i.bf16 %v10172_v55, %v10162_v50 }
 0x190   : > { %v537_v56 = vpop.permute.xlu0 %536 }
 0x191   : > { %v10174_v57 = vpop.permute.xlu1 %518  ;;  %v10259_v22 = vsel %vm552_vm0, %v537_v56, %v539_v49 }
 0x192   : > { %v10233_v17 = vpack.i.bf16 %v10174_v57, %v10166_v52 }
 0x194   : > { %v10176_v58 = vpop.permute.xlu0 %565 }
 0x195   : > { %v10178_v59 = vpop.permute.xlu1 %526 }
 0x196   : > { %v10251_v20 = vpack.i.bf16 %v10178_v59, %v10170_v54 }
 0x198   : > { %v10180_v60 = vpop.permute.xlu0 %581 }
 0x199   : > { %v543_v61 = vpop.permute.xlu1 %542 }
 0x19c   : > { %v10182_v62 = vpop.permute.xlu0 %502 }
 0x19d   : > { %v10184_v63 = vpop.permute.xlu1 %567  ;;  %v10188_v0 = vpack.i.bf16 %v10182_v62, %v10160_v48 }
 0x19e   : > { %v10322_v49 = vpack.i.bf16 %v10184_v63, %v10176_v58 }
 0x19f   : > { %9000 = vrot.lane.b32.xlu0 %v10188_v0, %s12160_s26 }
 0x1a0   : > { %v541_v1 = vpop.permute.xlu0 %540  ;;  %12230 = vst [vmem:[#allocation6_spill] sm:$0xff] %v10322_v49 }
 0x1a1   : > { %v10192_v2 = vpop.permute.xlu1 %583  ;;  %v10254_v21 = vsel %vm552_vm0, %v541_v1, %v543_v61 }
 0x1a2   : > { %v10269_v25 = vpack.i.bf16 %v10254_v21, %v10259_v22 }
 0x1a3   : > { %614 = vrot.lane.b32.xlu0 %v10110_v43, %s12160_s26 }
 0x1a4   : > { %v8991_v3 = vpop.permute.xlu0 %8990 }
 0x1a5   : > { %v8993_v4 = vunpack.i.h.bf16 %v8991_v3  ;;  %v8992_v5 = vunpack.i.l.bf16 %v8991_v3  ;;  %v10196_v6 = vpop.permute.xlu1 %504 }
 0x1a7   : > { %v8581_v9 = vpack.c.bf16 %v8993_v4, %v8992_v5  ;;  %620 = vrot.lane.b32.xlu0 %v10144_v47, %s12160_s26 }
 0x1a8   : > { %v10206_v10 = vpop.permute.xlu0 %559 }
 0x1a9   : > { %v10208_v11 = vpop.permute.xlu1 %544  ;;  %8583 = vmatprep.subr.msk.bf16.mxu1 %vm10200_vm1, %v8581_v9  ;;  %v10296_v33 = vpack.i.bf16 %v10206_v10, %v10164_v51 }
 0x1aa   : > { %8586 = vmatpush3.bf16.xpose.msk.msra.mxu1 %vm10200_vm1, %v8581_v9 }
 0x1ab   : > { %622 = vrot.lane.b32.xlu0 %v10110_v43, %s12164_s29  ;;  %12229 = vst [vmem:[#allocation5_spill] sm:$0xff] %v10296_v33 }
 0x1ac   : > { %v10216_v12 = vpop.permute.xlu0 %575 }
 0x1ad   : > { %v10218_v13 = vpop.permute.xlu1 %569 }
 0x1af   : > { %9005 = vrot.lane.b32.xlu0 %v10222_v14, %s12160_s26 }
 0x1b0   : > { %v513_v15 = vpop.permute.xlu0 %512 }
 0x1b1   : > { %v10226_v16 = vpop.permute.xlu1 %506  ;;  %8036 = vmatmul.mubr.msk.f32.vlgmr.msra.gmra.mrb[4].mxu1 %vm552_vm0, %v10065_v32  ;;  %8070 = vmatprep.mubr.msk.f32.mxu0 %vm552_vm0, %v513_v15 }
 0x1b2   : > { %8042 = vmatprep.mubr.msk.f32.mxu1 %vm552_vm0, %v10085_v37  ;;  %v10239_v18 = vpack.i.bf16 %v10226_v16, %v10196_v6 }
 0x1b3   : > { %9010 = vrot.lane.b32.xlu0 %v10233_v17, %s12160_s26 }
 0x1b4   : > { %9020 = vrot.lane.b32.xlu1 %v10239_v18, %s12160_s26  ;;  %v10245_v19 = vpop.permute.xlu0 %520 }
 0x1b5   : > { %v10247_v7 = vpop.permute.xlu1 %585 }
 0x1b7   : > { %9015 = vrot.lane.b32.xlu0 %v10251_v20, %s12160_s26 }
 0x1b8   : > { %624 = vrot.lane.b32.xlu1 %v10120_v44, %s12164_s29  ;;  %v10263_v23 = vpop.permute.xlu0 %528 }
 0x1b9   : > { %v10265_v24 = vpop.permute.xlu1 %595 }
 0x1bb   : > { %9025 = vrot.lane.b32.xlu0 %v10269_v25, %s12160_s26 }
 0x1bc   : > { %626 = vrot.lane.b32.xlu1 %v10132_v45, %s12164_s29  ;;  %v547_v26 = vpop.permute.xlu0 %546 }
 0x1bd   : > { %v10275_v27 = vpop.permute.xlu1 %514 }
 0x1be   : > { %v10278_v28 = vpack.i.bf16 %v10275_v27, %v513_v15 }
 0x1bf   : > { %628 = vrot.lane.b32.xlu0 %v10144_v47, %s12164_s29 }
 0x1c0   : > { %9030 = vrot.lane.b32.xlu1 %v10278_v28, %s12160_s26  ;;  %v10284_v29 = vpop.permute.xlu0 %561 }
 0x1c1   : > { %v600_v30 = vpop.permute.xlu1 %599 }
 0x1c3   : > { %630 = vrot.lane.b32.xlu0 %v10110_v43, %s12170_s9 }
 0x1c4   : > { %632 = vrot.lane.b32.xlu1 %v10120_v44, %s12170_s9  ;;  %v10290_v31 = vpop.permute.xlu0 %577 }
 0x1c5   : > { %v10292_v32 = vpop.permute.xlu1 %522 }
 0x1c6   : > { %v10300_v34 = vpack.i.bf16 %v10292_v32, %v10245_v19 }
 0x1c7   : > { %9035 = vrot.lane.b32.xlu0 %v10296_v33, %s12160_s26 }
 0x1c8   : > { %9040 = vrot.lane.b32.xlu1 %v10300_v34, %s12160_s26  ;;  %v594_v35 = vpop.permute.xlu0 %593 }
 0x1c9   : > { %v602_v36 = vpop.permute.xlu1 %601 }
 0x1cb   : > { %636 = vrot.lane.b32.xlu0 %v10144_v47, %s12170_s9 }
 0x1cc   : > { %634 = vrot.lane.b32.xlu1 %v10132_v45, %s12170_s9  ;;  %v598_v37 = vpop.permute.xlu0 %597 }
 0x1cd   : > { %v10310_v39 = vpop.permute.xlu1 %530 }
 0x1ce   : > { %v10314_v40 = vpack.i.bf16 %v10310_v39, %v10263_v23 }
 0x1cf   : > { %638 = vrot.lane.b32.xlu0 %v10110_v43, %s9793_s10 }
 0x1d0   : > { %9045 = vrot.lane.b32.xlu1 %v10314_v40, %s12160_s26  ;;  %v604_v56 = vpop.permute.xlu0 %603 }
 0x1d1   : > { %v549_v42 = vpop.permute.xlu1 %548 }
 0x1d3   : > { %9060 = vrot.lane.b32.xlu0 %v10322_v49, %s12160_s26 }
 0x1d4   : > { %v551_v4 = vpop.permute.xlu0 %550 }
 0x1d5   : > { %v8996_v61 = vpop.permute.xlu1 %8995  ;;  %v10337_v33 = vsel %vm552_vm0, %v549_v42, %v551_v4 }
 0x1d6   : > { %v8998_v1 = vunpack.i.h.bf16 %v8996_v61  ;;  %v8997_v3 = vunpack.i.l.bf16 %v8996_v61  ;;  %v10347_v61 = vsel %vm552_vm0, %v10208_v11, %v547_v26  ;;  %v10371_v11 = vpack.i.bf16 %v10192_v2, %v10180_v60 }
 0x1d7   : > { %644 = vrot.lane.b32.xlu0 %v10144_v47, %s9793_s10  ;;  %v10355_v42 = vpack.i.bf16 %v10337_v33, %v10347_v61  ;;  %v10374_v26 = vsel %vm609_vm2, %v598_v37, %v600_v30 }
 0x1d8   : > { %v8587_v5 = vpack.c.bf16 %v8998_v1, %v8997_v3  ;;  %v10351_v1 = vpack.i.bf16 %v10216_v12, %v10168_v53  ;;  %12233 = vst [vmem:[#allocation9_spill] sm:$0xff] %v10371_v11 }
 0x1d9   : > { %v10328_v9 = vpop.permute.xlu1 %563  ;;  %12232 = vst [vmem:[#allocation8_spill] sm:$0xff] %v10355_v42 }
 0x1da   : > { %8589 = vmatprep.subr.msk.bf16.mxu1 %vm10200_vm1, %v8587_v5  ;;  %v10334_v15 = vpack.i.bf16 %v10328_v9, %v10284_v29  ;;  %12231 = vst [vmem:[#allocation7_spill] sm:$0xff] %v10351_v1 }
 0x1db   : > { %646 = vrot.lane.b32.xlu0 %v10110_v43, %s9794_s11  ;;  %8592 = vmatpush3.bf16.xpose.msk.msra.mxu1 %vm10200_vm1, %v8587_v5  ;;  %v608_v43 = vpop.permute.xlu0 %607 }
 0x1dc   : > { %9050 = vrot.lane.b32.xlu1 %v10334_v15, %s12160_s26 }
 0x1df   : > { %9070 = vrot.lane.b32.xlu0 %v10351_v1, %s12160_s26  ;;  %v10376_v3 = vpop.permute.xlu0 %571 }
 0x1e0   : > { %9055 = vrot.lane.b32.xlu1 %v10355_v42, %s12160_s26 }
 0x1e2   : > { %8043 = vmatmul.mubr.msk.f32.vlgmr.msra.gmra.mrb[6].mxu1 %vm552_vm0, %v10101_v41  ;;  %v10382_v41 = vsel %vm609_vm2, %v594_v35, %v10265_v24  ;;  %v10400_v24 = vpop.permute.xlu1 %579 }
 0x1e3   : > { %652 = vrot.lane.b32.xlu0 %v10144_v47, %s9794_s11  ;;  %8049 = vmatprep.mubr.msk.f32.mxu1 %vm552_vm0, %v10160_v48  ;;  %v10388_v47 = vpack.i.bf16 %v10374_v26, %v10382_v41  ;;  %v10392_v48 = vpack.i.bf16 %v10376_v3, %v10218_v13  ;;  %v10406_v30 = vpack.i.bf16 %v10400_v24, %v10290_v31  ;;  %v10408_v35 = vpop.permute.xlu0 %587 }
 0x1e4   : > { %640 = vrot.lane.b32.xlu1 %v10120_v44, %s9793_s10  ;;  %v10414_v4 = vpack.i.bf16 %v10408_v35, %v10247_v7 }
 0x1e5   : > { %12234 = vst [vmem:[#allocation10_spill] sm:$0xff] %v10388_v47  ;;  %12235 = vst [vmem:[#allocation11_spill] sm:$0xff] %v10406_v30 }
 0x1e6   : > { %v606_v37 = vpop.permute.xlu1 %605  ;;  %12236 = vst [vmem:[#allocation12_spill] sm:$0xff] %v10414_v4 }
 0x1e7   : > { %9080 = vrot.lane.b32.xlu0 %v10371_v11, %s12160_s26 }
 0x1e8   : > { %642 = vrot.lane.b32.xlu1 %v10132_v45, %s9793_s10 }
 0x1ea   : > { %v10430_v49 = vpop.permute.xlu1 %616 }
 0x1eb   : > { %9090 = vrot.lane.b32.xlu0 %v10388_v47, %s12160_s26  ;;  %12239 = vst [vmem:[#allocation15_spill] sm:$0xff] %v10430_v49 }
 0x1ec   : > { %9065 = vrot.lane.b32.xlu1 %v10392_v48, %s12160_s26 }
 0x1f0   : > { %648 = vrot.lane.b32.xlu1 %v10120_v44, %s9794_s11  ;;  %v10417_v44 = vsel %vm609_vm2, %v606_v37, %v608_v43 }
 0x1f1   : > { %12237 = vst [vmem:[#allocation13_spill] sm:$0xff] %v10417_v44 }
 0x1f4   : > { %650 = vrot.lane.b32.xlu1 %v10132_v45, %s9794_s11  ;;  %v10422_v45 = vsel %vm609_vm2, %v602_v36, %v604_v56  ;;  %v10444_v56 = vpop.permute.xlu1 %618 }
 0x1f5   : > { %v10426_v5 = vpack.i.bf16 %v10417_v44, %v10422_v45  ;;  %12241 = vst [vmem:[#allocation17_spill] sm:$0xff] %v10444_v56 }
 0x1f7   : > { %12238 = vst [vmem:[#allocation14_spill] sm:$0xff] %v10426_v5 }
 0x1f8   : > { %9075 = vrot.lane.b32.xlu1 %v10406_v30, %s12160_s26 }
 0x1fc   : > { %9085 = vrot.lane.b32.xlu1 %v10414_v4, %s12160_s26 }
 0x200   : > { %9095 = vrot.lane.b32.xlu1 %v10426_v5, %s12160_s26 }
 0x211   : > { %v9001_v47 = vpop.permute.xlu0 %9000 }
 0x212   : > { %v9003_v11 = vunpack.i.h.bf16 %v9001_v47  ;;  %v9002_v1 = vunpack.i.l.bf16 %v9001_v47 }
 0x214   : > { %v8593_v43 = vpack.c.bf16 %v9003_v11, %v9002_v1 }
 0x215   : > { %v10432_v37 = vpop.permute.xlu0 %614 }
 0x216   : > { %8595 = vmatprep.subr.msk.bf16.mxu1 %vm10200_vm1, %v8593_v43  ;;  %v10438_v36 = vpack.i.bf16 %v10430_v49, %v10432_v37 }
 0x217   : > { %8598 = vmatpush3.bf16.xpose.msk.msra.mxu1 %vm10200_vm1, %v8593_v43 }
 0x218   : > { %12240 = vst [vmem:[#allocation16_spill] sm:$0xff] %v10438_v36  ;;  %9100 = vrot.lane.b32.xlu0 %v10438_v36, %s12160_s26 }
 0x219   : > { %v10446_v47 = vpop.permute.xlu0 %620 }
 0x21a   : > { %12242 = vst [vmem:[#allocation18_spill] sm:$0xff] %v10446_v47  ;;  %v10450_v1 = vpack.i.bf16 %v10446_v47, %v10444_v56 }
 0x21c   : > { %12243 = vst [vmem:[#allocation19_spill] sm:$0xff] %v10450_v1  ;;  %9105 = vrot.lane.b32.xlu1 %v10450_v1, %s12160_s26 }
 0x21d   : > { %v10454_v11 = vpop.permute.xlu0 %622 }
 0x21e   : > { %12244 = vst [vmem:[#allocation20_spill] sm:$0xff] %v10454_v11  ;;  %8050 = vmatmul.mubr.msk.f32.vlgmr.msra.gmra.mrb[8].mxu1 %vm552_vm0, %v10182_v62 }
 0x21f   : > { %8056 = vmatprep.mubr.msk.f32.mxu1 %vm552_vm0, %v10196_v6 }
 0x221   : > { %v9006_v43 = vpop.permute.xlu0 %9005 }
 0x222   : > { %v9008_v49 = vunpack.i.h.bf16 %v9006_v43  ;;  %v9007_v4 = vunpack.i.l.bf16 %v9006_v43 }
 0x224   : > { %v8605_v1 = vpack.c.bf16 %v9008_v49, %v9007_v4 }
 0x225   : > { %v9011_v5 = vpop.permute.xlu0 %9010 }
 0x226   : > { %v9021_v36 = vpop.permute.xlu1 %9020  ;;  %v9013_v49 = vunpack.i.h.bf16 %v9011_v5  ;;  %v9012_v4 = vunpack.i.l.bf16 %v9011_v5 }
 0x227   : > { %v9023_v30 = vunpack.i.h.bf16 %v9021_v36  ;;  %v9022_v44 = vunpack.i.l.bf16 %v9021_v36 }
 0x229   : > { %v8599_v47 = vpack.c.bf16 %v9023_v30, %v9022_v44  ;;  %v9016_v56 = vpop.permute.xlu0 %9015 }
 0x22a   : > { %v10460_v42 = vpop.permute.xlu1 %624 }
 0x22b   : > { %12245 = vst [vmem:[#allocation21_spill] sm:$0xff] %v10460_v42  ;;  %8601 = vmatprep.subr.msk.bf16.mxu1 %vm10200_vm1, %v8599_v47  ;;  %v10466_v62 = vpack.i.bf16 %v10460_v42, %v10454_v11  ;;  %v8617_v42 = vpack.c.bf16 %v9013_v49, %v9012_v4  ;;  %v9018_v4 = vunpack.i.h.bf16 %v9016_v56 }
 0x22c   : > { %8604 = vmatpush3.bf16.xpose.msk.msra.mxu1 %vm10200_vm1, %v8599_v47 }
 0x22d   : > { %12246 = vst [vmem:[#allocation22_spill] sm:$0xff] %v10466_v62  ;;  %9110 = vrot.lane.b32.xlu0 %v10466_v62, %s12160_s26  ;;  %v9026_v6 = vpop.permute.xlu0 %9025  ;;  %8607 = vmatprep.subr.msk.bf16.mxu1 %vm10200_vm1, %v8605_v1 }
 0x22e   : > { %v10474_v30 = vpop.permute.xlu1 %626 }
 0x231   : > { %v10476_v44 = vpop.permute.xlu0 %628 }
 0x232   : > { %v9031_v36 = vpop.permute.xlu1 %9030  ;;  %v10480_v43 = vpack.i.bf16 %v10476_v44, %v10474_v30 }
 0x233   : > { %v9033_v47 = vunpack.i.h.bf16 %v9031_v36  ;;  %v9032_v11 = vunpack.i.l.bf16 %v9031_v36  ;;  %8057 = vmatmul.mubr.msk.f32.vlgmr.msra.gmra.mrb[10].mxu1 %vm552_vm0, %v10226_v16  ;;  %v9017_v36 = vunpack.i.l.bf16 %v9016_v56 }
 0x234   : > { %12247 = vst [vmem:[#allocation23_spill] sm:$0xff] %v10480_v43  ;;  %9115 = vrot.lane.b32.xlu1 %v10480_v43, %s12160_s26  ;;  %8610 = vmatpush3.bf16.xpose.msk.msra.mxu1 %vm10200_vm1, %v8605_v1 }
 0x235   : > { %v8611_v5 = vpack.c.bf16 %v9033_v47, %v9032_v11  ;;  %8063 = vmatprep.mubr.msk.f32.mxu1 %vm552_vm0, %v10162_v50  ;;  %v10490_v62 = vpop.permute.xlu0 %630  ;;  %8619 = vmatprep.subr.msk.bf16.mxu1 %vm10200_vm1, %v8617_v42  ;;  %v8629_v11 = vpack.c.bf16 %v9018_v4, %v9017_v36  ;;  %v9028_v4 = vunpack.i.h.bf16 %v9026_v6  ;;  %v9027_v36 = vunpack.i.l.bf16 %v9026_v6 }
 0x236   : > { %v10494_v49 = vpop.permute.xlu1 %632 }
 0x237   : > { %12248 = vst [vmem:[#allocation24_spill] sm:$0xff] %v10494_v49  ;;  %8613 = vmatprep.subr.msk.bf16.mxu0 %vm10200_vm1, %v8611_v5  ;;  %v10500_v16 = vpack.i.bf16 %v10494_v49, %v10490_v62 }
 0x238   : > { %8616 = vmatpush3.bf16.xpose.msk.msra.mxu0 %vm10200_vm1, %v8611_v5 }
 0x239   : > { %12249 = vst [vmem:[#allocation25_spill] sm:$0xff] %v10500_v16  ;;  %9120 = vrot.lane.b32.xlu0 %v10500_v16, %s12160_s26  ;;  %v9036_v50 = vpop.permute.xlu0 %9035  ;;  %v683_v16 = vld [vmem:[%s12138_s5 + $0xe8] sm:$0xff] }
 0x23a   : > { %v9041_v1 = vpop.permute.xlu1 %9040 }
 0x23b   : > { %v9043_v47 = vunpack.i.h.bf16 %v9041_v1  ;;  %v9042_v43 = vunpack.i.l.bf16 %v9041_v1  ;;  %8064 = vmatmul.mubr.msk.f32.vlgmr.msra.gmra.mrb[12].mxu1 %vm552_vm0, %v10172_v55 }
 0x23c   : > { %8622 = vmatpush3.bf16.xpose.msk.msra.mxu1 %vm10200_vm1, %v8617_v42  ;;  %8077 = vmatprep.mubr.msk.f32.mxu1 %vm552_vm0, %v10166_v52 }
 0x23d   : > { %v8623_v56 = vpack.c.bf16 %v9043_v47, %v9042_v43  ;;  %v10512_v49 = vpop.permute.xlu0 %636  ;;  %8631 = vmatprep.subr.msk.bf16.mxu1 %vm10200_vm1, %v8629_v11  ;;  %v9038_v47 = vunpack.i.h.bf16 %v9036_v50 }
 0x23e   : > { %v10516_v5 = vpop.permute.xlu1 %634 }
 0x23f   : > { %8071 = vmatmul.mubr.msk.f32.vlgmr.msra.gmra.mrb[8].mxu0 %vm552_vm0, %v10275_v27  ;;  %8625 = vmatprep.subr.msk.bf16.mxu0 %vm10200_vm1, %v8623_v56  ;;  %v10524_v55 = vpack.i.bf16 %v10512_v49, %v10516_v5  ;;  %v8641_v27 = vpack.c.bf16 %v9028_v4, %v9027_v36 }
 0x240   : > { %8628 = vmatpush3.bf16.xpose.msk.msra.mxu0 %vm10200_vm1, %v8623_v56  ;;  %8084 = vmatprep.mubr.msk.f32.mxu0 %vm552_vm0, %v10245_v19  ;;  %v9037_v56 = vunpack.i.l.bf16 %v9036_v50 }
 0x241   : > { %12250 = vst [vmem:[#allocation26_spill] sm:$0xff] %v10524_v55  ;;  %9125 = vrot.lane.b32.xlu1 %v10524_v55, %s12160_s26  ;;  %v10532_v52 = vpop.permute.xlu0 %638  ;;  %v682_v55 = vld [vmem:[%s12138_s5 + $0xe0] sm:$0xff] }
 0x242   : > { %v9046_v42 = vpop.permute.xlu1 %9045 }
 0x243   : > { %v9048_v6 = vunpack.i.h.bf16 %v9046_v42  ;;  %v9047_v43 = vunpack.i.l.bf16 %v9046_v42  ;;  %8078 = vmatmul.mubr.msk.f32.vlgmr.msra.gmra.mrb[14].mxu1 %vm552_vm0, %v10174_v57  ;;  %v8653_v57 = vpack.c.bf16 %v9038_v47, %v9037_v56 }
 0x244   : > { %8634 = vmatpush3.bf16.xpose.msk.msra.mxu1 %vm10200_vm1, %v8629_v11  ;;  %8091 = vmatprep.mubr.msk.f32.mxu1 %vm552_vm0, %v10170_v54 }
 0x245   : > { %v8635_v1 = vpack.c.bf16 %v9048_v6, %v9047_v43  ;;  %v9061_v19 = vpop.permute.xlu0 %9060  ;;  %8643 = vmatprep.subr.msk.bf16.mxu1 %vm10200_vm1, %v8641_v27 }
 0x246   : > { %v9063_v50 = vunpack.i.h.bf16 %v9061_v19  ;;  %v9062_v11 = vunpack.i.l.bf16 %v9061_v19 }
 0x247   : > { %8085 = vmatmul.mubr.msk.f32.vlgmr.msra.gmra.mrb[10].mxu0 %vm552_vm0, %v10292_v32  ;;  %8637 = vmatprep.subr.msk.bf16.mxu0 %vm10200_vm1, %v8635_v1 }
 0x248   : > { %8640 = vmatpush3.bf16.xpose.msk.msra.mxu0 %vm10200_vm1, %v8635_v1  ;;  %8098 = vmatprep.mubr.msk.f32.mxu0 %vm552_vm0, %v10263_v23  ;;  %v8665_v4 = vpack.c.bf16 %v9063_v50, %v9062_v11 }
 0x249   : > { %v10550_v54 = vpop.permute.xlu0 %644 }
 0x24b   : > { %8092 = vmatmul.mubr.msk.f32.vlgmr.msra.gmra.mrb[16].mxu1 %vm552_vm0, %v10178_v59 }
 0x24c   : > { %8646 = vmatpush3.bf16.xpose.msk.msra.mxu1 %vm10200_vm1, %v8641_v27  ;;  %8105 = vmatprep.mubr.msk.f32.mxu1 %vm552_vm0, %v10259_v22 }
 0x24d   : > { %v10558_v32 = vpop.permute.xlu0 %646  ;;  %8655 = vmatprep.subr.msk.bf16.mxu1 %vm10200_vm1, %v8653_v57 }
 0x24e   : > { %v9051_v23 = vpop.permute.xlu1 %9050 }
 0x24f   : > { %8099 = vmatmul.mubr.msk.f32.vlgmr.msra.gmra.mrb[12].mxu0 %vm552_vm0, %v10310_v39  ;;  %v9053_v42 = vunpack.i.h.bf16 %v9051_v23  ;;  %v9052_v27 = vunpack.i.l.bf16 %v9051_v23 }
 0x250   : > { %8112 = vmatprep.mubr.msk.f32.mxu0 %vm552_vm0, %v10347_v61 }
 0x251   : > { %v9071_v59 = vpop.permute.xlu0 %9070  ;;  %v8659_v1 = vpack.c.bf16 %v9053_v42, %v9052_v27 }
 0x252   : > { %v9056_v36 = vpop.permute.xlu1 %9055  ;;  %v9073_v19 = vunpack.i.h.bf16 %v9071_v59  ;;  %v9072_v47 = vunpack.i.l.bf16 %v9071_v59 }
 0x253   : > { %v9058_v22 = vunpack.i.h.bf16 %v9056_v36  ;;  %v9057_v6 = vunpack.i.l.bf16 %v9056_v36  ;;  %8106 = vmatmul.mubr.msk.f32.vlgmr.msra.gmra.mrb[18].mxu1 %vm552_vm0, %v10254_v21 }
 0x254   : > { %8658 = vmatpush3.bf16.xpose.msk.msra.mxu1 %vm10200_vm1, %v8653_v57  ;;  %8119 = vmatprep.mubr.msk.f32.mxu1 %vm552_vm0, %v10164_v51  ;;  %v8677_v56 = vpack.c.bf16 %v9073_v19, %v9072_v47 }
 0x255   : > { %v8647_v39 = vpack.c.bf16 %v9058_v22, %v9057_v6  ;;  %8667 = vmatprep.subr.msk.bf16.mxu1 %vm10200_vm1, %v8665_v4  ;;  %v10574_v61 = vpop.permute.xlu0 %652 }
 0x256   : > { %v10576_v43 = vpop.permute.xlu1 %640 }
 0x257   : > { %8649 = vmatprep.subr.msk.bf16.mxu0 %vm10200_vm1, %v8647_v39  ;;  %v10582_v21 = vpack.i.bf16 %v10576_v43, %v10532_v52 }
 0x258   : > { %8652 = vmatpush3.bf16.xpose.msk.msra.mxu0 %vm10200_vm1, %v8647_v39 }
 0x259   : > { %12251 = vst [vmem:[#allocation27_spill] sm:$0xff] %v10582_v21  ;;  %8661 = vmatprep.subr.msk.bf16.mxu0 %vm10200_vm1, %v8659_v1  ;;  %9130 = vrot.lane.b32.xlu0 %v10582_v21, %s12160_s26  ;;  %v9081_v50 = vpop.permute.xlu0 %9080 }
 0x25a   : > { %v10590_v51 = vpop.permute.xlu1 %642  ;;  %v9083_v23 = vunpack.i.h.bf16 %v9081_v50 }
 0x25b   : > { %8120 = vmatmul.mubr.msk.f32.vlgmr.msra.gmra.mrb[20].mxu1 %vm552_vm0, %v10206_v10  ;;  %v10596_v57 = vpack.i.bf16 %v10550_v54, %v10590_v51  ;;  %v9082_v10 = vunpack.i.l.bf16 %v9081_v50  ;;  %v12265_v50 = vld [vmem:[#allocation15_spill] sm:$0xff] }
 0x25c   : > { %8670 = vmatpush3.bf16.xpose.msk.msra.mxu1 %vm10200_vm1, %v8665_v4  ;;  %8133 = vmatprep.mubr.msk.f32.mxu1 %vm552_vm0, %v10176_v58 }
 0x25d   : > { %12252 = vst [vmem:[#allocation28_spill] sm:$0xff] %v10596_v57  ;;  %9135 = vrot.lane.b32.xlu1 %v10596_v57, %s12160_s26  ;;  %8679 = vmatprep.subr.msk.bf16.mxu1 %vm10200_vm1, %v8677_v56  ;;  %v8689_v42 = vpack.c.bf16 %v9083_v23, %v9082_v10  ;;  %v12267_v23 = vld [vmem:[#allocation18_spill] sm:$0xff] }
 0x25e   : > { %v9066_v11 = vpop.permute.xlu1 %9065 }
 0x25f   : > { %v9068_v59 = vunpack.i.h.bf16 %v9066_v11  ;;  %v9067_v36 = vunpack.i.l.bf16 %v9066_v11  ;;  %8113 = vmatmul.mubr.msk.f32.vlgmr.msra.gmra.mrb[14].mxu0 %vm552_vm0, %v10337_v33  ;;  %v12266_v11 = vld [vmem:[#allocation20_spill] sm:$0xff] }
 0x260   : > { %8664 = vmatpush3.bf16.xpose.msk.msra.mxu0 %vm10200_vm1, %v8659_v1  ;;  %8126 = vmatprep.mubr.msk.f32.mxu0 %vm552_vm0, %v10284_v29  ;;  %v9091_v29 = vpop.permute.xlu0 %9090 }
 0x261   : > { %v8671_v58 = vpack.c.bf16 %v9068_v59, %v9067_v36  ;;  %v9093_v22 = vunpack.i.h.bf16 %v9091_v29  ;;  %v9092_v6 = vunpack.i.l.bf16 %v9091_v29 }
 0x262   : > { %v10612_v4 = vpop.permute.xlu1 %648 }
 0x263   : > { %v10616_v27 = vpack.i.bf16 %v10612_v4, %v10558_v32  ;;  %8134 = vmatmul.mubr.msk.f32.vlgmr.msra.gmra.mrb[22].mxu1 %vm552_vm0, %v10184_v63  ;;  %8673 = vmatprep.subr.msk.bf16.mxu0 %vm10200_vm1, %v8671_v58 }
 0x264   : > { %8682 = vmatpush3.bf16.xpose.msk.msra.mxu1 %vm10200_vm1, %v8677_v56  ;;  %8147 = vmatprep.mubr.msk.f32.mxu1 %vm552_vm0, %v10168_v53  ;;  %v12264_v56 = vld [vmem:[#allocation10_spill] sm:$0xff] }
 0x265   : > { %12253 = vst [vmem:[#allocation29_spill] sm:$0xff] %v10616_v27  ;;  %9140 = vrot.lane.b32.xlu0 %v10616_v27, %s12160_s26  ;;  %8691 = vmatprep.subr.msk.bf16.mxu1 %vm10200_vm1, %v8689_v42 }
 0x266   : > { %v10630_v33 = vpop.permute.xlu1 %650 }
 0x267   : > { %v10634_v63 = vpack.i.bf16 %v10574_v61, %v10630_v33  ;;  %8127 = vmatmul.mubr.msk.f32.vlgmr.msra.gmra.mrb[16].mxu0 %vm552_vm0, %v10328_v9  ;;  %v8701_v9 = vpack.c.bf16 %v9093_v22, %v9092_v6 }
 0x268   : > { %8676 = vmatpush3.bf16.xpose.msk.msra.mxu0 %vm10200_vm1, %v8671_v58  ;;  %8140 = vmatprep.mubr.msk.f32.mxu0 %vm552_vm0, %v10218_v13 }
 0x269   : > { %12254 = vst [vmem:[#allocation30_spill] sm:$0xff] %v10634_v63  ;;  %9160 = vrot.lane.b32.xlu0 %v10188_v0, %s9783_s14  ;;  %9145 = vrot.lane.b32.xlu1 %v10634_v63, %s12160_s26  ;;  %s9795_s26 = smov [#allocation2]  }
 0x26a   : > { %v9076_v53 = vpop.permute.xlu1 %9075 }
 0x26b   : > { %v9078_v39 = vunpack.i.h.bf16 %v9076_v53  ;;  %v9077_v1 = vunpack.i.l.bf16 %v9076_v53  ;;  %8148 = vmatmul.mubr.msk.f32.vlgmr.msra.gmra.mrb[24].mxu1 %vm552_vm0, %v10216_v12 }
 0x26c   : > { %8694 = vmatpush3.bf16.xpose.msk.msra.mxu1 %vm10200_vm1, %v8689_v42  ;;  %8161 = vmatprep.mubr.msk.f32.mxu1 %vm552_vm0, %v10180_v60  ;;  %v654_v42 = vld [vmem:[%s12138_s5] sm:$0xff] }
 0x26d   : > { %v8683_v13 = vpack.c.bf16 %v9078_v39, %v9077_v1  ;;  %9170 = vrot.lane.b32.xlu0 %v10222_v14, %s9783_s14  ;;  %9150 = vrot.lane.b32.xlu1 %v10089_v38, %s9783_s14 }
 0x26e   : > { %8703 = vmatprep.subr.msk.bf16.mxu1 %vm10200_vm1, %v8701_v9  ;;  %v9086_v0 = vpop.permute.xlu1 %9085 }
 0x26f   : > { %v9088_v19 = vunpack.i.h.bf16 %v9086_v0  ;;  %v9087_v12 = vunpack.i.l.bf16 %v9086_v0  ;;  %8141 = vmatmul.mubr.msk.f32.vlgmr.msra.gmra.mrb[18].mxu0 %vm552_vm0, %v10376_v3  ;;  %8685 = vmatprep.subr.msk.bf16.mxu0 %vm10200_vm1, %v8683_v13  ;;  %v12261_v3 = vld [vmem:[#allocation12_spill] sm:$0xff] }
 0x270   : > { %8688 = vmatpush3.bf16.xpose.msk.msra.mxu0 %vm10200_vm1, %v8683_v13  ;;  %8154 = vmatprep.mubr.msk.f32.mxu0 %vm552_vm0, %v10290_v31  ;;  %v12259_v31 = vld [vmem:[#allocation11_spill] sm:$0xff]  ;;  %v12268_v13 = vld [vmem:[#allocation21_spill] sm:$0xff] }
 0x271   : > { %v8695_v60 = vpack.c.bf16 %v9088_v19, %v9087_v12  ;;  %9175 = vrot.lane.b32.xlu0 %v10278_v28, %s9783_s14  ;;  %9155 = vrot.lane.b32.xlu1 %v10142_v46, %s9783_s14  ;;  %v12258_v28 = vld [vmem:[#allocation17_spill] sm:$0xff]  ;;  %v655_v12 = vld [vmem:[%s12138_s5 + $0x8] sm:$0xff] }
 0x272   : > { %v9096_v38 = vpop.permute.xlu1 %9095 }
 0x273   : > { %v9098_v14 = vunpack.i.h.bf16 %v9096_v38  ;;  %v9097_v47 = vunpack.i.l.bf16 %v9096_v38  ;;  %8162 = vmatmul.mubr.msk.f32.vlgmr.msra.gmra.mrb[26].mxu1 %vm552_vm0, %v10192_v2  ;;  %8697 = vmatprep.subr.msk.bf16.mxu0 %vm10200_vm1, %v8695_v60 }
 0x274   : > { %8706 = vmatpush3.bf16.xpose.msk.msra.mxu1 %vm10200_vm1, %v8701_v9  ;;  %8175 = vmatprep.mubr.msk.f32.mxu1 %vm552_vm0, %v10382_v41  ;;  %v12262_v41 = vld [vmem:[#allocation7_spill] sm:$0xff] }
 0x275   : > { %9185 = vrot.lane.b32.xlu0 %v10300_v34, %s9783_s14  ;;  %9165 = vrot.lane.b32.xlu1 %v10239_v18, %s9783_s14  ;;  %v8707_v46 = vpack.c.bf16 %v9098_v14, %v9097_v47  ;;  %v12260_v34 = vld [vmem:[#allocation6_spill] sm:$0xff] }
 0x277   : > { %8155 = vmatmul.mubr.msk.f32.vlgmr.msra.gmra.mrb[20].mxu0 %vm552_vm0, %v10400_v24 }
 0x278   : > { %8700 = vmatpush3.bf16.xpose.msk.msra.mxu0 %vm10200_vm1, %v8695_v60  ;;  %8168 = vmatprep.mubr.msk.f32.mxu0 %vm552_vm0, %v10247_v7  ;;  %v12256_v7 = vld [vmem:[#allocation5_spill] sm:$0xff] }
 0x279   : > { %8709 = vmatprep.subr.msk.bf16.mxu0 %vm10200_vm1, %v8707_v46  ;;  %9195 = vrot.lane.b32.xlu0 %v10314_v40, %s9783_s14 }
 0x27a   : > { %9180 = vrot.lane.b32.xlu1 %v10233_v17, %s9783_s14  ;;  %v12255_v17 = vld [vmem:[#allocation8_spill] sm:$0xff] }
 0x27b   : > { %8176 = vmatmul.mubr.msk.f32.vlgmr.msra.gmra.mrb[28].mxu1 %vm552_vm0, %v10374_v26 }
 0x27c   : > { %8189 = vmatprep.mubr.msk.f32.mxu1 %vm552_vm0, %v10432_v37  ;;  %v12263_v37 = vld [vmem:[#allocation9_spill] sm:$0xff] }
 0x27d   : > { %9210 = vrot.lane.b32.xlu0 %v10334_v15, %s9783_s14 }
 0x27e   : > { %9190 = vrot.lane.b32.xlu1 %v10251_v20, %s9783_s14  ;;  %v12257_v20 = vld [vmem:[#allocation13_spill] sm:$0xff] }
 0x27f   : > { %8169 = vmatmul.mubr.msk.f32.vlgmr.msra.gmra.mrb[22].mxu0 %vm552_vm0, %v10408_v35 }
 0x280   : > { %8712 = vmatpush3.bf16.xpose.msk.msra.mxu0 %vm10200_vm1, %v8707_v46  ;;  %8182 = vmatprep.mubr.msk.f32.mxu0 %vm552_vm0, %v10422_v45 }
 0x281   : > { %9220 = vrot.lane.b32.xlu0 %v10392_v48, %s9783_s14 }
 0x282   : > { %9200 = vrot.lane.b32.xlu1 %v10269_v25, %s9783_s14 }
 0x284   : > { %v8037_v2 = vpop.f32.mrb[4].mxu1 }
 0x285   : > { %9230 = vrot.lane.b32.xlu0 %v12255_v17, %s9783_s14  ;;  %v796_v18 = vpop.f32.mrb[5].mxu1  ;;  %v10781_v47 = vadd.f32 %v8037_v2, %v655_v12 }
 0x286   : > { %9205 = vrot.lane.b32.xlu1 %v12256_v7, %s9783_s14  ;;  %v10755_v53 = vadd.f32 %v796_v18, %v654_v42  ;;  %v657_v18 = vld [vmem:[%s12138_s5 + $0x18] sm:$0xff] }
 0x287   : > { %8183 = vmatmul.mubr.msk.f32.vlgmr.msra.gmra.mrb[24].mxu0 %vm552_vm0, %v12257_v20  ;;  %v12269_v20 = vld [vmem:[#allocation24_spill] sm:$0xff]  ;;  %v3505_v2 = vsel %vm609_vm2, %v10781_v47, -inf }
 0x288   : > { %8196 = vmatprep.mubr.msk.f32.mxu0 %vm552_vm0, %v12258_v28  ;;  %v3502_v0 = vsel %vm609_vm2, %v10755_v53, -inf }
 0x289   : > { %9235 = vrot.lane.b32.xlu0 %v12259_v31, %s9783_s14 }
 0x28a   : > { %9215 = vrot.lane.b32.xlu1 %v12260_v34, %s9783_s14  ;;  %v9101_v25 = vpop.permute.xlu0 %9100 }
 0x28b   : > { %v9103_v40 = vunpack.i.h.bf16 %v9101_v25  ;;  %v9102_v15 = vunpack.i.l.bf16 %v9101_v25 }
 0x28d   : > { %v8713_v26 = vpack.c.bf16 %v9103_v40, %v9102_v15  ;;  %9245 = vrot.lane.b32.xlu0 %v12261_v3, %s9783_s14 }
 0x28e   : > { %9225 = vrot.lane.b32.xlu1 %v12262_v41, %s9783_s14  ;;  %v9106_v48 = vpop.permute.xlu1 %9105 }
 0x28f   : > { %v9108_v24 = vunpack.i.h.bf16 %v9106_v48  ;;  %v9107_v35 = vunpack.i.l.bf16 %v9106_v48  ;;  %8715 = vmatprep.subr.msk.bf16.mxu1 %vm10200_vm1, %v8713_v26 }
 0x290   : > { %8718 = vmatpush3.bf16.xpose.msk.msra.mxu1 %vm10200_vm1, %v8713_v26 }
 0x291   : > { %v8719_v45 = vpack.c.bf16 %v9108_v24, %v9107_v35 }
 0x292   : > { %9240 = vrot.lane.b32.xlu1 %v12263_v37, %s9783_s14 }
 0x293   : > { %8721 = vmatprep.subr.msk.bf16.mxu0 %vm10200_vm1, %v8719_v45 }
 0x294   : > { %8724 = vmatpush3.bf16.xpose.msk.msra.mxu0 %vm10200_vm1, %v8719_v45 }
 0x296   : > { %9250 = vrot.lane.b32.xlu1 %v12264_v56, %s9783_s14 }
 0x297   : > { %8190 = vmatmul.mubr.msk.f32.vlgmr.msra.gmra.mrb[30].mxu1 %vm552_vm0, %v12265_v50 }
 0x298   : > { %8203 = vmatprep.mubr.msk.f32.mxu1 %vm552_vm0, %v12266_v11 }
 0x29b   : > { %8197 = vmatmul.mubr.msk.f32.vlgmr.msra.gmra.mrb[26].mxu0 %vm552_vm0, %v12267_v23 }
 0x29c   : > { %8210 = vmatprep.mubr.msk.f32.mxu0 %vm552_vm0, %v10474_v30 }
 0x29f   : > { %v9111_v10 = vpop.permute.xlu0 %9110 }
 0x2a0   : > { %v9113_v59 = vunpack.i.h.bf16 %v9111_v10  ;;  %v9112_v36 = vunpack.i.l.bf16 %v9111_v10 }
 0x2a2   : > { %v8725_v58 = vpack.c.bf16 %v9113_v59, %v9112_v36 }
 0x2a4   : > { %8727 = vmatprep.subr.msk.bf16.mxu1 %vm10200_vm1, %v8725_v58 }
 0x2a5   : > { %8730 = vmatpush3.bf16.xpose.msk.msra.mxu1 %vm10200_vm1, %v8725_v58 }
 0x2a6   : > { %v9116_v29 = vpop.permute.xlu1 %9115 }
 0x2a7   : > { %v9118_v22 = vunpack.i.h.bf16 %v9116_v29  ;;  %v9117_v6 = vunpack.i.l.bf16 %v9116_v29 }
 0x2a9   : > { %v8731_v30 = vpack.c.bf16 %v9118_v22, %v9117_v6 }
 0x2ab   : > { %8733 = vmatprep.subr.msk.bf16.mxu0 %vm10200_vm1, %v8731_v30  ;;  %v9121_v39 = vpop.permute.xlu0 %9120 }
 0x2ac   : > { %v9123_v1 = vunpack.i.h.bf16 %v9121_v39  ;;  %v9122_v9 = vunpack.i.l.bf16 %v9121_v39  ;;  %8204 = vmatmul.mubr.msk.f32.vlgmr.msra.gmra.mrb[32].mxu1 %vm552_vm0, %v12268_v13  ;;  %8736 = vmatpush3.bf16.xpose.msk.msra.mxu0 %vm10200_vm1, %v8731_v30  ;;  %v659_v30 = vld [vmem:[%s12138_s5 + $0x28] sm:$0xff] }
 0x2ad   : > { %3503 = vmax.xlane.f32.xlu0 %v3502_v0  ;;  %8217 = vmatprep.mubr.msk.f32.mxu1 %vm552_vm0, %v10490_v62  ;;  %v656_v62 = vld [vmem:[%s12138_s5 + $0x10] sm:$0xff] }
 0x2ae   : > { %v8737_v19 = vpack.c.bf16 %v9123_v1, %v9122_v9 }
 0x2b0   : > { %8739 = vmatprep.subr.msk.bf16.mxu1 %vm10200_vm1, %v8737_v19 }
 0x2b1   : > { %8742 = vmatpush3.bf16.xpose.msk.msra.mxu1 %vm10200_vm1, %v8737_v19  ;;  %v661_v19 = vld [vmem:[%s12138_s5 + $0x38] sm:$0xff] }
 0x2b3   : > { %8211 = vmatmul.mubr.msk.f32.vlgmr.msra.gmra.mrb[28].mxu0 %vm552_vm0, %v10476_v44  ;;  %v9126_v60 = vpop.permute.xlu1 %9125 }
 0x2b4   : > { %v9128_v38 = vunpack.i.h.bf16 %v9126_v60  ;;  %v9127_v14 = vunpack.i.l.bf16 %v9126_v60  ;;  %8224 = vmatprep.mubr.msk.f32.mxu0 %vm552_vm0, %v10516_v5 }
 0x2b5   : > { %v8044_v46 = vpop.f32.mrb[6].mxu1 }
 0x2b6   : > { %v8743_v17 = vpack.c.bf16 %v9128_v38, %v9127_v14  ;;  %v883_v7 = vpop.f32.mrb[7].mxu1  ;;  %v10792_v5 = vadd.f32 %v8044_v46, %v657_v18  ;;  %v663_v46 = vld [vmem:[%s12138_s5 + $0x48] sm:$0xff]  ;;  %v662_v18 = vld [vmem:[%s12138_s5 + $0x40] sm:$0xff] }
 0x2b7   : > { %v10786_v44 = vadd.f32 %v883_v7, %v656_v62 }
 0x2b8   : > { %8218 = vmatmul.mubr.msk.f32.vlgmr.msra.gmra.mrb[34].mxu1 %vm552_vm0, %v12269_v20  ;;  %8745 = vmatprep.subr.msk.bf16.mxu0 %vm10200_vm1, %v8743_v17  ;;  %v3511_v31 = vsel %vm609_vm2, %v10792_v5, -inf }
 0x2b9   : > { %8748 = vmatpush3.bf16.xpose.msk.msra.mxu0 %vm10200_vm1, %v8743_v17  ;;  %8231 = vmatprep.mubr.msk.f32.mxu1 %vm552_vm0, %v10532_v52  ;;  %v3508_v28 = vsel %vm609_vm2, %v10786_v44, -inf }
 0x2ba   : > { %3506 = vmax.xlane.f32.xlu1 %v3505_v2  ;;  %3509 = vmax.xlane.f32.xlu0 %v3508_v28  ;;  %v665_v2 = vld [vmem:[%s12138_s5 + $0x58] sm:$0xff] }
 0x2be   : > { %3512 = vmax.xlane.f32.xlu1 %v3511_v31 }
 0x2c0   : > { %8225 = vmatmul.mubr.msk.f32.vlgmr.msra.gmra.mrb[30].mxu0 %vm552_vm0, %v10512_v49 }
 0x2c1   : > { %8238 = vmatprep.mubr.msk.f32.mxu0 %vm552_vm0, %v10590_v51 }
 0x2cb   : > { %v9131_v34 = vpop.permute.xlu0 %9130 }
 0x2cc   : > { %v9133_v52 = vunpack.i.h.bf16 %v9131_v34  ;;  %v9132_v25 = vunpack.i.l.bf16 %v9131_v34 }
 0x2ce   : > { %v8749_v40 = vpack.c.bf16 %v9133_v52, %v9132_v25  ;;  %v660_v52 = vld [vmem:[%s12138_s5 + $0x30] sm:$0xff] }
 0x2cf   : > { %v9136_v15 = vpop.permute.xlu1 %9135 }
 0x2d0   : > { %v9138_v26 = vunpack.i.h.bf16 %v9136_v15  ;;  %v9137_v3 = vunpack.i.l.bf16 %v9136_v15  ;;  %8751 = vmatprep.subr.msk.bf16.mxu1 %vm10200_vm1, %v8749_v40 }
 0x2d1   : > { %8754 = vmatpush3.bf16.xpose.msk.msra.mxu1 %vm10200_vm1, %v8749_v40 }
 0x2d2   : > { %v8755_v41 = vpack.c.bf16 %v9138_v26, %v9137_v3  ;;  %v667_v3 = vld [vmem:[%s12138_s5 + $0x68] sm:$0xff] }
 0x2d4   : > { %8757 = vmatprep.subr.msk.bf16.mxu0 %vm10200_vm1, %v8755_v41 }
 0x2d5   : > { %8760 = vmatpush3.bf16.xpose.msk.msra.mxu0 %vm10200_vm1, %v8755_v41 }
 0x2d7   : > { %v9141_v49 = vpop.permute.xlu0 %9140 }
 0x2d8   : > { %v9143_v51 = vunpack.i.h.bf16 %v9141_v49  ;;  %v9142_v48 = vunpack.i.l.bf16 %v9141_v49  ;;  %8232 = vmatmul.mubr.msk.f32.vlgmr.msra.gmra.mrb[36].mxu1 %vm552_vm0, %v10576_v43 }
 0x2d9   : > { %8245 = vmatprep.mubr.msk.f32.mxu1 %vm552_vm0, %v10558_v32 }
 0x2da   : > { %v8761_v24 = vpack.c.bf16 %v9143_v51, %v9142_v48  ;;  %v664_v48 = vld [vmem:[%s12138_s5 + $0x50] sm:$0xff] }
 0x2db   : > { %v9146_v35 = vpop.permute.xlu1 %9145  ;;  %v9161_v45 = vpop.permute.xlu0 %9160 }
 0x2dc   : > { %v9148_v37 = vunpack.i.h.bf16 %v9146_v35  ;;  %v9147_v56 = vunpack.i.l.bf16 %v9146_v35  ;;  %v9163_v50 = vunpack.i.h.bf16 %v9161_v45  ;;  %v9162_v11 = vunpack.i.l.bf16 %v9161_v45  ;;  %8239 = vmatmul.mubr.msk.f32.vlgmr.msra.gmra.mrb[32].mxu0 %vm552_vm0, %v10550_v54  ;;  %8763 = vmatprep.subr.msk.bf16.mxu1 %vm10200_vm1, %v8761_v24  ;;  %v666_v35 = vld [vmem:[%s12138_s5 + $0x60] sm:$0xff] }
 0x2dd   : > { %8766 = vmatpush3.bf16.xpose.msk.msra.mxu1 %vm10200_vm1, %v8761_v24  ;;  %8252 = vmatprep.mubr.msk.f32.mxu0 %vm552_vm0, %v10630_v33 }
 0x2de   : > { %v8767_v32 = vpack.c.bf16 %v9148_v37, %v9147_v56  ;;  %v8781_v59 = vpack.c.bf16 %v9163_v50, %v9162_v11 }
 0x2df   : > { %v9151_v43 = vpop.permute.xlu1 %9150  ;;  %v9171_v36 = vpop.permute.xlu0 %9170 }
 0x2e0   : > { %v9153_v23 = vunpack.i.h.bf16 %v9151_v43  ;;  %v9152_v10 = vunpack.i.l.bf16 %v9151_v43  ;;  %8769 = vmatprep.subr.msk.bf16.mxu0 %vm10200_vm1, %v8767_v32  ;;  %v9173_v42 = vunpack.i.h.bf16 %v9171_v36  ;;  %v9172_v29 = vunpack.i.l.bf16 %v9171_v36 }
 0x2e1   : > { %8772 = vmatpush3.bf16.xpose.msk.msra.mxu0 %vm10200_vm1, %v8767_v32 }
 0x2e2   : > { %8782 = vmatprep.subr.bf16.mxu0 %v8781_v59  ;;  %v8773_v54 = vpack.c.bf16 %v9153_v23, %v9152_v10  ;;  %v10839_v8 = vpack.c.bf16 %v9173_v42, %v9172_v29  ;;  %v669_v10 = vld [vmem:[%s12138_s5 + $0x78] sm:$0xff] }
 0x2e3   : > { %v9156_v58 = vpop.permute.xlu1 %9155  ;;  %v10863_v62 = vpop.permute.xlu0 %9175 }
 0x2e4   : > { %v9158_v22 = vunpack.i.h.bf16 %v9156_v58  ;;  %v9157_v6 = vunpack.i.l.bf16 %v9156_v58  ;;  %8246 = vmatmul.mubr.msk.f32.vlgmr.msra.gmra.mrb[38].mxu1 %vm552_vm0, %v10612_v4  ;;  %8774 = vmatprep.subr.bf16.mxu1 %v8773_v54  ;;  %12270 = vst [vmem:[#allocation8_spill] sm:$0xff] %v10839_v8  ;;  %v658_v4 = vld [vmem:[%s12138_s5 + $0x20] sm:$0xff] }
 0x2e5   : > { %8776 = vmatpush3.bf16.msra.mxu1 %v8773_v54  ;;  %v671_v54 = vld [vmem:[%s12138_s5 + $0x88] sm:$0xff] }
 0x2e6   : > { %v10834_v33 = vpack.c.bf16 %v9158_v22, %v9157_v6  ;;  %v668_v6 = vld [vmem:[%s12138_s5 + $0x70] sm:$0xff] }
 0x2e7   : > { %v10880_v34 = vpop.permute.xlu0 %9185  ;;  %v10885_v40 = vpop.permute.xlu1 %9165 }
 0x2e8   : > { %8253 = vmatmul.mubr.msk.f32.vlgmr.msra.gmra.mrb[34].mxu0 %vm552_vm0, %v10574_v61  ;;  %8778 = vmatprep.subr.bf16.mxu1 %v10834_v33  ;;  %12271 = vst [vmem:[#allocation5_spill] sm:$0xff] %v10880_v34 }
 0x2e9   : > { %8784 = vmatpush3.bf16.msra.mxu0 %v8781_v59 }
 0x2ea   : > { %8790 = vmatprep.subr.bf16.mxu0 %v10839_v8  ;;  %v690_v8 = vld [vmem:[%s12138_s5 + $0x120] sm:$0xff] }
 0x2eb   : > { %v10906_v56 = vpop.permute.xlu0 %9195 }
 0x2ec   : > { %12272 = vst [vmem:[#allocation13_spill] sm:$0xff] %v10906_v56  ;;  %v10908_v50 = vpop.permute.xlu1 %9180 }
 0x2ed   : > { %12273 = vst [vmem:[#allocation17_spill] sm:$0xff] %v10908_v50 }
 0x2ef   : > { %v10930_v22 = vpop.permute.xlu0 %9210 }
 0x2f0   : > { %12274 = vst [vmem:[#allocation11_spill] sm:$0xff] %v10930_v22  ;;  %v691_v22 = vld [vmem:[%s12138_s5 + $0x128] sm:$0xff] }
 0x2f1   : > { %v8051_v39 = vpop.f32.mrb[8].mxu1 }
 0x2f2   : > { %v10848_v1 = vadd.f32 %v8051_v39, %v659_v30  ;;  %v970_v9 = vpop.f32.mrb[9].mxu1  ;;  %v670_v39 = vld [vmem:[%s12138_s5 + $0x80] sm:$0xff] }
 0x2f3   : > { %v10850_v61 = vadd.f32 %v970_v9, %v658_v4  ;;  %v10938_v4 = vpop.permute.xlu1 %9190 }
 0x2f4   : > { %v3517_v13 = vsel %vm609_vm2, %v10848_v1, -inf  ;;  %12275 = vst [vmem:[#allocation6_spill] sm:$0xff] %v10938_v4 }
 0x2f5   : > { %3518 = vmax.xlane.f32.xlu0 %v3517_v13  ;;  %v3514_v0 = vsel %vm609_vm2, %v10850_v61, -inf }
 0x2f9   : > { %3515 = vmax.xlane.f32.xlu0 %v3514_v0 }
 0x306   : > { %v8058_v12 = vpop.f32.mrb[10].mxu1 }
 0x307   : > { %v10859_v60 = vadd.f32 %v8058_v12, %v661_v19  ;;  %v1057_v38 = vpop.f32.mrb[11].mxu1 }
 0x308   : > { %v10892_v41 = vadd.f32 %v1057_v38, %v660_v52 }
 0x309   : > { %v3523_v14 = vsel %vm609_vm2, %v10859_v60, -inf }
 0x30a   : > { %3524 = vmax.xlane.f32.xlu1 %v3523_v14  ;;  %v3520_v43 = vsel %vm609_vm2, %v10892_v41, -inf  ;;  %v673_v14 = vld [vmem:[%s12138_s5 + $0x98] sm:$0xff] }
 0x30e   : > { %v8065_v17 = vpop.f32.mrb[12].mxu1 }
 0x30f   : > { %v10871_v7 = vadd.f32 %v8065_v17, %v663_v46  ;;  %v1144_v20 = vpop.f32.mrb[13].mxu1 }
 0x310   : > { %v10876_v28 = vadd.f32 %v1144_v20, %v662_v18  ;;  %v10953_v18 = vpop.permute.xlu0 %9220  ;;  %v675_v20 = vld [vmem:[%s12138_s5 + $0xa8] sm:$0xff] }
 0x311   : > { %v3529_v31 = vsel %vm609_vm2, %v10871_v7, -inf  ;;  %12276 = vst [vmem:[#allocation12_spill] sm:$0xff] %v10953_v18 }
 0x312   : > { %v8072_v25 = vpop.f32.mrb[8].mxu0  ;;  %3530 = vmax.xlane.f32.xlu0 %v3529_v31  ;;  %v3526_v51 = vsel %vm609_vm2, %v10876_v28, -inf }
 0x313   : > { %v10887_v15 = vadd.f32 %v8072_v25, %v665_v2  ;;  %v1231_v26 = vpop.f32.mrb[9].mxu0  ;;  %v10958_v2 = vpop.permute.xlu1 %9200 }
 0x314   : > { %v10910_v11 = vadd.f32 %v1231_v26, %v664_v48  ;;  %12277 = vst [vmem:[#allocation7_spill] sm:$0xff] %v10958_v2  ;;  %v672_v26 = vld [vmem:[%s12138_s5 + $0x90] sm:$0xff] }
 0x315   : > { %v3535_v49 = vsel %vm609_vm2, %v10887_v15, -inf }
 0x316   : > { %3536 = vmax.xlane.f32.xlu1 %v3535_v49  ;;  %v8079_v24 = vpop.f32.mrb[14].mxu1  ;;  %3527 = vmax.xlane.f32.xlu0 %v3526_v51  ;;  %v3532_v42 = vsel %vm609_vm2, %v10910_v11, -inf  ;;  %v674_v49 = vld [vmem:[%s12138_s5 + $0xa0] sm:$0xff] }
 0x317   : > { %v10904_v45 = vadd.f32 %v8079_v24, %v667_v3  ;;  %v1318_v37 = vpop.f32.mrb[15].mxu1 }
 0x318   : > { %v10912_v32 = vadd.f32 %v1318_v37, %v666_v35 }
 0x319   : > { %v3541_v23 = vsel %vm609_vm2, %v10904_v45, -inf }
 0x31a   : > { %v8086_v59 = vpop.f32.mrb[10].mxu0  ;;  %3521 = vmax.xlane.f32.xlu1 %v3520_v43  ;;  %3542 = vmax.xlane.f32.xlu0 %v3541_v23  ;;  %v3538_v29 = vsel %vm609_vm2, %v10912_v32, -inf  ;;  %v10982_v23 = vpop.permute.xlu0 %9230 }
 0x31b   : > { %v1405_v36 = vpop.f32.mrb[11].mxu0  ;;  %v10924_v58 = vadd.f32 %v8086_v59, %v669_v10  ;;  %12278 = vst [vmem:[#allocation9_spill] sm:$0xff] %v10982_v23  ;;  %v10984_v10 = vpop.permute.xlu1 %9205 }
 0x31c   : > { %v10942_v0 = vadd.f32 %v1405_v36, %v668_v6  ;;  %12279 = vst [vmem:[#allocation10_spill] sm:$0xff] %v10984_v10  ;;  %v677_v6 = vld [vmem:[%s12138_s5 + $0xb8] sm:$0xff] }
 0x31d   : > { %v3547_v12 = vsel %vm609_vm2, %v10924_v58, -inf }
 0x31e   : > { %v8093_v30 = vpop.f32.mrb[16].mxu1  ;;  %3533 = vmax.xlane.f32.xlu1 %v3532_v42  ;;  %3539 = vmax.xlane.f32.xlu0 %v3538_v29  ;;  %v3544_v52 = vsel %vm609_vm2, %v10942_v0, -inf  ;;  %v10994_v29 = vpop.permute.xlu0 %9235 }
 0x31f   : > { %v10940_v9 = vadd.f32 %v8093_v30, %v671_v54  ;;  %v1492_v13 = vpop.f32.mrb[17].mxu1  ;;  %12280 = vst [vmem:[#allocation15_spill] sm:$0xff] %v10994_v29  ;;  %v10999_v30 = vpop.permute.xlu1 %9215  ;;  %v684_v29 = vld [vmem:[%s12138_s5 + $0xf0] sm:$0xff] }
 0x320   : > { %v10944_v19 = vadd.f32 %v1492_v13, %v670_v39  ;;  %12281 = vst [vmem:[#allocation20_spill] sm:$0xff] %v10999_v30  ;;  %v676_v13 = vld [vmem:[%s12138_s5 + $0xb0] sm:$0xff] }
 0x321   : > { %v3553_v38 = vsel %vm609_vm2, %v10940_v9, -inf }
 0x322   : > { %v8100_v46 = vpop.f32.mrb[12].mxu0  ;;  %3548 = vmax.xlane.f32.xlu1 %v3547_v12  ;;  %3554 = vmax.xlane.f32.xlu0 %v3553_v38  ;;  %v3550_v25 = vsel %vm609_vm2, %v10944_v19, -inf }
 0x323   : > { %v1579_v17 = vpop.f32.mrb[13].mxu0  ;;  %v10960_v31 = vadd.f32 %v8100_v46, %v673_v14 }
 0x324   : > { %v10974_v24 = vadd.f32 %v1579_v17, %v672_v26  ;;  %v11010_v17 = vpop.permute.xlu0 %9245  ;;  %v681_v26 = vld [vmem:[%s12138_s5 + $0xd8] sm:$0xff] }
 0x325   : > { %v3559_v37 = vsel %vm609_vm2, %v10960_v31, -inf  ;;  %12282 = vst [vmem:[#allocation18_spill] sm:$0xff] %v11010_v17 }
 0x326   : > { %v8107_v3 = vpop.f32.mrb[18].mxu1  ;;  %3545 = vmax.xlane.f32.xlu1 %v3544_v52  ;;  %3551 = vmax.xlane.f32.xlu0 %v3550_v25  ;;  %v3556_v59 = vsel %vm609_vm2, %v10974_v24, -inf  ;;  %v11014_v52 = vpop.permute.xlu1 %9225 }
 0x327   : > { %v10972_v51 = vadd.f32 %v8107_v3, %v675_v20  ;;  %v1666_v48 = vpop.f32.mrb[19].mxu1  ;;  %12283 = vst [vmem:[#allocation21_spill] sm:$0xff] %v11014_v52 }
 0x328   : > { %v10976_v35 = vadd.f32 %v1666_v48, %v674_v49 }
 0x329   : > { %v3565_v43 = vsel %vm609_vm2, %v10972_v51, -inf }
 0x32a   : > { %3560 = vmax.xlane.f32.xlu1 %v3559_v37  ;;  %3566 = vmax.xlane.f32.xlu0 %v3565_v43  ;;  %v3562_v36 = vsel %vm609_vm2, %v10976_v35, -inf  ;;  %v680_v37 = vld [vmem:[%s12138_s5 + $0xd0] sm:$0xff] }
 0x32e   : > { %v10990_v54 = vpop.f32.mrb[20].mxu1  ;;  %3557 = vmax.xlane.f32.xlu1 %v3556_v59  ;;  %3563 = vmax.xlane.f32.xlu0 %v3562_v36 }
 0x32f   : > { %v10992_v42 = vpop.f32.mrb[21].mxu1 }
 0x332   : > { %v8114_v39 = vpop.f32.mrb[14].mxu0 }
 0x333   : > { %v11004_v12 = vadd.f32 %v8114_v39, %v677_v6  ;;  %v1753_v38 = vpop.f32.mrb[15].mxu0  ;;  %v11029_v6 = vpop.permute.xlu1 %9240 }
 0x334   : > { %v11006_v14 = vadd.f32 %v1753_v38, %v676_v13  ;;  %12284 = vst [vmem:[#allocation24_spill] sm:$0xff] %v11029_v6 }
 0x335   : > { %v3571_v46 = vsel %vm609_vm2, %v11004_v12, -inf }
 0x336   : > { %v11012_v20 = vpop.f32.mrb[22].mxu1  ;;  %3572 = vmax.xlane.f32.xlu1 %v3571_v46  ;;  %v3568_v3 = vsel %vm609_vm2, %v11006_v14, -inf }
 0x337   : > { %v11016_v25 = vpop.f32.mrb[23].mxu1 }
 0x33a   : > { %v3504_v49 = vpop.xlane.xlu0 %3503  ;;  %v8128_v48 = vpop.f32.mrb[16].mxu0  ;;  %3569 = vmax.xlane.f32.xlu1 %v3568_v3 }
 0x33b   : > { %v3694_v43 = vsub.f32 %v10755_v53, %v3504_v49  ;;  %v11027_v59 = vadd.f32 %v8128_v48, %v681_v26  ;;  %v1927_v36 = vpop.f32.mrb[17].mxu0  ;;  %v11041_v49 = vpop.permute.xlu1 %9250 }
 0x33c   : > { %v11031_v13 = vadd.f32 %v1927_v36, %v680_v37  ;;  %12285 = vst [vmem:[#allocation31_spill] sm:$0xff] %v11041_v49  ;;  %v685_v37 = vld [vmem:[%s12138_s5 + $0xf8] sm:$0xff] }
 0x33d   : > { %v3758_v39 = vmul.f32 1.442695, %v3694_v43  ;;  %v3583_v38 = vsel %vm609_vm2, %v11027_v59, -inf }
 0x33e   : > { %v11035_v46 = vpop.f32.mrb[24].mxu1  ;;  %3584 = vmax.xlane.f32.xlu1 %v3583_v38  ;;  %v3580_v53 = vsel %vm609_vm2, %v11031_v13, -inf }
 0x33f   : > { %9459 = vpow2.f32 %v3758_v39  ;;  %v11037_v3 = vpop.f32.mrb[25].mxu1 }
 0x342   : > { %v8142_v26 = vpop.f32.mrb[18].mxu0  ;;  %3581 = vmax.xlane.f32.xlu1 %v3580_v53 }
 0x343   : > { %v2101_v48 = vpop.f32.mrb[19].mxu0  ;;  %v11053_v17 = vadd.f32 %v8142_v26, %v685_v37 }
 0x346   : > { %v11043_v43 = vpop.f32.mrb[26].mxu1 }
 0x347   : > { %v3507_v36 = vpop.xlane.xlu1 %3506  ;;  %v11048_v6 = vpop.f32.mrb[27].mxu1 }
 0x348   : > { %v3695_v39 = vsub.f32 %v10781_v47, %v3507_v36  ;;  %v3510_v38 = vpop.xlane.xlu0 %3509  ;;  %v11062_v36 = vadd.f32 %v2101_v48, %v684_v29 }
 0x349   : > { %v11051_v52 = vpop.eup %9459  ;;  %v3696_v49 = vsub.f32 %v10786_v44, %v3510_v38  ;;  %v3595_v44 = vsel %vm609_vm2, %v11053_v17, -inf }
 0x34a   : > { %v3760_v53 = vmul.f32 1.442695, %v3695_v39  ;;  %v8156_v30 = vpop.f32.mrb[20].mxu0  ;;  %v3886_v27 = vsel %vm609_vm2, %v11051_v52, 0.0 }
 0x34b   : > { %v3513_v21 = vpop.xlane.xlu1 %3512  ;;  %3887 = vadd.xlane.f32.xlu1 %v3886_v27  ;;  %v2275_v18 = vpop.f32.mrb[21].mxu0  ;;  %v3762_v26 = vmul.f32 1.442695, %v3696_v49  ;;  %v3592_v27 = vsel %vm609_vm2, %v11062_v36, -inf }
 0x34c   : > { %9461 = vpow2.f32 %v3760_v53  ;;  %v3697_v47 = vsub.f32 %v10792_v5, %v3513_v21  ;;  %v679_v5 = vld [vmem:[%s12138_s5 + $0xc8] sm:$0xff]  ;;  %v678_v53 = vld [vmem:[%s12138_s5 + $0xc0] sm:$0xff] }
 0x34d   : > { %v11078_v49 = vadd.f32 %v10990_v54, %v679_v5 }
 0x34e   : > { %v3764_v37 = vmul.f32 1.442695, %v3697_v47  ;;  %v11064_v39 = vpop.f32.mrb[28].mxu1 }
 0x34f   : > { %3596 = vmax.xlane.f32.xlu1 %v3595_v44  ;;  %v11068_v38 = vpop.f32.mrb[29].mxu1 }
 0x350   : > { %9463 = vpow2.f32 %v3764_v37  ;;  %v11088_v37 = vadd.f32 %v10992_v42, %v678_v53  ;;  %v11103_v42 = vadd.f32 %v11012_v20, %v683_v16  ;;  %v11118_v16 = vadd.f32 %v11016_v25, %v682_v55 }
 0x351   : > { %9465 = vpow2.f32 %v3762_v26 }
 0x352   : > { %v8170_v63 = vpop.f32.mrb[22].mxu0  ;;  %v3574_v10 = vsel %vm609_vm2, %v11088_v37, -inf  ;;  %v3589_v20 = vsel %vm609_vm2, %v11103_v42, -inf }
 0x353   : > { %3593 = vmax.xlane.f32.xlu1 %v3592_v27  ;;  %v2449_v21 = vpop.f32.mrb[23].mxu0  ;;  %v3577_v27 = vsel %vm609_vm2, %v11078_v49, -inf }
 0x356   : > { %v11075_v29 = vpop.eup %9461 }
 0x357   : > { %v3889_v48 = vsel %vm609_vm2, %v11075_v29, 0.0 }
 0x358   : > { %3890 = vadd.xlane.f32.xlu0 %v3889_v48  ;;  %v689_v48 = vld [vmem:[%s12138_s5 + $0x118] sm:$0xff] }
 0x359   : > { %v11105_v53 = vadd.f32 %v8156_v30, %v689_v48  ;;  %v687_v48 = vld [vmem:[%s12138_s5 + $0x108] sm:$0xff] }
 0x35a   : > { %v11085_v47 = vpop.eup %9463  ;;  %v8184_v26 = vpop.f32.mrb[24].mxu0  ;;  %v11133_v55 = vadd.f32 %v11035_v46, %v687_v48 }
 0x35b   : > { %v2623_v44 = vpop.f32.mrb[25].mxu0  ;;  %v3895_v54 = vsel %vm609_vm2, %v11085_v47, 0.0  ;;  %v11094_v5 = vpop.eup %9465 }
 0x35c   : > { %3578 = vmax.xlane.f32.xlu0 %v3577_v27  ;;  %3896 = vadd.xlane.f32.xlu1 %v3895_v54  ;;  %v3892_v57 = vsel %vm609_vm2, %v11094_v5, 0.0  ;;  %v688_v27 = vld [vmem:[%s12138_s5 + $0x110] sm:$0xff]  ;;  %v3607_v54 = vsel %vm609_vm2, %v11105_v53, -inf }
 0x35d   : > { %v11120_v30 = vadd.f32 %v2275_v18, %v688_v27  ;;  %v3586_v18 = vsel %vm609_vm2, %v11118_v16, -inf  ;;  %v686_v27 = vld [vmem:[%s12138_s5 + $0x100] sm:$0xff] }
 0x35f   : > { %v3604_v25 = vsel %vm609_vm2, %v11120_v30, -inf }
 0x360   : > { %3575 = vmax.xlane.f32.xlu0 %v3574_v10  ;;  %3893 = vadd.xlane.f32.xlu1 %v3892_v57  ;;  %v693_v10 = vld [vmem:[%s12138_s5 + $0x138] sm:$0xff] }
 0x361   : > { %v11135_v57 = vadd.f32 %v8170_v63, %v693_v10  ;;  %v11148_v63 = vadd.f32 %v11037_v3, %v686_v27  ;;  %v3601_v10 = vsel %vm609_vm2, %v11133_v55, -inf }
 0x363   : > { %v3619_v2 = vsel %vm609_vm2, %v11135_v57, -inf }
 0x364   : > { %3590 = vmax.xlane.f32.xlu0 %v3589_v20  ;;  %3608 = vmax.xlane.f32.xlu1 %v3607_v54  ;;  %v692_v20 = vld [vmem:[%s12138_s5 + $0x130] sm:$0xff] }
 0x365   : > { %v11150_v54 = vadd.f32 %v2449_v21, %v692_v20  ;;  %v11163_v21 = vadd.f32 %v11043_v43, %v691_v22  ;;  %v3598_v20 = vsel %vm609_vm2, %v11148_v63, -inf  ;;  %v11178_v22 = vadd.f32 %v11048_v6, %v690_v8 }
 0x367   : > { %v3616_v4 = vsel %vm609_vm2, %v11150_v54, -inf  ;;  %12286 = vst [vmem:[#allocation32_spill] sm:$0xff] %v11178_v22  ;;  %v3610_v6 = vsel %vm609_vm2, %v11178_v22, -inf }
 0x368   : > { %3587 = vmax.xlane.f32.xlu0 %v3586_v18  ;;  %3605 = vmax.xlane.f32.xlu1 %v3604_v25  ;;  %v697_v18 = vld [vmem:[%s12138_s5 + $0x158] sm:$0xff] }
 0x369   : > { %v11165_v25 = vadd.f32 %v8184_v26, %v697_v18  ;;  %v3613_v26 = vsel %vm609_vm2, %v11163_v21, -inf  ;;  %v695_v18 = vld [vmem:[%s12138_s5 + $0x148] sm:$0xff] }
 0x36a   : > { %v8191_v46 = vpop.f32.mrb[30].mxu1  ;;  %v11193_v8 = vadd.f32 %v11064_v39, %v695_v18 }
 0x36b   : > { %v2710_v48 = vpop.f32.mrb[31].mxu1 }
 0x36c   : > { %3602 = vmax.xlane.f32.xlu0 %v3601_v10  ;;  %3620 = vmax.xlane.f32.xlu1 %v3619_v2  ;;  %v696_v2 = vld [vmem:[%s12138_s5 + $0x150] sm:$0xff]  ;;  %v3631_v10 = vsel %vm609_vm2, %v11165_v25, -inf  ;;  %12288 = vst [vmem:[#allocation34_spill] sm:$0xff] %v11193_v8 }
 0x36d   : > { %v11180_v43 = vadd.f32 %v2623_v44, %v696_v2  ;;  %v694_v2 = vld [vmem:[%s12138_s5 + $0x140] sm:$0xff] }
 0x36e   : > { %v8198_v3 = vpop.f32.mrb[26].mxu0  ;;  %v11208_v39 = vadd.f32 %v11068_v38, %v694_v2 }
 0x36f   : > { %v2797_v27 = vpop.f32.mrb[27].mxu0  ;;  %12287 = vst [vmem:[#allocation33_spill] sm:$0xff] %v11180_v43  ;;  %v3628_v44 = vsel %vm609_vm2, %v11180_v43, -inf  ;;  %v715_v43 = vld [vmem:[%s12138_s5 + $0x1e8] sm:$0xff] }
 0x370   : > { %3599 = vmax.xlane.f32.xlu0 %v3598_v20  ;;  %3617 = vmax.xlane.f32.xlu1 %v3616_v4  ;;  %v701_v20 = vld [vmem:[%s12138_s5 + $0x178] sm:$0xff]  ;;  %12290 = vst [vmem:[#allocation36_spill] sm:$0xff] %v11208_v39  ;;  %v3622_v38 = vsel %vm609_vm2, %v11208_v39, -inf }
 0x371   : > { %v11195_v4 = vadd.f32 %v8198_v3, %v701_v20  ;;  %v699_v20 = vld [vmem:[%s12138_s5 + $0x168] sm:$0xff] }
 0x372   : > { %v11219_v23 = vadd.f32 %v8191_v46, %v699_v20 }
 0x373   : > { %12289 = vst [vmem:[#allocation35_spill] sm:$0xff] %v11195_v4  ;;  %v3643_v18 = vsel %vm609_vm2, %v11195_v4, -inf }
 0x374   : > { %3614 = vmax.xlane.f32.xlu0 %v3613_v26  ;;  %3632 = vmax.xlane.f32.xlu1 %v3631_v10  ;;  %v700_v26 = vld [vmem:[%s12138_s5 + $0x170] sm:$0xff]  ;;  %v3625_v10 = vsel %vm609_vm2, %v11193_v8, -inf  ;;  %12292 = vst [vmem:[#allocation38_spill] sm:$0xff] %v11219_v23  ;;  %v3637_v46 = vsel %vm609_vm2, %v11219_v23, -inf }
 0x375   : > { %v11210_v3 = vadd.f32 %v2797_v27, %v700_v26 }
 0x377   : > { %12291 = vst [vmem:[#allocation37_spill] sm:$0xff] %v11210_v3  ;;  %v3640_v27 = vsel %vm609_vm2, %v11210_v3, -inf }
 0x378   : > { %3611 = vmax.xlane.f32.xlu0 %v3610_v6  ;;  %3629 = vmax.xlane.f32.xlu1 %v3628_v44  ;;  %v698_v44 = vld [vmem:[%s12138_s5 + $0x160] sm:$0xff] }
 0x379   : > { %v11228_v26 = vadd.f32 %v2710_v48, %v698_v44 }
 0x37b   : > { %12293 = vst [vmem:[#allocation39_spill] sm:$0xff] %v11228_v26  ;;  %v3634_v50 = vsel %vm609_vm2, %v11228_v26, -inf  ;;  %v712_v26 = vld [vmem:[%s12138_s5 + $0x1d0] sm:$0xff] }
 0x37c   : > { %3626 = vmax.xlane.f32.xlu0 %v3625_v10  ;;  %3644 = vmax.xlane.f32.xlu1 %v3643_v18  ;;  %v703_v10 = vld [vmem:[%s12138_s5 + $0x188] sm:$0xff]  ;;  %v705_v18 = vld [vmem:[%s12138_s5 + $0x198] sm:$0xff] }
 0x37f   : > { %v8205_v6 = vpop.f32.mrb[32].mxu1 }
 0x380   : > { %3623 = vmax.xlane.f32.xlu0 %v3622_v38  ;;  %3641 = vmax.xlane.f32.xlu1 %v3640_v27  ;;  %v2884_v2 = vpop.f32.mrb[33].mxu1  ;;  %v704_v38 = vld [vmem:[%s12138_s5 + $0x190] sm:$0xff]  ;;  %v11241_v27 = vadd.f32 %v8205_v6, %v703_v10 }
 0x382   : > { %12294 = vst [vmem:[#allocation40_spill] sm:$0xff] %v11241_v27  ;;  %v3649_v10 = vsel %vm609_vm2, %v11241_v27, -inf }
 0x384   : > { %3638 = vmax.xlane.f32.xlu0 %v3637_v46  ;;  %v702_v46 = vld [vmem:[%s12138_s5 + $0x180] sm:$0xff] }
 0x385   : > { %v11254_v23 = vadd.f32 %v2884_v2, %v702_v46  ;;  %v706_v2 = vld [vmem:[%s12138_s5 + $0x1a0] sm:$0xff] }
 0x386   : > { %v8212_v20 = vpop.f32.mrb[28].mxu0 }
 0x387   : > { %v11243_v48 = vadd.f32 %v8212_v20, %v705_v18  ;;  %v2971_v44 = vpop.f32.mrb[29].mxu0  ;;  %12297 = vst [vmem:[#allocation43_spill] sm:$0xff] %v11254_v23  ;;  %v707_v18 = vld [vmem:[%s12138_s5 + $0x1a8] sm:$0xff] }
 0x388   : > { %3635 = vmax.xlane.f32.xlu0 %v3634_v50  ;;  %v11250_v56 = vadd.f32 %v2971_v44, %v704_v38  ;;  %v709_v44 = vld [vmem:[%s12138_s5 + $0x1b8] sm:$0xff] }
 0x389   : > { %12295 = vst [vmem:[#allocation41_spill] sm:$0xff] %v11243_v48  ;;  %v3655_v34 = vsel %vm609_vm2, %v11243_v48, -inf }
 0x38a   : > { %12296 = vst [vmem:[#allocation42_spill] sm:$0xff] %v11250_v56  ;;  %3656 = vmax.xlane.f32.xlu1 %v3655_v34  ;;  %v3652_v50 = vsel %vm609_vm2, %v11250_v56, -inf  ;;  %v3646_v34 = vsel %vm609_vm2, %v11254_v23, -inf }
 0x38b   : > { %v8219_v6 = vpop.f32.mrb[34].mxu1 }
 0x38c   : > { %3650 = vmax.xlane.f32.xlu0 %v3649_v10  ;;  %v3058_v20 = vpop.f32.mrb[35].mxu1  ;;  %v11263_v38 = vadd.f32 %v8219_v6, %v707_v18  ;;  %v708_v6 = vld [vmem:[%s12138_s5 + $0x1b0] sm:$0xff] }
 0x38d   : > { %v11273_v46 = vadd.f32 %v3058_v20, %v706_v2 }
 0x38e   : > { %3653 = vmax.xlane.f32.xlu1 %v3652_v50  ;;  %12298 = vst [vmem:[#allocation44_spill] sm:$0xff] %v11263_v38  ;;  %v3661_v50 = vsel %vm609_vm2, %v11263_v38, -inf }
 0x38f   : > { %12299 = vst [vmem:[#allocation45_spill] sm:$0xff] %v11273_v46  ;;  %v3658_v20 = vsel %vm609_vm2, %v11273_v46, -inf }
 0x390   : > { %3647 = vmax.xlane.f32.xlu0 %v3646_v34 }
 0x393   : > { %v8226_v10 = vpop.f32.mrb[30].mxu0 }
 0x394   : > { %v11280_v18 = vadd.f32 %v8226_v10, %v709_v44  ;;  %3662 = vmax.xlane.f32.xlu0 %v3661_v50  ;;  %v3145_v23 = vpop.f32.mrb[31].mxu0  ;;  %v3519_v10 = vpop.xlane.xlu0 %3518 }
 0x395   : > { %v11282_v56 = vadd.f32 %v3145_v23, %v708_v6  ;;  %v711_v23 = vld [vmem:[%s12138_s5 + $0x1c8] sm:$0xff] }
 0x396   : > { %12300 = vst [vmem:[#allocation46_spill] sm:$0xff] %v11280_v18  ;;  %v3667_v34 = vsel %vm609_vm2, %v11280_v18, -inf }
 0x397   : > { %12301 = vst [vmem:[#allocation47_spill] sm:$0xff] %v11282_v56  ;;  %3668 = vmax.xlane.f32.xlu1 %v3667_v34  ;;  %v3664_v2 = vsel %vm609_vm2, %v11282_v56, -inf  ;;  %v3525_v38 = vpop.xlane.xlu1 %3524  ;;  %v713_v34 = vld [vmem:[%s12138_s5 + $0x1d8] sm:$0xff] }
 0x398   : > { %3659 = vmax.xlane.f32.xlu0 %v3658_v20  ;;  %v3701_v20 = vsub.f32 %v10859_v60, %v3525_v38 }
 0x39a   : > { %v3772_v3 = vmul.f32 1.442695, %v3701_v20 }
 0x39b   : > { %3665 = vmax.xlane.f32.xlu1 %v3664_v2 }
 0x39c   : > { %9467 = vpow2.f32 %v3772_v3 }
 0x3a3   : > { %v3537_v27 = vpop.xlane.xlu1 %3536 }
 0x3a4   : > { %v3705_v8 = vsub.f32 %v10887_v15, %v3537_v27  ;;  %v3699_v15 = vsub.f32 %v10848_v1, %v3519_v10  ;;  %v717_v27 = vld [vmem:[%s12138_s5 + $0x1f8] sm:$0xff] }
 0x3a7   : > { %v3522_v44 = vpop.xlane.xlu1 %3521 }
 0x3a8   : > { %v3700_v22 = vsub.f32 %v10892_v41, %v3522_v44  ;;  %v716_v41 = vld [vmem:[%s12138_s5 + $0x1f0] sm:$0xff]  ;;  %v710_v44 = vld [vmem:[%s12138_s5 + $0x1c0] sm:$0xff] }
 0x3ab   : > { %v8233_v50 = vpop.f32.mrb[36].mxu1  ;;  %v3534_v6 = vpop.xlane.xlu1 %3533 }
 0x3ac   : > { %v11293_v18 = vadd.f32 %v8233_v50, %v711_v23  ;;  %v3232_v48 = vpop.f32.mrb[37].mxu1  ;;  %v3516_v50 = vpop.xlane.xlu0 %3515  ;;  %v3704_v3 = vsub.f32 %v10910_v11, %v3534_v6 }
 0x3ad   : > { %v3698_v1 = vsub.f32 %v10850_v61, %v3516_v50  ;;  %v11331_v6 = vadd.f32 %v3232_v48, %v710_v44 }
 0x3ae   : > { %12302 = vst [vmem:[#allocation48_spill] sm:$0xff] %v11293_v18  ;;  %v3673_v2 = vsel %vm609_vm2, %v11293_v18, -inf  ;;  %v3778_v11 = vmul.f32 1.442695, %v3704_v3 }
 0x3af   : > { %v8240_v46 = vpop.f32.mrb[32].mxu0  ;;  %v3549_v56 = vpop.xlane.xlu1 %3548  ;;  %3674 = vmax.xlane.f32.xlu0 %v3673_v2  ;;  %v3780_v2 = vmul.f32 1.442695, %v3705_v8 }
 0x3b0   : > { %v11304_v39 = vadd.f32 %v8240_v46, %v713_v34  ;;  %v3319_v23 = vpop.f32.mrb[33].mxu0  ;;  %v3531_v18 = vpop.xlane.xlu0 %3530 }
 0x3b1   : > { %v11307_v4 = vadd.f32 %v3319_v23, %v712_v26  ;;  %9469 = vpow2.f32 %v3780_v2  ;;  %v3770_v23 = vmul.f32 1.442695, %v3700_v22  ;;  %v3709_v22 = vsub.f32 %v10924_v58, %v3549_v56 }
 0x3b2   : > { %12303 = vst [vmem:[#allocation49_spill] sm:$0xff] %v11304_v39  ;;  %v3679_v60 = vsel %vm609_vm2, %v11304_v39, -inf  ;;  %v3766_v56 = vmul.f32 1.442695, %v3698_v1  ;;  %v3703_v58 = vsub.f32 %v10871_v7, %v3531_v18 }
 0x3b3   : > { %12304 = vst [vmem:[#allocation50_spill] sm:$0xff] %v11307_v4  ;;  %v3546_v38 = vpop.xlane.xlu1 %3545  ;;  %3680 = vmax.xlane.f32.xlu1 %v3679_v60  ;;  %v3676_v46 = vsel %vm609_vm2, %v11307_v4, -inf  ;;  %v3768_v4 = vmul.f32 1.442695, %v3699_v15  ;;  %9471 = vpow2.f32 %v3770_v23  ;;  %v11340_v15 = vpop.eup %9467 }
 0x3b4   : > { %v3528_v8 = vpop.xlane.xlu0 %3527  ;;  %v3708_v23 = vsub.f32 %v10942_v0, %v3546_v38  ;;  %v3907_v7 = vsel %vm609_vm2, %v11340_v15, 0.0  ;;  %v3776_v0 = vmul.f32 1.442695, %v3703_v58 }
 0x3b5   : > { %9473 = vpow2.f32 %v3768_v4 }
 0x3b6   : > { %9475 = vpow2.f32 %v3778_v11  ;;  %v3786_v18 = vmul.f32 1.442695, %v3708_v23 }
 0x3b7   : > { %v8247_v34 = vpop.f32.mrb[38].mxu1  ;;  %3677 = vmax.xlane.f32.xlu1 %v3676_v46  ;;  %v3561_v26 = vpop.xlane.xlu1 %3560  ;;  %9477 = vpow2.f32 %v3766_v56 }
 0x3b8   : > { %v3406_v20 = vpop.f32.mrb[39].mxu1  ;;  %v3543_v48 = vpop.xlane.xlu0 %3542  ;;  %v11344_v3 = vadd.f32 %v8247_v34, %v715_v43  ;;  %v3702_v43 = vsub.f32 %v10876_v28, %v3528_v8  ;;  %v3713_v38 = vsub.f32 %v10960_v31, %v3561_v26 }
 0x3b9   : > { %v3707_v8 = vsub.f32 %v10904_v45, %v3543_v48 }
 0x3ba   : > { %v3774_v28 = vmul.f32 1.442695, %v3702_v43  ;;  %v3796_v31 = vmul.f32 1.442695, %v3713_v38 }
 0x3bb   : > { %v8254_v60 = vpop.f32.mrb[34].mxu0  ;;  %v3558_v61 = vpop.xlane.xlu1 %3557  ;;  %v3784_v23 = vmul.f32 1.442695, %v3707_v8 }
 0x3bc   : > { %v11326_v10 = vadd.f32 %v8254_v60, %v717_v27  ;;  %v3493_v46 = vpop.f32.mrb[35].mxu0  ;;  %v3788_v27 = vmul.f32 1.442695, %v3709_v22  ;;  %v11355_v4 = vpop.eup %9469  ;;  %v3685_v60 = vsel %vm609_vm2, %v11344_v3, -inf }
 0x3bd   : > { %v11329_v2 = vadd.f32 %v3493_v46, %v716_v41  ;;  %v714_v41 = vld [vmem:[%s12138_s5 + $0x1e0] sm:$0xff]  ;;  %v3540_v1 = vpop.xlane.xlu0 %3539  ;;  %v3919_v22 = vsel %vm609_vm2, %v11355_v4, 0.0  ;;  %v11367_v11 = vpop.eup %9471 }
 0x3be   : > { %v3691_v39 = vsel %vm609_vm2, %v11326_v10, -inf  ;;  %9479 = vpow2.f32 %v3788_v27  ;;  %v11359_v34 = vadd.f32 %v3406_v20, %v714_v41  ;;  %v3712_v20 = vsub.f32 %v10974_v24, %v3558_v61 }
 0x3bf   : > { %3692 = vmax.xlane.f32.xlu0 %v3691_v39  ;;  %v3688_v50 = vsel %vm609_vm2, %v11329_v2, -inf  ;;  %v3670_v39 = vsel %vm609_vm2, %v11331_v6, -inf  ;;  %9481 = vpow2.f32 %v3776_v0  ;;  %v3904_v58 = vsel %vm609_vm2, %v11367_v11, 0.0 }
 0x3c0   : > { %3689 = vmax.xlane.f32.xlu1 %v3688_v50  ;;  %9483 = vpow2.f32 %v3786_v18  ;;  %v3682_v26 = vsel %vm609_vm2, %v11359_v34, -inf  ;;  %v11373_v50 = vpop.eup %9473  ;;  %v3706_v45 = vsub.f32 %v10912_v32, %v3540_v1  ;;  %v3794_v24 = vmul.f32 1.442695, %v3712_v20 }
 0x3c1   : > { %v11377_v27 = vpop.eup %9475  ;;  %9485 = vpow2.f32 %v3774_v28  ;;  %v3555_v48 = vpop.xlane.xlu0 %3554  ;;  %v3901_v41 = vsel %vm609_vm2, %v11373_v50, 0.0 }
 0x3c2   : > { %9487 = vpow2.f32 %v3796_v31  ;;  %v3916_v43 = vsel %vm609_vm2, %v11377_v27, 0.0  ;;  %v3711_v18 = vsub.f32 %v10940_v9, %v3555_v48  ;;  %v3782_v32 = vmul.f32 1.442695, %v3706_v45 }
 0x3c3   : > { %v11351_v44 = vpop.xlane.xlu1 %3572  ;;  %3671 = vmax.xlane.f32.xlu0 %v3670_v39  ;;  %v11380_v39 = vpop.eup %9477  ;;  %9489 = vpow2.f32 %v3784_v23 }
 0x3c4   : > { %3908 = vadd.xlane.f32.xlu1 %v3907_v7  ;;  %9491 = vpow2.f32 %v3794_v24  ;;  %v3792_v8 = vmul.f32 1.442695, %v3711_v18  ;;  %v3717_v31 = vsub.f32 %v11004_v12, %v11351_v44 }
 0x3c5   : > { %9493 = vpow2.f32 %v3782_v32  ;;  %v3552_v9 = vpop.xlane.xlu0 %3551 }
 0x3c6   : > { %v3710_v23 = vsub.f32 %v10944_v19, %v3552_v9  ;;  %v3804_v48 = vmul.f32 1.442695, %v3717_v31 }
 0x3c7   : > { %v11363_v46 = vpop.xlane.xlu1 %3569  ;;  %3686 = vmax.xlane.f32.xlu0 %v3685_v60 }
 0x3c8   : > { %3920 = vadd.xlane.f32.xlu1 %v3919_v22  ;;  %v11385_v7 = vpop.eup %9479  ;;  %v3716_v19 = vsub.f32 %v11006_v14, %v11363_v46 }
 0x3c9   : > { %v11393_v1 = vpop.eup %9481  ;;  %v3931_v22 = vsel %vm609_vm2, %v11385_v7, 0.0  ;;  %v3567_v24 = vpop.xlane.xlu0 %3566 }
 0x3ca   : > { %v11397_v28 = vpop.eup %9483  ;;  %v3913_v20 = vsel %vm609_vm2, %v11393_v1, 0.0  ;;  %v3715_v46 = vsub.f32 %v10972_v51, %v3567_v24 }
 0x3cb   : > { %v3585_v56 = vpop.xlane.xlu1 %3584  ;;  %3683 = vmax.xlane.f32.xlu0 %v3682_v26  ;;  %v11403_v26 = vpop.eup %9485 }
 0x3cc   : > { %3905 = vadd.xlane.f32.xlu1 %v3904_v58  ;;  %v3721_v61 = vsub.f32 %v11027_v59, %v3585_v56  ;;  %v3898_v59 = vsel %vm609_vm2, %v11380_v39, 0.0  ;;  %v3928_v56 = vsel %vm609_vm2, %v11397_v28, 0.0  ;;  %v11407_v58 = vpop.eup %9487  ;;  %v3910_v12 = vsel %vm609_vm2, %v11403_v26, 0.0 }
 0x3cd   : > { %v11412_v44 = vpop.eup %9489  ;;  %v3564_v9 = vpop.xlane.xlu0 %3563 }
 0x3ce   : > { %v3812_v38 = vmul.f32 1.442695, %v3721_v61  ;;  %v3943_v61 = vsel %vm609_vm2, %v11407_v58, 0.0  ;;  %v3925_v32 = vsel %vm609_vm2, %v11412_v44, 0.0 }
 0x3cf   : > { %v3582_v0 = vpop.xlane.xlu1 %3581  ;;  %3902 = vadd.xlane.f32.xlu0 %v3901_v41  ;;  %v11416_v41 = vpop.eup %9491 }
 0x3d0   : > { %3917 = vadd.xlane.f32.xlu1 %v3916_v43  ;;  %v3720_v60 = vsub.f32 %v11031_v13, %v3582_v0  ;;  %9495 = vpow2.f32 %v3812_v38  ;;  %v3790_v0 = vmul.f32 1.442695, %v3710_v23  ;;  %v11423_v38 = vpop.eup %9493 }
 0x3d1   : > { %9497 = vpow2.f32 %v3792_v8  ;;  %v3802_v8 = vmul.f32 1.442695, %v3716_v19 }
 0x3d2   : > { %v3810_v13 = vmul.f32 1.442695, %v3720_v60 }
 0x3d3   : > { %3899 = vadd.xlane.f32.xlu0 %v3898_v59  ;;  %v3940_v59 = vsel %vm609_vm2, %v11416_v41, 0.0 }
 0x3d4   : > { %3932 = vadd.xlane.f32.xlu1 %v3931_v22 }
 0x3d7   : > { %3914 = vadd.xlane.f32.xlu0 %v3913_v20 }
 0x3d8   : > { %v3888_v45 = vpop.xlane.xlu1 %3887  ;;  %3929 = vadd.xlane.f32.xlu1 %v3928_v56 }
 0x3d9   : > { %9499 = vrcp.f32 %v3888_v45 }
 0x3da   : > { %9501 = vpow2.f32 %v3810_v13  ;;  %v11427_v22 = vpop.eup %9495  ;;  %v3922_v13 = vsel %vm609_vm2, %v11423_v38, 0.0 }
 0x3db   : > { %3911 = vadd.xlane.f32.xlu0 %v3910_v12  ;;  %9503 = vpow2.f32 %v3804_v48  ;;  %v11431_v31 = vpop.eup %9497  ;;  %v3967_v23 = vsel %vm609_vm2, %v11427_v22, 0.0  ;;  %v3714_v48 = vsub.f32 %v10976_v35, %v3564_v9 }
 0x3dc   : > { %v3597_v43 = vpop.xlane.xlu1 %3596  ;;  %3944 = vadd.xlane.f32.xlu1 %v3943_v61  ;;  %9505 = vpow2.f32 %v3790_v0  ;;  %v3937_v24 = vsel %vm609_vm2, %v11431_v31, 0.0 }
 0x3dd   : > { %v3725_v18 = vsub.f32 %v11053_v17, %v3597_v43  ;;  %v3798_v35 = vmul.f32 1.442695, %v3714_v48 }
 0x3df   : > { %v3820_v60 = vmul.f32 1.442695, %v3725_v18  ;;  %3926 = vadd.xlane.f32.xlu0 %v3925_v32 }
 0x3e0   : > { %v3594_v14 = vpop.xlane.xlu1 %3593  ;;  %3941 = vadd.xlane.f32.xlu1 %v3940_v59 }
 0x3e1   : > { %9507 = vpow2.f32 %v3820_v60  ;;  %v3724_v17 = vsub.f32 %v11062_v36, %v3594_v14  ;;  %v3800_v36 = vmul.f32 1.442695, %v3715_v46 }
 0x3e2   : > { %9509 = vpow2.f32 %v3802_v8 }
 0x3e3   : > { %v9500_v20 = vpop.eup %9499  ;;  %v3818_v56 = vmul.f32 1.442695, %v3724_v17  ;;  %3923 = vadd.xlane.f32.xlu0 %v3922_v13 }
 0x3e4   : > { %v11437_v45 = vpop.eup %9501  ;;  %3968 = vadd.xlane.f32.xlu1 %v3967_v23  ;;  %v4142_v51 = vmul.f32 %v9500_v20, %v11051_v52  ;;  %v9168_v20 = vunpack.i.h.bf16 %v10885_v40 }
 0x3e5   : > { %9511 = vpow2.f32 %v3818_v56  ;;  %v3891_v12 = vpop.xlane.xlu0 %3890  ;;  %v11444_v61 = vpop.eup %9503  ;;  %v3964_v0 = vsel %vm609_vm2, %v11437_v45, 0.0  ;;  %v9167_v56 = vunpack.i.l.bf16 %v10885_v40 }
 0x3e6   : > { %9513 = vrcp.f32 %v3891_v12  ;;  %8259 = vmatprep.mubr.msk.f32.mxu1 %vm609_vm2, %v4142_v51  ;;  %v11448_v43 = vpop.eup %9505  ;;  %v3955_v32 = vsel %vm609_vm2, %v11444_v61, 0.0 }
 0x3e7   : > { %3938 = vadd.xlane.f32.xlu0 %v3937_v24  ;;  %9515 = vpow2.f32 %v3800_v36 }
 0x3e8   : > { %3965 = vadd.xlane.f32.xlu1 %v3964_v0  ;;  %9517 = vpow2.f32 %v3798_v35 }
 0x3e9   : > { %v3897_v19 = vpop.xlane.xlu1 %3896  ;;  %v3579_v52 = vpop.xlane.xlu0 %3578 }
 0x3ea   : > { %v3719_v18 = vsub.f32 %v11078_v49, %v3579_v52  ;;  %9519 = vrcp.f32 %v3897_v19  ;;  %v3934_v49 = vsel %vm609_vm2, %v11448_v43, 0.0  ;;  %v8785_v19 = vpack.c.bf16 %v9168_v20, %v9167_v56 }
 0x3eb   : > { %v11453_v60 = vpop.eup %9507  ;;  %3956 = vadd.xlane.f32.xlu0 %v3955_v32  ;;  %v9177_v20 = vunpack.i.l.bf16 %v10863_v62 }
 0x3ec   : > { %v3979_v59 = vsel %vm609_vm2, %v11453_v60, 0.0  ;;  %v3808_v8 = vmul.f32 1.442695, %v3719_v18  ;;  %v11457_v9 = vpop.eup %9509 }
 0x3ed   : > { %3980 = vadd.xlane.f32.xlu1 %v3979_v59  ;;  %v3894_v14 = vpop.xlane.xlu1 %3893  ;;  %v3576_v46 = vpop.xlane.xlu0 %3575  ;;  %v3952_v40 = vsel %vm609_vm2, %v11457_v9, 0.0 }
 0x3ee   : > { %v3718_v17 = vsub.f32 %v11088_v37, %v3576_v46  ;;  %9521 = vrcp.f32 %v3894_v14 }
 0x3ef   : > { %v11462_v13 = vpop.eup %9511  ;;  %3935 = vadd.xlane.f32.xlu0 %v3934_v49  ;;  %9523 = vpow2.f32 %v3808_v8 }
 0x3f0   : > { %v9514_v23 = vpop.eup %9513  ;;  %v3806_v48 = vmul.f32 1.442695, %v3718_v17  ;;  %v3976_v51 = vsel %vm609_vm2, %v11462_v13, 0.0 }
 0x3f1   : > { %3977 = vadd.xlane.f32.xlu1 %v3976_v51  ;;  %v3609_v36 = vpop.xlane.xlu1 %3608  ;;  %v3591_v37 = vpop.xlane.xlu0 %3590  ;;  %v4143_v12 = vmul.f32 %v9514_v23, %v11075_v29 }
 0x3f2   : > { %v3729_v24 = vsub.f32 %v11105_v53, %v3609_v36  ;;  %v3723_v0 = vsub.f32 %v11103_v42, %v3591_v37  ;;  %v11473_v35 = vpop.eup %9515  ;;  %9525 = vpow2.f32 %v3806_v48 }
 0x3f3   : > { %8260 = vmatmul.mubr.msk.f32.vlgmr.msra.gmra.mrb[40].mxu1 %vm609_vm2, %v4143_v12  ;;  %3953 = vadd.xlane.f32.xlu0 %v3952_v40  ;;  %v11477_v53 = vpop.eup %9517  ;;  %v3949_v8 = vsel %vm609_vm2, %v11473_v35, 0.0 }
 0x3f4   : > { %v3816_v52 = vmul.f32 1.442695, %v3723_v0  ;;  %8780 = vmatpush3.bf16.msra.mxu1 %v10834_v33  ;;  %v3828_v18 = vmul.f32 1.442695, %v3729_v24  ;;  %v9520_v14 = vpop.eup %9519  ;;  %v9178_v33 = vunpack.i.h.bf16 %v10863_v62 }
 0x3f5   : > { %8786 = vmatprep.subr.bf16.mxu1 %v8785_v19  ;;  %v3606_v29 = vpop.xlane.xlu1 %3605  ;;  %v3588_v32 = vpop.xlane.xlu0 %3587  ;;  %v4145_v37 = vmul.f32 %v9520_v14, %v11085_v47 }
 0x3f6   : > { %v3728_v42 = vsub.f32 %v11120_v30, %v3606_v29  ;;  %v3722_v59 = vsub.f32 %v11118_v16, %v3588_v32  ;;  %9527 = vpow2.f32 %v3816_v52  ;;  %v3946_v30 = vsel %vm609_vm2, %v11477_v53, 0.0 }
 0x3f7   : > { %3950 = vadd.xlane.f32.xlu0 %v3949_v8  ;;  %9529 = vpow2.f32 %v3828_v18  ;;  %v11495_v0 = vpack.c.bf16 %v9178_v33, %v9177_v20 }
 0x3f8   : > { %v3826_v46 = vmul.f32 1.442695, %v3728_v42  ;;  %v3814_v17 = vmul.f32 1.442695, %v3722_v59  ;;  %v9522_v49 = vpop.eup %9521 }
 0x3f9   : > { %v3621_v56 = vpop.xlane.xlu1 %3620  ;;  %v3603_v23 = vpop.xlane.xlu0 %3602  ;;  %v4144_v51 = vmul.f32 %v9522_v49, %v11094_v5 }
 0x3fa   : > { %9531 = vpow2.f32 %v3826_v46  ;;  %v3733_v16 = vsub.f32 %v11135_v57, %v3621_v56  ;;  %v3727_v48 = vsub.f32 %v11133_v55, %v3603_v23  ;;  %v11490_v36 = vpop.eup %9523  ;;  %v12306_v23 = vld [vmem:[#allocation32_spill] sm:$0xff] }
 0x3fb   : > { %3947 = vadd.xlane.f32.xlu0 %v3946_v30  ;;  %9533 = vpow2.f32 %v3814_v17  ;;  %8266 = vmatprep.mubr.msk.f32.mxu1 %vm609_vm2, %v4144_v51  ;;  %v3961_v47 = vsel %vm609_vm2, %v11490_v36, 0.0 }
 0x3fc   : > { %v3824_v62 = vmul.f32 1.442695, %v3727_v48  ;;  %v3836_v12 = vmul.f32 1.442695, %v3733_v16  ;;  %8267 = vmatmul.mubr.msk.f32.vlgmr.msra.gmra.mrb[42].mxu1 %vm609_vm2, %v4145_v37  ;;  %v11497_v40 = vpop.eup %9525 }
 0x3fd   : > { %v3618_v24 = vpop.xlane.xlu1 %3617  ;;  %v3600_v57 = vpop.xlane.xlu0 %3599  ;;  %8788 = vmatpush3.bf16.msra.mxu1 %v8785_v19  ;;  %v3958_v19 = vsel %vm609_vm2, %v11497_v40, 0.0 }
 0x3fe   : > { %v3732_v5 = vsub.f32 %v11150_v54, %v3618_v24  ;;  %v3726_v55 = vsub.f32 %v11148_v63, %v3600_v57  ;;  %9535 = vpow2.f32 %v3824_v62  ;;  %8794 = vmatprep.subr.bf16.mxu1 %v11495_v0  ;;  %v12307_v57 = vld [vmem:[#allocation35_spill] sm:$0xff] }
 0x3ff   : > { %3962 = vadd.xlane.f32.xlu0 %v3961_v47  ;;  %9537 = vpow2.f32 %v3836_v12 }
 0x400   : > { %v3834_v52 = vmul.f32 1.442695, %v3732_v5  ;;  %v11504_v18 = vpop.eup %9527  ;;  %v3822_v29 = vmul.f32 1.442695, %v3726_v55  ;;  %v12308_v55 = vld [vmem:[#allocation34_spill] sm:$0xff] }
 0x401   : > { %v3633_v32 = vpop.xlane.xlu1 %3632  ;;  %v3615_v42 = vpop.xlane.xlu0 %3614  ;;  %v3973_v59 = vsel %vm609_vm2, %v11504_v18, 0.0 }
 0x402   : > { %9539 = vpow2.f32 %v3834_v52  ;;  %v3737_v63 = vsub.f32 %v11165_v25, %v3633_v32  ;;  %v3731_v54 = vsub.f32 %v11163_v21, %v3615_v42  ;;  %v11512_v8 = vpop.eup %9529  ;;  %3974 = vadd.xlane.f32.xlu1 %v3973_v59  ;;  %v12305_v21 = vld [vmem:[#allocation33_spill] sm:$0xff] }
 0x403   : > { %3959 = vadd.xlane.f32.xlu0 %v3958_v19  ;;  %9541 = vpow2.f32 %v3822_v29  ;;  %v3991_v16 = vsel %vm609_vm2, %v11512_v8, 0.0 }
 0x404   : > { %v11514_v14 = vpop.eup %9531  ;;  %v3832_v46 = vmul.f32 1.442695, %v3731_v54  ;;  %v3844_v17 = vmul.f32 1.442695, %v3737_v63 }
 0x405   : > { %v3630_v49 = vpop.xlane.xlu1 %3629  ;;  %v3612_v33 = vpop.xlane.xlu0 %3611  ;;  %v3988_v20 = vsel %vm609_vm2, %v11514_v14, 0.0 }
 0x406   : > { %v11518_v25 = vpop.eup %9533  ;;  %v3736_v56 = vsub.f32 %v12305_v21, %v3630_v49  ;;  %v3730_v30 = vsub.f32 %v12306_v23, %v3612_v33  ;;  %9543 = vpow2.f32 %v3832_v46  ;;  %3989 = vadd.xlane.f32.xlu1 %v3988_v20  ;;  %v12309_v46 = vld [vmem:[#allocation37_spill] sm:$0xff]  ;;  %v12310_v49 = vld [vmem:[#allocation36_spill] sm:$0xff] }
 0x407   : > { %3992 = vadd.xlane.f32.xlu0 %v3991_v16  ;;  %9545 = vpow2.f32 %v3844_v17  ;;  %v3970_v24 = vsel %vm609_vm2, %v11518_v25, 0.0 }
 0x408   : > { %v3842_v48 = vmul.f32 1.442695, %v3736_v56  ;;  %v3830_v51 = vmul.f32 1.442695, %v3730_v30  ;;  %v11524_v37 = vpop.eup %9535 }
 0x409   : > { %v3645_v62 = vpop.xlane.xlu1 %3644  ;;  %v3627_v12 = vpop.xlane.xlu0 %3626  ;;  %v3985_v52 = vsel %vm609_vm2, %v11524_v37, 0.0 }
 0x40a   : > { %9547 = vpow2.f32 %v3842_v48  ;;  %v3741_v5 = vsub.f32 %v12307_v57, %v3645_v62  ;;  %v3735_v47 = vsub.f32 %v12308_v55, %v3627_v12  ;;  %v11532_v29 = vpop.eup %9537  ;;  %3986 = vadd.xlane.f32.xlu1 %v3985_v52  ;;  %v12311_v48 = vld [vmem:[#allocation38_spill] sm:$0xff] }
 0x40b   : > { %3971 = vadd.xlane.f32.xlu0 %v3970_v24  ;;  %9549 = vpow2.f32 %v3830_v51  ;;  %v4003_v20 = vsel %vm609_vm2, %v11532_v29, 0.0 }
 0x40c   : > { %v11534_v32 = vpop.eup %9539  ;;  %v3840_v42 = vmul.f32 1.442695, %v3735_v47  ;;  %v3852_v19 = vmul.f32 1.442695, %v3741_v5 }
 0x40d   : > { %v3642_v63 = vpop.xlane.xlu1 %3641  ;;  %v3624_v54 = vpop.xlane.xlu0 %3623  ;;  %v4000_v59 = vsel %vm609_vm2, %v11534_v32, 0.0 }
 0x40e   : > { %v3740_v17 = vsub.f32 %v12309_v46, %v3642_v63  ;;  %v3734_v33 = vsub.f32 %v12310_v49, %v3624_v54  ;;  %v11542_v21 = vpop.eup %9541  ;;  %9551 = vpow2.f32 %v3840_v42  ;;  %4001 = vadd.xlane.f32.xlu1 %v4000_v59  ;;  %v12313_v42 = vld [vmem:[#allocation39_spill] sm:$0xff]  ;;  %v12314_v59 = vld [vmem:[#allocation41_spill] sm:$0xff] }
 0x40f   : > { %4004 = vadd.xlane.f32.xlu0 %v4003_v20  ;;  %9553 = vpow2.f32 %v3852_v19  ;;  %v3982_v12 = vsel %vm609_vm2, %v11542_v21, 0.0 }
 0x410   : > { %v3850_v56 = vmul.f32 1.442695, %v3740_v17  ;;  %v11544_v23 = vpop.eup %9543  ;;  %v3838_v30 = vmul.f32 1.442695, %v3734_v33 }
 0x411   : > { %v3639_v16 = vpop.xlane.xlu0 %3638  ;;  %v3997_v62 = vsel %vm609_vm2, %v11544_v23, 0.0  ;;  %v11551_v24 = vpop.eup %9545 }
 0x412   : > { %9555 = vpow2.f32 %v3850_v56  ;;  %v3739_v51 = vsub.f32 %v12311_v48, %v3639_v16  ;;  %12312 = vst [vmem:[#allocation33_spill] sm:$0xff] %v11551_v24  ;;  %3998 = vadd.xlane.f32.xlu1 %v3997_v62  ;;  %v4015_v63 = vsel %vm609_vm2, %v11551_v24, 0.0 }
 0x413   : > { %3983 = vadd.xlane.f32.xlu0 %v3982_v12  ;;  %9557 = vpow2.f32 %v3838_v30  ;;  %v12315_v30 = vld [vmem:[#allocation40_spill] sm:$0xff] }
 0x414   : > { %v11553_v57 = vpop.eup %9547  ;;  %v3848_v5 = vmul.f32 1.442695, %v3739_v51 }
 0x415   : > { %v3636_v55 = vpop.xlane.xlu0 %3635  ;;  %v4012_v47 = vsel %vm609_vm2, %v11553_v57, 0.0  ;;  %v11557_v52 = vpop.eup %9549 }
 0x416   : > { %9559 = vpow2.f32 %v3848_v5  ;;  %v3738_v19 = vsub.f32 %v12313_v42, %v3636_v55  ;;  %4013 = vadd.xlane.f32.xlu1 %v4012_v47  ;;  %v3994_v33 = vsel %vm609_vm2, %v11557_v52, 0.0  ;;  %v12318_v5 = vld [vmem:[#allocation42_spill] sm:$0xff] }
 0x417   : > { %v3657_v54 = vpop.xlane.xlu1 %3656  ;;  %4016 = vadd.xlane.f32.xlu0 %v4015_v63 }
 0x418   : > { %v3745_v46 = vsub.f32 %v12314_v59, %v3657_v54  ;;  %v11563_v17 = vpop.eup %9551  ;;  %v3846_v20 = vmul.f32 1.442695, %v3738_v19 }
 0x419   : > { %v3651_v49 = vpop.xlane.xlu0 %3650  ;;  %v4009_v48 = vsel %vm609_vm2, %v11563_v17, 0.0  ;;  %v11570_v51 = vpop.eup %9553 }
 0x41a   : > { %v3860_v56 = vmul.f32 1.442695, %v3745_v46  ;;  %v3743_v16 = vsub.f32 %v12315_v30, %v3651_v49  ;;  %12316 = vst [vmem:[#allocation32_spill] sm:$0xff] %v11570_v51  ;;  %4010 = vadd.xlane.f32.xlu1 %v4009_v48  ;;  %v4027_v54 = vsel %vm609_vm2, %v11570_v51, 0.0  ;;  %v12321_v48 = vld [vmem:[#allocation46_spill] sm:$0xff] }
 0x41b   : > { %v3654_v62 = vpop.xlane.xlu1 %3653  ;;  %3995 = vadd.xlane.f32.xlu0 %v3994_v33  ;;  %v12320_v33 = vld [vmem:[#allocation43_spill] sm:$0xff] }
 0x41c   : > { %v11572_v12 = vpop.eup %9555  ;;  %9561 = vpow2.f32 %v3860_v56  ;;  %v3744_v55 = vsub.f32 %v12318_v5, %v3654_v62  ;;  %v3856_v42 = vmul.f32 1.442695, %v3743_v16 }
 0x41d   : > { %12317 = vst [vmem:[#allocation35_spill] sm:$0xff] %v11572_v12  ;;  %v4024_v47 = vsel %vm609_vm2, %v11572_v12, 0.0  ;;  %9563 = vpow2.f32 %v3846_v20  ;;  %v3648_v63 = vpop.xlane.xlu0 %3647  ;;  %v11579_v59 = vpop.eup %9557 }
 0x41e   : > { %v3858_v19 = vmul.f32 1.442695, %v3744_v55  ;;  %4025 = vadd.xlane.f32.xlu1 %v4024_v47  ;;  %v3742_v56 = vsub.f32 %v12320_v33, %v3648_v63  ;;  %v4006_v20 = vsel %vm609_vm2, %v11579_v59, 0.0  ;;  %v12323_v47 = vld [vmem:[#allocation44_spill] sm:$0xff] }
 0x41f   : > { %4028 = vadd.xlane.f32.xlu0 %v4027_v54 }
 0x420   : > { %v11581_v46 = vpop.eup %9559  ;;  %9565 = vpow2.f32 %v3858_v19  ;;  %v3854_v55 = vmul.f32 1.442695, %v3742_v56 }
 0x421   : > { %12319 = vst [vmem:[#allocation34_spill] sm:$0xff] %v11581_v46  ;;  %v4021_v49 = vsel %vm609_vm2, %v11581_v46, 0.0  ;;  %9567 = vpow2.f32 %v3856_v42  ;;  %v3663_v30 = vpop.xlane.xlu0 %3662 }
 0x422   : > { %4022 = vadd.xlane.f32.xlu1 %v4021_v49  ;;  %v3747_v19 = vsub.f32 %v12323_v47, %v3663_v30  ;;  %v12324_v49 = vld [vmem:[#allocation47_spill] sm:$0xff] }
 0x423   : > { %4007 = vadd.xlane.f32.xlu0 %v4006_v20 }
 0x424   : > { %v3669_v16 = vpop.xlane.xlu1 %3668 }
 0x425   : > { %v3749_v62 = vsub.f32 %v12321_v48, %v3669_v16  ;;  %v3864_v16 = vmul.f32 1.442695, %v3747_v19 }
 0x426   : > { %v11589_v5 = vpop.eup %9561 }
 0x427   : > { %12322 = vst [vmem:[#allocation37_spill] sm:$0xff] %v11589_v5  ;;  %v3868_v54 = vmul.f32 1.442695, %v3749_v62  ;;  %v4039_v42 = vsel %vm609_vm2, %v11589_v5, 0.0  ;;  %v11594_v51 = vpop.eup %9563 }
 0x428   : > { %v3666_v63 = vpop.xlane.xlu1 %3665  ;;  %4040 = vadd.xlane.f32.xlu0 %v4039_v42  ;;  %v4018_v30 = vsel %vm609_vm2, %v11594_v51, 0.0 }
 0x429   : > { %9569 = vpow2.f32 %v3868_v54  ;;  %v3748_v33 = vsub.f32 %v12324_v49, %v3666_v63 }
 0x42a   : > { %v11597_v20 = vpop.eup %9565  ;;  %9571 = vpow2.f32 %v3854_v55 }
 0x42b   : > { %12325 = vst [vmem:[#allocation36_spill] sm:$0xff] %v11597_v20  ;;  %v3866_v48 = vmul.f32 1.442695, %v3748_v33  ;;  %v4036_v56 = vsel %vm609_vm2, %v11597_v20, 0.0  ;;  %v11603_v62 = vpop.eup %9567 }
 0x42c   : > { %12326 = vst [vmem:[#allocation38_spill] sm:$0xff] %v11603_v62  ;;  %4037 = vadd.xlane.f32.xlu1 %v4036_v56  ;;  %4019 = vadd.xlane.f32.xlu0 %v4018_v30  ;;  %v4033_v47 = vsel %vm609_vm2, %v11603_v62, 0.0  ;;  %v12331_v56 = vld [vmem:[#allocation45_spill] sm:$0xff] }
 0x42d   : > { %9573 = vpow2.f32 %v3866_v48 }
 0x42e   : > { %9575 = vpow2.f32 %v3864_v16  ;;  %v3660_v16 = vpop.xlane.xlu0 %3659 }
 0x42f   : > { %v3746_v30 = vsub.f32 %v12331_v56, %v3660_v16 }
 0x430   : > { %4034 = vadd.xlane.f32.xlu1 %v4033_v47 }
 0x431   : > { %v3862_v20 = vmul.f32 1.442695, %v3746_v30 }
 0x433   : > { %v11607_v54 = vpop.eup %9569 }
 0x434   : > { %12327 = vst [vmem:[#allocation39_spill] sm:$0xff] %v11607_v54  ;;  %v11609_v55 = vpop.eup %9571  ;;  %v4051_v19 = vsel %vm609_vm2, %v11607_v54, 0.0  ;;  %v12332_v54 = vld [vmem:[#allocation49_spill] sm:$0xff] }
 0x435   : > { %12328 = vst [vmem:[#allocation41_spill] sm:$0xff] %v11609_v55  ;;  %4052 = vadd.xlane.f32.xlu0 %v4051_v19  ;;  %v4030_v49 = vsel %vm609_vm2, %v11609_v55, 0.0  ;;  %v12334_v55 = vld [vmem:[#allocation50_spill] sm:$0xff] }
 0x437   : > { %v11613_v42 = vpop.eup %9573 }
 0x438   : > { %12329 = vst [vmem:[#allocation40_spill] sm:$0xff] %v11613_v42  ;;  %v4048_v63 = vsel %vm609_vm2, %v11613_v42, 0.0  ;;  %v11619_v33 = vpop.eup %9575  ;;  %v12333_v42 = vld [vmem:[#allocation48_spill] sm:$0xff] }
 0x439   : > { %12330 = vst [vmem:[#allocation42_spill] sm:$0xff] %v11619_v33  ;;  %4049 = vadd.xlane.f32.xlu1 %v4048_v63  ;;  %4031 = vadd.xlane.f32.xlu0 %v4030_v49  ;;  %v4045_v48 = vsel %vm609_vm2, %v11619_v33, 0.0 }
 0x43c   : > { %v3675_v47 = vpop.xlane.xlu0 %3674 }
 0x43d   : > { %4046 = vadd.xlane.f32.xlu1 %v4045_v48  ;;  %v3751_v62 = vsub.f32 %v12333_v42, %v3675_v47 }
 0x43f   : > { %v3872_v49 = vmul.f32 1.442695, %v3751_v62 }
 0x440   : > { %v3681_v19 = vpop.xlane.xlu1 %3680 }
 0x441   : > { %v3753_v5 = vsub.f32 %v12332_v54, %v3681_v19 }
 0x443   : > { %v3876_v12 = vmul.f32 1.442695, %v3753_v5 }
 0x444   : > { %v3678_v24 = vpop.xlane.xlu1 %3677 }
 0x445   : > { %9577 = vpow2.f32 %v3876_v12  ;;  %v3752_v63 = vsub.f32 %v12334_v55, %v3678_v24 }
 0x446   : > { %9579 = vpow2.f32 %v3862_v20 }
 0x447   : > { %v3874_v46 = vmul.f32 1.442695, %v3752_v63 }
 0x449   : > { %9581 = vpow2.f32 %v3874_v46 }
 0x44a   : > { %9583 = vpow2.f32 %v3872_v49 }
 0x44c   : > { %v3693_v48 = vpop.xlane.xlu0 %3692 }
 0x44d   : > { %v3757_v16 = vsub.f32 %v11326_v10, %v3693_v48  ;;  %v3690_v56 = vpop.xlane.xlu1 %3689 }
 0x44e   : > { %v3756_v33 = vsub.f32 %v11329_v2, %v3690_v56 }
 0x44f   : > { %v11629_v54 = vpop.eup %9577  ;;  %v3884_v30 = vmul.f32 1.442695, %v3757_v16 }
 0x450   : > { %v3882_v42 = vmul.f32 1.442695, %v3756_v33  ;;  %v3672_v5 = vpop.xlane.xlu0 %3671  ;;  %v4063_v12 = vsel %vm609_vm2, %v11629_v54, 0.0  ;;  %v11633_v24 = vpop.eup %9579 }
 0x451   : > { %9585 = vpow2.f32 %v3884_v30  ;;  %v3750_v46 = vsub.f32 %v11331_v6, %v3672_v5  ;;  %v3909_v20 = vpop.xlane.xlu1 %3908  ;;  %4064 = vadd.xlane.f32.xlu0 %v4063_v12  ;;  %v4042_v33 = vsel %vm609_vm2, %v11633_v24, 0.0 }
 0x452   : > { %9587 = vpow2.f32 %v3882_v42 }
 0x453   : > { %v11636_v10 = vpop.eup %9581  ;;  %v3870_v62 = vmul.f32 1.442695, %v3750_v46 }
 0x454   : > { %v3687_v2 = vpop.xlane.xlu0 %3686  ;;  %v4060_v55 = vsel %vm609_vm2, %v11636_v10, 0.0  ;;  %v11642_v47 = vpop.eup %9583 }
 0x455   : > { %9589 = vpow2.f32 %v3870_v62  ;;  %v3755_v19 = vsub.f32 %v11344_v3, %v3687_v2  ;;  %v3921_v63 = vpop.xlane.xlu1 %3920  ;;  %4061 = vadd.xlane.f32.xlu1 %v4060_v55  ;;  %4043 = vadd.xlane.f32.xlu0 %v4042_v33  ;;  %v4057_v48 = vsel %vm609_vm2, %v11642_v47, 0.0 }
 0x456   : > { %9591 = vrcp.f32 %v3909_v20 }
 0x457   : > { %v3880_v6 = vmul.f32 1.442695, %v3755_v19 }
 0x458   : > { %v3684_v49 = vpop.xlane.xlu0 %3683 }
 0x459   : > { %9593 = vpow2.f32 %v3880_v6  ;;  %v3754_v16 = vsub.f32 %v11359_v34, %v3684_v49  ;;  %v3906_v56 = vpop.xlane.xlu1 %3905  ;;  %4058 = vadd.xlane.f32.xlu1 %v4057_v48  ;;  %v12336_v49 = vld [vmem:[#allocation5_spill] sm:$0xff] }
 0x45a   : > { %9595 = vrcp.f32 %v3906_v56  ;;  %v9188_v48 = vunpack.i.h.bf16 %v12336_v49 }
 0x45b   : > { %v11648_v30 = vpop.eup %9585  ;;  %v3878_v42 = vmul.f32 1.442695, %v3754_v16 }
 0x45c   : > { %12335 = vst [vmem:[#allocation43_spill] sm:$0xff] %v11648_v30  ;;  %v11650_v5 = vpop.eup %9587  ;;  %v3903_v3 = vpop.xlane.xlu0 %3902  ;;  %v4075_v12 = vsel %vm609_vm2, %v11648_v30, 0.0 }
 0x45d   : > { %9597 = vpow2.f32 %v3878_v42  ;;  %v3918_v46 = vpop.xlane.xlu1 %3917  ;;  %4076 = vadd.xlane.f32.xlu0 %v4075_v12  ;;  %v4072_v20 = vsel %vm609_vm2, %v11650_v5, 0.0 }
 0x45e   : > { %9599 = vrcp.f32 %v3921_v63  ;;  %4073 = vadd.xlane.f32.xlu1 %v4072_v20  ;;  %v9187_v63 = vunpack.i.l.bf16 %v12336_v49 }
 0x45f   : > { %v11656_v34 = vpop.eup %9589  ;;  %9601 = vrcp.f32 %v3918_v46 }
 0x460   : > { %9603 = vrcp.f32 %v3903_v3  ;;  %v3900_v62 = vpop.xlane.xlu0 %3899  ;;  %v4054_v2 = vsel %vm609_vm2, %v11656_v34, 0.0  ;;  %v9592_v33 = vpop.eup %9591 }
 0x461   : > { %9605 = vrcp.f32 %v3900_v62  ;;  %v3933_v55 = vpop.xlane.xlu1 %3932  ;;  %4055 = vadd.xlane.f32.xlu0 %v4054_v2  ;;  %v4149_v12 = vmul.f32 %v9592_v33, %v11340_v15  ;;  %v8801_v2 = vpack.c.bf16 %v9188_v48, %v9187_v63 }
 0x462   : > { %9607 = vrcp.f32 %v3933_v55 }
 0x463   : > { %v11660_v19 = vpop.eup %9593 }
 0x464   : > { %v9596_v6 = vpop.eup %9595  ;;  %v3915_v16 = vpop.xlane.xlu0 %3914  ;;  %v4069_v56 = vsel %vm609_vm2, %v11660_v19, 0.0 }
 0x465   : > { %v3930_v42 = vpop.xlane.xlu1 %3929  ;;  %4070 = vadd.xlane.f32.xlu1 %v4069_v56  ;;  %v4148_v3 = vmul.f32 %v9596_v6, %v11367_v11  ;;  %v12337_v56 = vld [vmem:[#allocation13_spill] sm:$0xff] }
 0x466   : > { %9609 = vrcp.f32 %v3930_v42  ;;  %v9198_v30 = vunpack.i.h.bf16 %v12337_v56  ;;  %v9197_v11 = vunpack.i.l.bf16 %v12337_v56  ;;  %v12338_v42 = vld [vmem:[#allocation17_spill] sm:$0xff] }
 0x467   : > { %v11668_v46 = vpop.eup %9597  ;;  %8280 = vmatprep.mubr.msk.f32.mxu1 %vm609_vm2, %v4148_v3  ;;  %9611 = vrcp.f32 %v3915_v16  ;;  %v9183_v48 = vunpack.i.h.bf16 %v12338_v42  ;;  %v9182_v63 = vunpack.i.l.bf16 %v12338_v42  ;;  %v12341_v42 = vld [vmem:[#allocation6_spill] sm:$0xff] }
 0x468   : > { %v9600_v20 = vpop.eup %9599  ;;  %8281 = vmatmul.mubr.msk.f32.vlgmr.msra.gmra.mrb[44].mxu1 %vm609_vm2, %v4149_v12  ;;  %v3912_v62 = vpop.xlane.xlu0 %3911  ;;  %v4066_v55 = vsel %vm609_vm2, %v11668_v46, 0.0 }
 0x469   : > { %v9602_v49 = vpop.eup %9601  ;;  %8796 = vmatpush3.bf16.msra.mxu1 %v11495_v0  ;;  %9613 = vrcp.f32 %v3912_v62  ;;  %v3945_v15 = vpop.xlane.xlu1 %3944  ;;  %4067 = vadd.xlane.f32.xlu0 %v4066_v55  ;;  %v4153_v3 = vmul.f32 %v9600_v20, %v11355_v4  ;;  %v8809_v62 = vpack.c.bf16 %v9198_v30, %v9197_v11  ;;  %v8797_v4 = vpack.c.bf16 %v9183_v48, %v9182_v63 }
 0x46a   : > { %v9604_v33 = vpop.eup %9603  ;;  %8802 = vmatprep.subr.bf16.mxu1 %v8801_v2  ;;  %v4152_v6 = vmul.f32 %v9602_v49, %v11377_v27  ;;  %9615 = vrcp.f32 %v3945_v15  ;;  %v12339_v49 = vld [vmem:[#allocation9_spill] sm:$0xff]  ;;  %v12340_v15 = vld [vmem:[#allocation8_spill] sm:$0xff]  ;;  %v9193_v48 = vunpack.i.h.bf16 %v12341_v42  ;;  %v9192_v63 = vunpack.i.l.bf16 %v12341_v42 }
 0x46b   : > { %v9606_v16 = vpop.eup %9605  ;;  %v4147_v55 = vmul.f32 %v9604_v33, %v11373_v50 }
 0x46c   : > { %8294 = vmatprep.mubr.msk.f32.mxu1 %vm609_vm2, %v4152_v6  ;;  %v3927_v12 = vpop.xlane.xlu0 %3926  ;;  %v4146_v56 = vmul.f32 %v9606_v16, %v11380_v39  ;;  %v9608_v27 = vpop.eup %9607  ;;  %v9233_v6 = vunpack.i.h.bf16 %v12339_v49  ;;  %v9232_v39 = vunpack.i.l.bf16 %v12339_v49 }
 0x46d   : > { %8295 = vmatmul.mubr.msk.f32.vlgmr.msra.gmra.mrb[46].mxu1 %vm609_vm2, %v4153_v3  ;;  %v3942_v0 = vpop.xlane.xlu1 %3941  ;;  %v4157_v33 = vmul.f32 %v9608_v27, %v11385_v7  ;;  %v12342_v7 = vld [vmem:[#allocation16_spill] sm:$0xff]  ;;  %v12343_v27 = vld [vmem:[#allocation11_spill] sm:$0xff] }
 0x46e   : > { %8804 = vmatpush3.bf16.msra.mxu1 %v8801_v2  ;;  %9617 = vrcp.f32 %v3942_v0  ;;  %8273 = vmatprep.mubr.msk.f32.mxu0 %vm609_vm2, %v4146_v56  ;;  %v9212_v49 = vunpack.i.l.bf16 %v12343_v27 }
 0x46f   : > { %8810 = vmatprep.subr.bf16.mxu1 %v8809_v62  ;;  %8274 = vmatmul.mubr.msk.f32.vlgmr.msra.gmra.mrb[36].mxu0 %vm609_vm2, %v4147_v55  ;;  %9619 = vrcp.f32 %v3927_v12  ;;  %v8817_v12 = vpack.c.bf16 %v9233_v6, %v9232_v39  ;;  %v8805_v6 = vpack.c.bf16 %v9193_v48, %v9192_v63  ;;  %v12346_v63 = vld [vmem:[#allocation23_spill] sm:$0xff] }
 0x470   : > { %v9610_v20 = vpop.eup %9609  ;;  %8792 = vmatpush3.bf16.msra.mxu0 %v12340_v15  ;;  %v3924_v30 = vpop.xlane.xlu0 %3923 }
 0x471   : > { %8798 = vmatprep.subr.bf16.mxu0 %v8797_v4  ;;  %9621 = vrcp.f32 %v3924_v30  ;;  %v3969_v50 = vpop.xlane.xlu1 %3968  ;;  %v4156_v2 = vmul.f32 %v9610_v20, %v11397_v28  ;;  %v9612_v11 = vpop.eup %9611  ;;  %v9213_v20 = vunpack.i.h.bf16 %v12343_v27  ;;  %v12344_v30 = vld [vmem:[#allocation19_spill] sm:$0xff] }
 0x472   : > { %v4151_v0 = vmul.f32 %v9612_v11, %v11393_v1 }
 0x473   : > { %v9614_v16 = vpop.eup %9613  ;;  %8308 = vmatprep.mubr.msk.f32.mxu1 %vm609_vm2, %v4156_v2  ;;  %v11709_v11 = vpack.c.bf16 %v9213_v20, %v9212_v49  ;;  %v12351_v20 = vld [vmem:[#allocation10_spill] sm:$0xff] }
 0x474   : > { %8309 = vmatmul.mubr.msk.f32.vlgmr.msra.gmra.mrb[48].mxu1 %vm609_vm2, %v4157_v33  ;;  %v3939_v3 = vpop.xlane.xlu0 %3938  ;;  %v4150_v56 = vmul.f32 %v9614_v16, %v11403_v26  ;;  %v9616_v55 = vpop.eup %9615  ;;  %v12345_v33 = vld [vmem:[#allocation7_spill] sm:$0xff]  ;;  %v9208_v49 = vunpack.i.h.bf16 %v12351_v20 }
 0x475   : > { %8812 = vmatpush3.bf16.msra.mxu1 %v8809_v62  ;;  %v3966_v28 = vpop.xlane.xlu1 %3965  ;;  %v4161_v39 = vmul.f32 %v9616_v55, %v11407_v58  ;;  %v9203_v16 = vunpack.i.h.bf16 %v12345_v33  ;;  %v9202_v42 = vunpack.i.l.bf16 %v12345_v33  ;;  %9623 = vrcp.f32 %v3939_v3  ;;  %v12347_v3 = vld [vmem:[#allocation14_spill] sm:$0xff]  ;;  %v12350_v55 = vld [vmem:[#allocation28_spill] sm:$0xff] }
 0x476   : > { %8818 = vmatprep.subr.bf16.mxu1 %v8817_v12  ;;  %9260 = vrot.lane.b32.xlu1 %v12342_v7, %s9783_s14  ;;  %v12354_v33 = vld [vmem:[#allocation12_spill] sm:$0xff] }
 0x477   : > { %8287 = vmatprep.mubr.msk.f32.mxu0 %vm609_vm2, %v4150_v56  ;;  %v8813_v56 = vpack.c.bf16 %v9203_v16, %v9202_v42  ;;  %v9223_v16 = vunpack.i.h.bf16 %v12354_v33  ;;  %v9222_v42 = vunpack.i.l.bf16 %v12354_v33 }
 0x478   : > { %v9618_v15 = vpop.eup %9617  ;;  %8288 = vmatmul.mubr.msk.f32.vlgmr.msra.gmra.mrb[38].mxu0 %vm609_vm2, %v4151_v0  ;;  %v3957_v26 = vpop.xlane.xlu0 %3956  ;;  %v12349_v0 = vld [vmem:[#allocation22_spill] sm:$0xff] }
 0x479   : > { %8800 = vmatpush3.bf16.msra.mxu0 %v8797_v4  ;;  %v4160_v1 = vmul.f32 %v9618_v15, %v11416_v41  ;;  %v9620_v62 = vpop.eup %9619  ;;  %v9207_v15 = vunpack.i.l.bf16 %v12351_v20 }
 0x47a   : > { %8806 = vmatprep.subr.bf16.mxu0 %v8805_v6  ;;  %9265 = vrot.lane.b32.xlu1 %v12344_v30, %s9783_s14  ;;  %v3981_v4 = vpop.xlane.xlu1 %3980  ;;  %v4155_v48 = vmul.f32 %v9620_v62, %v11412_v44  ;;  %v12348_v44 = vld [vmem:[#allocation26_spill] sm:$0xff] }
 0x47b   : > { %v9622_v2 = vpop.eup %9621  ;;  %8322 = vmatprep.mubr.msk.f32.mxu1 %vm609_vm2, %v4160_v1  ;;  %v12353_v30 = vld [vmem:[#allocation30_spill] sm:$0xff] }
 0x47c   : > { %8323 = vmatmul.mubr.msk.f32.vlgmr.msra.gmra.mrb[50].mxu1 %vm609_vm2, %v4161_v39  ;;  %v3936_v41 = vpop.xlane.xlu0 %3935  ;;  %v4154_v58 = vmul.f32 %v9622_v2, %v11423_v38 }
 0x47d   : > { %8820 = vmatpush3.bf16.msra.mxu1 %v8817_v12  ;;  %9625 = vrcp.f32 %v3936_v41 }
 0x47e   : > { %8826 = vmatprep.subr.bf16.mxu1 %v11709_v11  ;;  %9275 = vrot.lane.b32.xlu1 %v12346_v63, %s9783_s14  ;;  %9627 = vrcp.f32 %v3966_v28  ;;  %v3978_v12 = vpop.xlane.xlu1 %3977 }
 0x47f   : > { %8301 = vmatprep.mubr.msk.f32.mxu0 %vm609_vm2, %v4154_v58  ;;  %9255 = vrot.lane.b32.xlu0 %v12347_v3, %s9783_s14  ;;  %9629 = vrcp.f32 %v3957_v26  ;;  %v9624_v7 = vpop.eup %9623 }
 0x480   : > { %8302 = vmatmul.mubr.msk.f32.vlgmr.msra.gmra.mrb[40].mxu0 %vm609_vm2, %v4155_v48  ;;  %v3954_v38 = vpop.xlane.xlu0 %3953  ;;  %v4159_v62 = vmul.f32 %v9624_v7, %v11431_v31 }
 0x481   : > { %8808 = vmatpush3.bf16.msra.mxu0 %v8805_v6  ;;  %9631 = vrcp.f32 %v3954_v38  ;;  %v12352_v6 = vld [vmem:[#allocation25_spill] sm:$0xff]  ;;  %v12356_v38 = vld [vmem:[#allocation15_spill] sm:$0xff] }
 0x482   : > { %8814 = vmatprep.subr.bf16.mxu0 %v8813_v56  ;;  %9285 = vrot.lane.b32.xlu1 %v12348_v44, %s9783_s14  ;;  %9633 = vrcp.f32 %v3969_v50  ;;  %v9237_v44 = vunpack.i.l.bf16 %v12356_v38 }
 0x483   : > { %9270 = vrot.lane.b32.xlu0 %v12349_v0, %s9783_s14  ;;  %9635 = vrcp.f32 %v3978_v12  ;;  %v9238_v12 = vunpack.i.h.bf16 %v12356_v38  ;;  %v12357_v0 = vld [vmem:[#allocation29_spill] sm:$0xff] }
 0x484   : > { %v3951_v28 = vpop.xlane.xlu0 %3950  ;;  %9637 = vrcp.f32 %v3981_v4  ;;  %v12355_v4 = vld [vmem:[#allocation27_spill] sm:$0xff] }
 0x485   : > { %9639 = vrcp.f32 %v3951_v28 }
 0x486   : > { %9295 = vrot.lane.b32.xlu1 %v12350_v55, %s9783_s14  ;;  %v12358_v55 = vld [vmem:[#allocation20_spill] sm:$0xff] }
 0x487   : > { %v9626_v27 = vpop.eup %9625  ;;  %9280 = vrot.lane.b32.xlu0 %v12352_v6, %s9783_s14  ;;  %v12359_v6 = vld [vmem:[#allocation18_spill] sm:$0xff] }
 0x488   : > { %v3948_v26 = vpop.xlane.xlu0 %3947  ;;  %v4158_v1 = vmul.f32 %v9626_v27, %v11448_v43  ;;  %v9628_v50 = vpop.eup %9627  ;;  %v8821_v43 = vpack.c.bf16 %v9208_v49, %v9207_v15  ;;  %v9218_v27 = vunpack.i.h.bf16 %v12358_v55  ;;  %v9217_v15 = vunpack.i.l.bf16 %v12358_v55 }
 0x489   : > { %9641 = vrcp.f32 %v3948_v26  ;;  %v9630_v39 = vpop.eup %9629  ;;  %v4168_v63 = vmul.f32 %v9628_v50, %v11437_v45  ;;  %v9248_v26 = vunpack.i.h.bf16 %v12359_v6 }
 0x48a   : > { %9305 = vrot.lane.b32.xlu1 %v12353_v30, %s9783_s14  ;;  %8315 = vmatprep.mubr.msk.f32.mxu0 %vm609_vm2, %v4158_v1  ;;  %v4165_v58 = vmul.f32 %v9630_v39, %v11444_v61  ;;  %v8841_v1 = vpack.c.bf16 %v9238_v12, %v9237_v44  ;;  %v8829_v30 = vpack.c.bf16 %v9218_v27, %v9217_v15 }
 0x48b   : > { %v9632_v2 = vpop.eup %9631  ;;  %9290 = vrot.lane.b32.xlu0 %v12355_v4, %s9783_s14  ;;  %8316 = vmatmul.mubr.msk.f32.vlgmr.msra.gmra.mrb[42].mxu0 %vm609_vm2, %v4159_v62 }
 0x48c   : > { %8816 = vmatpush3.bf16.msra.mxu0 %v8813_v56  ;;  %v3963_v31 = vpop.xlane.xlu0 %3962  ;;  %v4164_v41 = vmul.f32 %v9632_v2, %v11457_v9  ;;  %v9634_v48 = vpop.eup %9633  ;;  %v8833_v56 = vpack.c.bf16 %v9223_v16, %v9222_v42 }
 0x48d   : > { %8822 = vmatprep.subr.bf16.mxu0 %v8821_v43  ;;  %v9636_v3 = vpop.eup %9635  ;;  %v4169_v45 = vmul.f32 %v9634_v48, %v11427_v22  ;;  %9643 = vrcp.f32 %v3963_v31 }
 0x48e   : > { %8336 = vmatprep.mubr.msk.f32.mxu1 %vm609_vm2, %v4164_v41  ;;  %v9638_v28 = vpop.eup %9637  ;;  %v4172_v20 = vmul.f32 %v9636_v3, %v11462_v13 }
 0x48f   : > { %9300 = vrot.lane.b32.xlu0 %v12357_v0, %s9783_s14  ;;  %8337 = vmatmul.mubr.msk.f32.vlgmr.msra.gmra.mrb[52].mxu1 %vm609_vm2, %v4165_v58  ;;  %v3975_v9 = vpop.xlane.xlu1 %3974  ;;  %v9640_v7 = vpop.eup %9639  ;;  %v4173_v39 = vmul.f32 %v9638_v28, %v11453_v60 }
 0x490   : > { %8828 = vmatpush3.bf16.msra.mxu1 %v11709_v11  ;;  %8350 = vmatprep.mubr.msk.f32.mxu1 %vm609_vm2, %v4168_v63  ;;  %v3960_v61 = vpop.xlane.xlu0 %3959  ;;  %v9247_v11 = vunpack.i.l.bf16 %v12359_v6  ;;  %v4163_v13 = vmul.f32 %v9640_v7, %v11473_v35  ;;  %v12362_v6 = vld [vmem:[#allocation31_spill] sm:$0xff] }
 0x491   : > { %8834 = vmatprep.subr.bf16.mxu1 %v8833_v56  ;;  %9645 = vrcp.f32 %v3960_v61 }
 0x492   : > { %v8849_v2 = vpack.c.bf16 %v9248_v26, %v9247_v11  ;;  %v9253_v26 = vunpack.i.h.bf16 %v12362_v6  ;;  %v9252_v11 = vunpack.i.l.bf16 %v12362_v6 }
 0x493   : > { %v9642_v49 = vpop.eup %9641  ;;  %8351 = vmatmul.mubr.msk.f32.vlgmr.msra.gmra.mrb[54].mxu1 %vm609_vm2, %v4169_v45  ;;  %v3990_v50 = vpop.xlane.xlu1 %3989 }
 0x494   : > { %8836 = vmatpush3.bf16.msra.mxu1 %v8833_v56  ;;  %8364 = vmatprep.mubr.msk.f32.mxu1 %vm609_vm2, %v4172_v20  ;;  %v3993_v22 = vpop.xlane.xlu0 %3992  ;;  %v4162_v62 = vmul.f32 %v9642_v49, %v11477_v53  ;;  %9647 = vrcp.f32 %v3990_v50  ;;  %v12360_v53 = vld [vmem:[#allocation21_spill] sm:$0xff]  ;;  %v12361_v56 = vld [vmem:[#allocation24_spill] sm:$0xff] }
 0x495   : > { %8842 = vmatprep.subr.bf16.mxu1 %v8841_v1  ;;  %9649 = vrcp.f32 %v3993_v22  ;;  %v9228_v42 = vunpack.i.h.bf16 %v12360_v53  ;;  %v9227_v4 = vunpack.i.l.bf16 %v12360_v53  ;;  %v9242_v61 = vunpack.i.l.bf16 %v12361_v56 }
 0x496   : > { %8329 = vmatprep.mubr.msk.f32.mxu0 %vm609_vm2, %v4162_v62  ;;  %9651 = vrcp.f32 %v3975_v9  ;;  %v9243_v9 = vunpack.i.h.bf16 %v12361_v56  ;;  %v8853_v62 = vpack.c.bf16 %v9253_v26, %v9252_v11 }
 0x497   : > { %8330 = vmatmul.mubr.msk.f32.vlgmr.msra.gmra.mrb[44].mxu0 %vm609_vm2, %v4163_v13  ;;  %8365 = vmatmul.mubr.msk.f32.vlgmr.msra.gmra.mrb[56].mxu1 %vm609_vm2, %v4173_v39  ;;  %v3987_v33 = vpop.xlane.xlu1 %3986  ;;  %v9644_v60 = vpop.eup %9643  ;;  %v8837_v38 = vpack.c.bf16 %v9228_v42, %v9227_v4 }
 0x498   : > { %8824 = vmatpush3.bf16.msra.mxu0 %v8821_v43  ;;  %8844 = vmatpush3.bf16.msra.mxu1 %v8841_v1  ;;  %v3972_v16 = vpop.xlane.xlu0 %3971  ;;  %v4167_v48 = vmul.f32 %v9644_v60, %v11490_v36  ;;  %v8845_v27 = vpack.c.bf16 %v9243_v9, %v9242_v61 }
 0x499   : > { %8830 = vmatprep.subr.bf16.mxu0 %v8829_v30  ;;  %8850 = vmatprep.subr.bf16.mxu1 %v8849_v2  ;;  %9653 = vrcp.f32 %v3972_v16 }
 0x49b   : > { %v9646_v35 = vpop.eup %9645  ;;  %v4002_v31 = vpop.xlane.xlu1 %4001 }
 0x49c   : > { %v4005_v41 = vpop.xlane.xlu0 %4004  ;;  %9655 = vrcp.f32 %v4002_v31  ;;  %v4166_v58 = vmul.f32 %v9646_v35, %v11497_v40 }
 0x49d   : > { %9657 = vrcp.f32 %v4005_v41 }
 0x49e   : > { %v9648_v43 = vpop.eup %9647  ;;  %8343 = vmatprep.mubr.msk.f32.mxu0 %vm609_vm2, %v4166_v58  ;;  %9659 = vrcp.f32 %v3987_v33 }
 0x49f   : > { %v9650_v63 = vpop.eup %9649  ;;  %v3999_v3 = vpop.xlane.xlu1 %3998  ;;  %8344 = vmatmul.mubr.msk.f32.vlgmr.msra.gmra.mrb[46].mxu0 %vm609_vm2, %v4167_v48  ;;  %v4176_v12 = vmul.f32 %v9648_v43, %v11514_v14 }
 0x4a0   : > { %v3984_v44 = vpop.xlane.xlu0 %3983  ;;  %v4177_v0 = vmul.f32 %v9650_v63, %v11512_v8  ;;  %8832 = vmatpush3.bf16.msra.mxu0 %v8829_v30  ;;  %v9652_v36 = vpop.eup %9651 }
 0x4a1   : > { %8838 = vmatprep.subr.bf16.mxu0 %v8837_v38  ;;  %8378 = vmatprep.mubr.msk.f32.mxu1 %vm609_vm2, %v4176_v12  ;;  %9661 = vrcp.f32 %v3984_v44  ;;  %v4171_v45 = vmul.f32 %v9652_v36, %v11504_v18 }
 0x4a2   : > { %8379 = vmatmul.mubr.msk.f32.vlgmr.msra.gmra.mrb[58].mxu1 %vm609_vm2, %v4177_v0 }
 0x4a3   : > { %v9654_v40 = vpop.eup %9653  ;;  %v4014_v28 = vpop.xlane.xlu1 %4013  ;;  %8852 = vmatpush3.bf16.msra.mxu1 %v8849_v2 }
 0x4a4   : > { %v11780_v14 = vpop.xlane.xlu0 %4016  ;;  %9663 = vrcp.f32 %v4014_v28  ;;  %v4170_v8 = vmul.f32 %v9654_v40, %v11518_v25 }
 0x4a5   : > { %9665 = vrcp.f32 %v3999_v3 }
 0x4a6   : > { %v9656_v7 = vpop.eup %9655  ;;  %8357 = vmatprep.mubr.msk.f32.mxu0 %vm609_vm2, %v4170_v8 }
 0x4a7   : > { %v9658_v55 = vpop.eup %9657  ;;  %8358 = vmatmul.mubr.msk.f32.vlgmr.msra.gmra.mrb[48].mxu0 %vm609_vm2, %v4171_v45  ;;  %v4180_v20 = vmul.f32 %v9656_v7, %v11534_v32 }
 0x4a8   : > { %v3996_v49 = vpop.xlane.xlu0 %3995  ;;  %v4181_v15 = vmul.f32 %v9658_v55, %v11532_v29  ;;  %8840 = vmatpush3.bf16.msra.mxu0 %v8837_v38  ;;  %v9660_v25 = vpop.eup %9659 }
 0x4a9   : > { %8846 = vmatprep.subr.bf16.mxu0 %v8845_v27  ;;  %8392 = vmatprep.mubr.msk.f32.mxu1 %vm609_vm2, %v4180_v20  ;;  %9667 = vrcp.f32 %v3996_v49  ;;  %v4175_v50 = vmul.f32 %v9660_v25, %v11524_v37  ;;  %v4011_v29 = vpop.xlane.xlu1 %4010 }
 0x4aa   : > { %8393 = vmatmul.mubr.msk.f32.vlgmr.msra.gmra.mrb[60].mxu1 %vm609_vm2, %v4181_v15  ;;  %9669 = vrcp.f32 %v4011_v29 }
 0x4ab   : > { %v9662_v18 = vpop.eup %9661 }
 0x4ac   : > { %v4029_v1 = vpop.xlane.xlu0 %4028  ;;  %v4174_v32 = vmul.f32 %v9662_v18, %v11542_v21 }
 0x4ae   : > { %v9664_v22 = vpop.eup %9663  ;;  %8371 = vmatprep.mubr.msk.f32.mxu0 %vm609_vm2, %v4174_v32 }
 0x4af   : > { %8372 = vmatmul.mubr.msk.f32.vlgmr.msra.gmra.mrb[50].mxu0 %vm609_vm2, %v4175_v50  ;;  %v4184_v39 = vmul.f32 %v9664_v22, %v11553_v57  ;;  %v9666_v30 = vpop.eup %9665  ;;  %v12364_v22 = vld [vmem:[#allocation41_spill] sm:$0xff] }
 0x4b0   : > { %v4008_v13 = vpop.xlane.xlu0 %4007  ;;  %8848 = vmatpush3.bf16.msra.mxu0 %v8845_v27  ;;  %v4179_v33 = vmul.f32 %v9666_v30, %v11544_v23 }
 0x4b1   : > { %8854 = vmatprep.subr.bf16.mxu0 %v8853_v62  ;;  %8406 = vmatprep.mubr.msk.f32.mxu1 %vm609_vm2, %v4184_v39  ;;  %9671 = vrcp.f32 %v4008_v13 }
 0x4b3   : > { %v9668_v21 = vpop.eup %9667 }
 0x4b4   : > { %v4178_v37 = vmul.f32 %v9668_v21, %v11557_v52  ;;  %v9670_v16 = vpop.eup %9669  ;;  %v4026_v52 = vpop.xlane.xlu1 %4025 }
 0x4b5   : > { %v4041_v2 = vpop.xlane.xlu0 %4040  ;;  %v4183_v53 = vmul.f32 %v9670_v16, %v11563_v17 }
 0x4b6   : > { %8385 = vmatprep.mubr.msk.f32.mxu0 %vm609_vm2, %v4178_v37 }
 0x4b7   : > { %8386 = vmatmul.mubr.msk.f32.vlgmr.msra.gmra.mrb[52].mxu0 %vm609_vm2, %v4179_v33 }
 0x4b8   : > { %8856 = vmatpush3.bf16.msra.mxu0 %v8853_v62  ;;  %v4023_v41 = vpop.xlane.xlu1 %4022 }
 0x4b9   : > { %v4020_v57 = vpop.xlane.xlu0 %4019 }
 0x4ba   : > { %9673 = vrcp.f32 %v4020_v57  ;;  %v12365_v57 = vld [vmem:[#allocation33_spill] sm:$0xff] }
 0x4bb   : > { %v9672_v60 = vpop.eup %9671  ;;  %9675 = vrcp.f32 %v4023_v41 }
 0x4bc   : > { %v4182_v35 = vmul.f32 %v9672_v60, %v11579_v59  ;;  %v4038_v58 = vpop.xlane.xlu1 %4037 }
 0x4be   : > { %8399 = vmatprep.mubr.msk.f32.mxu0 %vm609_vm2, %v4182_v35 }
 0x4bf   : > { %8400 = vmatmul.mubr.msk.f32.vlgmr.msra.gmra.mrb[54].mxu0 %vm609_vm2, %v4183_v53 }
 0x4c0   : > { %v4035_v17 = vpop.xlane.xlu1 %4034 }
 0x4c2   : > { %v4053_v43 = vpop.xlane.xlu0 %4052 }
 0x4c4   : > { %v9674_v42 = vpop.eup %9673 }
 0x4c5   : > { %v4186_v4 = vmul.f32 %v9674_v42, %v11594_v51  ;;  %v9676_v55 = vpop.eup %9675  ;;  %v12366_v42 = vld [vmem:[#allocation35_spill] sm:$0xff] }
 0x4c6   : > { %v11806_v23 = vpop.f32.mrb[40].mxu1  ;;  %v4050_v63 = vpop.xlane.xlu1 %4049 }
 0x4c7   : > { %v11809_v31 = vpop.f32.mrb[41].mxu1  ;;  %8413 = vmatprep.mubr.msk.f32.mxu0 %vm609_vm2, %v4186_v4  ;;  %v4032_v3 = vpop.xlane.xlu0 %4031 }
 0x4c8   : > { %9677 = vrcp.f32 %v4032_v3 }
 0x4c9   : > { %9679 = vrcp.f32 %v11780_v14  ;;  %v12363_v14 = vld [vmem:[#allocation34_spill] sm:$0xff] }
 0x4ca   : > { %v4047_v38 = vpop.xlane.xlu1 %4046  ;;  %9681 = vrcp.f32 %v4026_v52  ;;  %v4187_v26 = vmul.f32 %v9676_v55, %v12363_v14 }
 0x4cb   : > { %9683 = vrcp.f32 %v4029_v1 }
 0x4cc   : > { %9685 = vrcp.f32 %v4041_v2 }
 0x4cd   : > { %9687 = vrcp.f32 %v4038_v58 }
 0x4ce   : > { %9689 = vrcp.f32 %v4035_v17 }
 0x4cf   : > { %v11812_v48 = vpop.f32.mrb[42].mxu1 }
 0x4d0   : > { %v11814_v59 = vpop.f32.mrb[43].mxu1 }
 0x4d2   : > { %v9678_v49 = vpop.eup %9677 }
 0x4d3   : > { %v9680_v1 = vpop.eup %9679  ;;  %v4190_v62 = vmul.f32 %v9678_v49, %v12364_v22 }
 0x4d4   : > { %v9682_v39 = vpop.eup %9681  ;;  %v4185_v16 = vmul.f32 %v9680_v1, %v12365_v57 }
 0x4d5   : > { %v9684_v37 = vpop.eup %9683  ;;  %v4188_v4 = vmul.f32 %v9682_v39, %v12366_v42 }
 0x4d6   : > { %v9686_v33 = vpop.eup %9685 }
 0x4d7   : > { %v9688_v35 = vpop.eup %9687 }
 0x4d8   : > { %v9690_v41 = vpop.eup %9689 }
 0x4de   : > { %v11816_v12 = vpop.xlane.xlu0 %4064 }
 0x4e2   : > { %v4062_v44 = vpop.xlane.xlu1 %4061  ;;  %v4044_v0 = vpop.xlane.xlu0 %4043 }
 0x4e3   : > { %9691 = vrcp.f32 %v4044_v0 }
 0x4e4   : > { %9693 = vrcp.f32 %v4050_v63 }
 0x4e5   : > { %9695 = vrcp.f32 %v4047_v38 }
 0x4e6   : > { %v4059_v51 = vpop.xlane.xlu1 %4058 }
 0x4ea   : > { %v11818_v36 = vpop.xlane.xlu0 %4076 }
 0x4eb   : > { %v11820_v40 = vpop.xlane.xlu1 %4073 }
 0x4ed   : > { %v9692_v63 = vpop.eup %9691 }
 0x4ee   : > { %v4056_v56 = vpop.xlane.xlu0 %4055 }
 0x4ef   : > { %9697 = vrcp.f32 %v4056_v56  ;;  %v9694_v56 = vpop.eup %9693 }
 0x4f0   : > { %9699 = vrcp.f32 %v4053_v43 }
 0x4f1   : > { %9701 = vrcp.f32 %v4059_v51 }
 0x4f2   : > { %v11822_v9 = vpop.xlane.xlu1 %4070  ;;  %9703 = vrcp.f32 %v4062_v44  ;;  %v12367_v44 = vld [vmem:[#allocation32_spill] sm:$0xff] }
 0x4f3   : > { %v4189_v0 = vmul.f32 %v9684_v37, %v12367_v44 }
 0x4f6   : > { %v9261_v61 = vpop.permute.xlu1 %9260  ;;  %v4068_v28 = vpop.xlane.xlu0 %4067 }
 0x4f7   : > { %v9263_v8 = vunpack.i.h.bf16 %v9261_v61  ;;  %v9262_v45 = vunpack.i.l.bf16 %v9261_v61  ;;  %9705 = vrcp.f32 %v4068_v28  ;;  %v12368_v61 = vld [vmem:[#allocation38_spill] sm:$0xff] }
 0x4f8   : > { %9707 = vrcp.f32 %v11816_v12  ;;  %v4191_v28 = vmul.f32 %v9690_v41, %v12368_v61  ;;  %v9696_v12 = vpop.eup %9695 }
 0x4f9   : > { %v8861_v7 = vpack.c.bf16 %v9263_v8, %v9262_v45  ;;  %9709 = vrcp.f32 %v11822_v9 }
 0x4fa   : > { %v9266_v27 = vpop.permute.xlu1 %9265  ;;  %v9256_v20 = vpop.permute.xlu0 %9255  ;;  %9711 = vrcp.f32 %v11820_v40  ;;  %v4194_v40 = vmul.f32 %v9692_v63, %v11633_v24  ;;  %v12372_v24 = vld [vmem:[#allocation40_spill] sm:$0xff] }
 0x4fb   : > { %v9268_v15 = vunpack.i.h.bf16 %v9266_v27  ;;  %v9267_v25 = vunpack.i.l.bf16 %v9266_v27  ;;  %v9258_v18 = vunpack.i.h.bf16 %v9256_v20  ;;  %v9257_v6 = vunpack.i.l.bf16 %v9256_v20  ;;  %8862 = vmatprep.subr.bf16.mxu0 %v8861_v7  ;;  %v12369_v27 = vld [vmem:[#allocation36_spill] sm:$0xff]  ;;  %v9698_v20 = vpop.eup %9697 }
 0x4fc   : > { %8864 = vmatpush3.bf16.msra.mxu0 %v8861_v7  ;;  %9713 = vrcp.f32 %v11818_v36  ;;  %v4192_v9 = vmul.f32 %v9688_v35, %v12369_v27  ;;  %v9700_v36 = vpop.eup %9699 }
 0x4fd   : > { %v8857_v11 = vpack.c.bf16 %v9258_v18, %v9257_v6  ;;  %v8865_v32 = vpack.c.bf16 %v9268_v15, %v9267_v25  ;;  %v12370_v18 = vld [vmem:[#allocation37_spill] sm:$0xff] }
 0x4fe   : > { %v9276_v50 = vpop.permute.xlu1 %9275  ;;  %v9271_v29 = vpop.permute.xlu0 %9270  ;;  %v4193_v6 = vmul.f32 %v9686_v33, %v12370_v18  ;;  %v12373_v33 = vld [vmem:[#allocation39_spill] sm:$0xff] }
 0x4ff   : > { %v9278_v13 = vunpack.i.h.bf16 %v9276_v50  ;;  %v9277_v30 = vunpack.i.l.bf16 %v9276_v50  ;;  %v9273_v21 = vunpack.i.h.bf16 %v9271_v29  ;;  %v9272_v2 = vunpack.i.l.bf16 %v9271_v29  ;;  %8858 = vmatprep.subr.bf16.mxu1 %v8857_v11  ;;  %8414 = vmatmul.mubr.msk.f32.vlgmr.msra.gmra.mrb[56].mxu0 %vm609_vm2, %v4187_v26  ;;  %v12371_v26 = vld [vmem:[#allocation42_spill] sm:$0xff]  ;;  %v9702_v50 = vpop.eup %9701 }
 0x500   : > { %8860 = vmatpush3.bf16.msra.mxu1 %v8857_v11  ;;  %8427 = vmatprep.mubr.msk.f32.mxu0 %vm609_vm2, %v4190_v62  ;;  %v4195_v11 = vmul.f32 %v9696_v12, %v12371_v26  ;;  %v4196_v62 = vmul.f32 %v9694_v56, %v12372_v24  ;;  %v9704_v39 = vpop.eup %9703  ;;  %v4197_v57 = vmul.f32 %v9700_v36, %v12373_v33 }
 0x501   : > { %v8869_v60 = vpack.c.bf16 %v9273_v21, %v9272_v2  ;;  %8866 = vmatprep.subr.bf16.mxu1 %v8865_v32  ;;  %v8873_v58 = vpack.c.bf16 %v9278_v13, %v9277_v30  ;;  %v4198_v2 = vmul.f32 %v9698_v20, %v11656_v34  ;;  %v9706_v37 = vpop.eup %9705  ;;  %v4199_v35 = vmul.f32 %v9702_v50, %v11642_v47 }
 0x502   : > { %v9286_v53 = vpop.permute.xlu1 %9285  ;;  %v9281_v52 = vpop.permute.xlu0 %9280 }
 0x503   : > { %v9283_v17 = vunpack.i.h.bf16 %v9281_v52  ;;  %v9282_v43 = vunpack.i.l.bf16 %v9281_v52  ;;  %8407 = vmatmul.mubr.msk.f32.vlgmr.msra.gmra.mrb[62].mxu1 %vm609_vm2, %v4185_v16  ;;  %8870 = vmatprep.subr.bf16.mxu0 %v8869_v60  ;;  %v9288_v3 = vunpack.i.h.bf16 %v9286_v53  ;;  %v9287_v38 = vunpack.i.l.bf16 %v9286_v53 }
 0x504   : > { %8868 = vmatpush3.bf16.msra.mxu1 %v8865_v32  ;;  %8420 = vmatprep.mubr.msk.f32.mxu1 %vm609_vm2, %v4188_v4  ;;  %v4200_v52 = vmul.f32 %v9704_v39, %v11636_v10  ;;  %v4202_v4 = vmul.f32 %v9706_v37, %v11668_v46 }
 0x505   : > { %v8877_v51 = vpack.c.bf16 %v9283_v17, %v9282_v43  ;;  %8872 = vmatpush3.bf16.msra.mxu0 %v8869_v60  ;;  %8874 = vmatprep.subr.bf16.mxu1 %v8873_v58  ;;  %v8881_v49 = vpack.c.bf16 %v9288_v3, %v9287_v38  ;;  %v9708_v60 = vpop.eup %9707  ;;  %v12374_v17 = vld [vmem:[#allocation43_spill] sm:$0xff] }
 0x506   : > { %v9296_v8 = vpop.permute.xlu1 %9295  ;;  %v9291_v45 = vpop.permute.xlu0 %9290 }
 0x507   : > { %v9293_v7 = vunpack.i.h.bf16 %v9291_v45  ;;  %v9292_v55 = vunpack.i.l.bf16 %v9291_v45  ;;  %8421 = vmatmul.mubr.msk.f32.vlgmr.msra.gmra.mrb[64].mxu1 %vm609_vm2, %v4189_v0  ;;  %8878 = vmatprep.subr.bf16.mxu0 %v8877_v51  ;;  %v9298_v15 = vunpack.i.h.bf16 %v9296_v8  ;;  %v9297_v25 = vunpack.i.l.bf16 %v9296_v8  ;;  %v9710_v53 = vpop.eup %9709 }
 0x508   : > { %8428 = vmatmul.mubr.msk.f32.vlgmr.msra.gmra.mrb[58].mxu0 %vm609_vm2, %v4191_v28  ;;  %8876 = vmatpush3.bf16.msra.mxu1 %v8873_v58  ;;  %v9712_v34 = vpop.eup %9711  ;;  %v4201_v58 = vmul.f32 %v9708_v60, %v11629_v54  ;;  %v4203_v47 = vmul.f32 %v9710_v53, %v11660_v19 }
 0x509   : > { %v8885_v14 = vpack.c.bf16 %v9293_v7, %v9292_v55  ;;  %8434 = vmatprep.mubr.msk.f32.mxu1 %vm609_vm2, %v4192_v9  ;;  %8880 = vmatpush3.bf16.msra.mxu0 %v8877_v51  ;;  %v8889_v13 = vpack.c.bf16 %v9298_v15, %v9297_v25  ;;  %v9714_v41 = vpop.eup %9713  ;;  %v4204_v10 = vmul.f32 %v9712_v34, %v11650_v5 }
 0x50a   : > { %8441 = vmatprep.mubr.msk.f32.mxu0 %vm609_vm2, %v4194_v40  ;;  %8882 = vmatprep.subr.bf16.mxu1 %v8881_v49  ;;  %v9306_v1 = vpop.permute.xlu1 %9305  ;;  %v9301_v32 = vpop.permute.xlu0 %9300  ;;  %v4205_v46 = vmul.f32 %v9714_v41, %v12374_v17  ;;  %v7304_v17 = vld [vmem:[%s12136_s3 + $0x8] sm:$0xff] }
 0x50b   : > { %v9303_v29 = vunpack.i.h.bf16 %v9301_v32  ;;  %v9302_v22 = vunpack.i.l.bf16 %v9301_v32  ;;  %8435 = vmatmul.mubr.msk.f32.vlgmr.msra.gmra.mrb[66].mxu1 %vm609_vm2, %v4193_v6  ;;  %8886 = vmatprep.subr.bf16.mxu0 %v8885_v14  ;;  %v9308_v30 = vunpack.i.h.bf16 %v9306_v1  ;;  %v9307_v21 = vunpack.i.l.bf16 %v9306_v1 }
 0x50c   : > { %8442 = vmatmul.mubr.msk.f32.vlgmr.msra.gmra.mrb[60].mxu0 %vm609_vm2, %v4195_v11  ;;  %8884 = vmatpush3.bf16.msra.mxu1 %v8881_v49 }
 0x50d   : > { %v8893_v16 = vpack.c.bf16 %v9303_v29, %v9302_v22  ;;  %8448 = vmatprep.mubr.msk.f32.mxu1 %vm609_vm2, %v4196_v62  ;;  %8888 = vmatpush3.bf16.msra.mxu0 %v8885_v14  ;;  %v8897_v42 = vpack.c.bf16 %v9308_v30, %v9307_v21 }
 0x50e   : > { %8455 = vmatprep.mubr.msk.f32.mxu0 %vm609_vm2, %v4198_v2  ;;  %8890 = vmatprep.subr.bf16.mxu1 %v8889_v13 }
 0x50f   : > { %8449 = vmatmul.mubr.msk.f32.vlgmr.msra.gmra.mrb[68].mxu1 %vm609_vm2, %v4197_v57  ;;  %8894 = vmatprep.subr.bf16.mxu0 %v8893_v16 }
 0x510   : > { %8456 = vmatmul.mubr.msk.f32.vlgmr.msra.gmra.mrb[62].mxu0 %vm609_vm2, %v4199_v35  ;;  %8892 = vmatpush3.bf16.msra.mxu1 %v8889_v13 }
 0x511   : > { %8462 = vmatprep.mubr.msk.f32.mxu1 %vm609_vm2, %v4200_v52  ;;  %8896 = vmatpush3.bf16.msra.mxu0 %v8893_v16 }
 0x512   : > { %8469 = vmatprep.mubr.msk.f32.mxu0 %vm609_vm2, %v4202_v4  ;;  %8898 = vmatprep.subr.bf16.mxu1 %v8897_v42 }
 0x513   : > { %8463 = vmatmul.mubr.msk.f32.vlgmr.msra.gmra.mrb[70].mxu1 %vm609_vm2, %v4201_v58 }
 0x514   : > { %8470 = vmatmul.mubr.msk.f32.vlgmr.msra.gmra.mrb[64].mxu0 %vm609_vm2, %v4203_v47  ;;  %8900 = vmatpush3.bf16.msra.mxu1 %v8897_v42 }
 0x515   : > { %8476 = vmatprep.mubr.msk.f32.mxu1 %vm609_vm2, %v4204_v10  ;;  %v7303_v10 = vld [vmem:[%s12136_s3] sm:$0xff] }
 0x517   : > { %8477 = vmatmul.mubr.msk.f32.vlgmr.msra.gmra.mrb[72].mxu1 %vm609_vm2, %v4205_v46  ;;  %v8901_v46 = vpack.c.bf16 %v7304_v17, %v7303_v10 }
 0x519   : > { %8902 = vmatprep.subr.bf16.mxu0 %v8901_v46 }
 0x51a   : > { %8904 = vmatpush3.bf16.msra.mxu0 %v8901_v46 }
 0x53b   : > { %v8282_v54 = vpop.f32.mrb[44].mxu1 }
 0x53c   : > { %v4545_v43 = vpop.f32.mrb[45].mxu1 }
 0x53d   : > { %v9314_v63 = vpack.i.bf16 %v8282_v54, %v4545_v43  ;;  %v7305_v54 = vld [vmem:[%s12136_s3 + $0x10] sm:$0xff]  ;;  %v7306_v43 = vld [vmem:[%s12136_s3 + $0x18] sm:$0xff] }
 0x540   : > { %v8296_v19 = vpop.f32.mrb[46].mxu1 }
 0x541   : > { %v4719_v3 = vpop.f32.mrb[47].mxu1 }
 0x542   : > { %v9319_v38 = vpack.i.bf16 %v8296_v19, %v4719_v3  ;;  %v8275_v44 = vpop.f32.mrb[36].mxu0  ;;  %v7307_v19 = vld [vmem:[%s12136_s3 + $0x20] sm:$0xff]  ;;  %v7308_v3 = vld [vmem:[%s12136_s3 + $0x28] sm:$0xff] }
 0x543   : > { %v4458_v0 = vpop.f32.mrb[37].mxu0 }
 0x544   : > { %v9309_v51 = vpack.i.bf16 %v8275_v44, %v4458_v0  ;;  %v8909_v44 = vpack.c.bf16 %v7308_v3, %v7307_v19 }
 0x546   : > { %9310 = vrot.lane.b32.xlu0 %v9309_v51, %s9781_s13 }
 0x547   : > { %v8310_v5 = vpop.f32.mrb[48].mxu1 }
 0x548   : > { %v4893_v56 = vpop.f32.mrb[49].mxu1 }
 0x549   : > { %v9329_v61 = vpack.i.bf16 %v8310_v5, %v4893_v56  ;;  %v7309_v5 = vld [vmem:[%s12136_s3 + $0x30] sm:$0xff]  ;;  %v7310_v56 = vld [vmem:[%s12136_s3 + $0x38] sm:$0xff] }
 0x54a   : > { %9315 = vrot.lane.b32.xlu0 %v9314_v63, %s9781_s13  ;;  %v8905_v63 = vpack.c.bf16 %v7306_v43, %v7305_v54 }
 0x54b   : > { %v8289_v28 = vpop.f32.mrb[38].mxu0 }
 0x54c   : > { %v4632_v8 = vpop.f32.mrb[39].mxu0  ;;  %8906 = vmatprep.subr.bf16.mxu0 %v8905_v63 }
 0x54d   : > { %v9324_v45 = vpack.i.bf16 %v8289_v28, %v4632_v8  ;;  %8908 = vmatpush3.bf16.msra.mxu0 %v8905_v63  ;;  %v8913_v28 = vpack.c.bf16 %v7310_v56, %v7309_v5 }
 0x54e   : > { %9320 = vrot.lane.b32.xlu0 %v9319_v38, %s9790_s28  ;;  %8910 = vmatprep.subr.bf16.mxu0 %v8909_v44 }
 0x54f   : > { %9325 = vrot.lane.b32.xlu1 %v9324_v45, %s9790_s28  ;;  %v8324_v12 = vpop.f32.mrb[50].mxu1 }
 0x550   : > { %v5067_v7 = vpop.f32.mrb[51].mxu1 }
 0x551   : > { %v9339_v55 = vpack.i.bf16 %v8324_v12, %v5067_v7  ;;  %8912 = vmatpush3.bf16.msra.mxu0 %v8909_v44  ;;  %v7311_v12 = vld [vmem:[%s12136_s3 + $0x40] sm:$0xff]  ;;  %v7312_v7 = vld [vmem:[%s12136_s3 + $0x48] sm:$0xff] }
 0x552   : > { %9330 = vrot.lane.b32.xlu0 %v9329_v61, %s9794_s11  ;;  %8914 = vmatprep.subr.bf16.mxu0 %v8913_v28 }
 0x553   : > { %v8303_v27 = vpop.f32.mrb[40].mxu0 }
 0x554   : > { %v4806_v9 = vpop.f32.mrb[41].mxu0 }
 0x555   : > { %v9334_v20 = vpack.i.bf16 %v8303_v27, %v4806_v9  ;;  %8916 = vmatpush3.bf16.msra.mxu0 %v8913_v28  ;;  %v8917_v27 = vpack.c.bf16 %v7312_v7, %v7311_v12 }
 0x557   : > { %9335 = vrot.lane.b32.xlu0 %v9334_v20, %s9794_s11  ;;  %8918 = vmatprep.subr.bf16.mxu0 %v8917_v27  ;;  %s7696_s11 = sshll.u32 %s9853_s25, 9 }
 0x558   : > { %s12089_s29 = scalar_lea.hbm %s12139_s6, %s7696_s11 }
 0x559   : > { %8920 = vmatpush3.bf16.msra.mxu0 %v8917_v27 }
 0x55b   : > { %9340 = vrot.lane.b32.xlu0 %v9339_v55, %s9786_s18 }
 0x55e   : > { %v8317_v49 = vpop.f32.mrb[42].mxu0 }
 0x55f   : > { %v4980_v15 = vpop.f32.mrb[43].mxu0 }
 0x560   : > { %v9344_v25 = vpack.i.bf16 %v8317_v49, %v4980_v15 }
 0x562   : > { %9345 = vrot.lane.b32.xlu1 %v9344_v25, %s9786_s18  ;;  %v8338_v40 = vpop.f32.mrb[52].mxu1  ;;  %s12375_s18 = smov 72  }
 0x563   : > { %v5241_v18 = vpop.f32.mrb[53].mxu1 }
 0x564   : > { %v9349_v6 = vpack.i.bf16 %v8338_v40, %v5241_v18  ;;  %v7313_v40 = vld [vmem:[%s12136_s3 + $0x50] sm:$0xff]  ;;  %v7314_v18 = vld [vmem:[%s12136_s3 + $0x58] sm:$0xff] }
 0x566   : > { %9350 = vrot.lane.b32.xlu0 %v9349_v6, %s9788_s20  ;;  %v8352_v14 = vpop.f32.mrb[54].mxu1 }
 0x567   : > { %v5415_v36 = vpop.f32.mrb[55].mxu1 }
 0x568   : > { %v9359_v26 = vpack.i.bf16 %v8352_v14, %v5415_v36  ;;  %v8921_v14 = vpack.c.bf16 %v7314_v18, %v7313_v40 }
 0x56a   : > { %9360 = vrot.lane.b32.xlu0 %v9359_v26, %s9793_s10  ;;  %v8331_v11 = vpop.f32.mrb[44].mxu0  ;;  %v8366_v1 = vpop.f32.mrb[56].mxu1  ;;  %8922 = vmatprep.subr.bf16.mxu0 %v8921_v14 }
 0x56b   : > { %v5154_v32 = vpop.f32.mrb[45].mxu0  ;;  %v5589_v50 = vpop.f32.mrb[57].mxu1  ;;  %8924 = vmatpush3.bf16.msra.mxu0 %v8921_v14 }
 0x56c   : > { %v9354_v29 = vpack.i.bf16 %v8331_v11, %v5154_v32  ;;  %v9369_v22 = vpack.i.bf16 %v8366_v1, %v5589_v50  ;;  %v7315_v50 = vld [vmem:[%s12136_s3 + $0x60] sm:$0xff] }
 0x56e   : > { %9370 = vrot.lane.b32.xlu0 %v9369_v22, %s9784_s16  ;;  %9355 = vrot.lane.b32.xlu1 %v9354_v29, %s9788_s20  ;;  %s12376_s20 = smov 80   ;;  %v7316_v29 = vld [vmem:[%s12136_s3 + $0x68] sm:$0xff] }
 0x572   : > { %v8345_v24 = vpop.f32.mrb[46].mxu0 }
 0x573   : > { %v5328_v62 = vpop.f32.mrb[47].mxu0 }
 0x574   : > { %v9364_v39 = vpack.i.bf16 %v8345_v24, %v5328_v62  ;;  %v8925_v24 = vpack.c.bf16 %v7316_v29, %v7315_v50 }
 0x575   : > { %v8380_v13 = vpop.f32.mrb[58].mxu1 }
 0x576   : > { %9365 = vrot.lane.b32.xlu1 %v9364_v39, %s9793_s10  ;;  %v5763_v30 = vpop.f32.mrb[59].mxu1  ;;  %8926 = vmatprep.subr.bf16.mxu0 %v8925_v24 }
 0x577   : > { %v9379_v21 = vpack.i.bf16 %v8380_v13, %v5763_v30  ;;  %8928 = vmatpush3.bf16.msra.mxu0 %v8925_v24 }
 0x579   : > { %9380 = vrot.lane.b32.xlu0 %v9379_v21, %s9785_s17 }
 0x57a   : > { %v8359_v2 = vpop.f32.mrb[48].mxu0 }
 0x57b   : > { %v5502_v37 = vpop.f32.mrb[49].mxu0 }
 0x57c   : > { %v9374_v33 = vpack.i.bf16 %v8359_v2, %v5502_v37  ;;  %v7317_v2 = vld [vmem:[%s12136_s3 + $0x70] sm:$0xff]  ;;  %v7318_v37 = vld [vmem:[%s12136_s3 + $0x78] sm:$0xff] }
 0x57d   : > { %v8394_v57 = vpop.f32.mrb[60].mxu1 }
 0x57e   : > { %9375 = vrot.lane.b32.xlu1 %v9374_v33, %s9784_s16  ;;  %v5937_v16 = vpop.f32.mrb[61].mxu1 }
 0x57f   : > { %v9389_v60 = vpack.i.bf16 %v8394_v57, %v5937_v16  ;;  %v8929_v57 = vpack.c.bf16 %v7318_v37, %v7317_v2 }
 0x581   : > { %9390 = vrot.lane.b32.xlu0 %v9389_v60, %s12375_s18  ;;  %8930 = vmatprep.subr.bf16.mxu0 %v8929_v57 }
 0x582   : > { %v8373_v35 = vpop.f32.mrb[50].mxu0  ;;  %8932 = vmatpush3.bf16.msra.mxu0 %v8929_v57 }
 0x583   : > { %v5676_v53 = vpop.f32.mrb[51].mxu0 }
 0x584   : > { %v9384_v52 = vpack.i.bf16 %v8373_v35, %v5676_v53 }
 0x586   : > { %9385 = vrot.lane.b32.xlu1 %v9384_v52, %s9785_s17  ;;  %s12377_s17 = smov 88  }
 0x58a   : > { %v8387_v34 = vpop.f32.mrb[52].mxu0 }
 0x58b   : > { %v5850_v42 = vpop.f32.mrb[53].mxu0 }
 0x58c   : > { %v9394_v4 = vpack.i.bf16 %v8387_v34, %v5850_v42 }
 0x58e   : > { %9395 = vrot.lane.b32.xlu1 %v9394_v4, %s12375_s18 }
 0x592   : > { %v8401_v41 = vpop.f32.mrb[54].mxu0 }
 0x593   : > { %v6024_v58 = vpop.f32.mrb[55].mxu0 }
 0x594   : > { %v9404_v47 = vpack.i.bf16 %v8401_v41, %v6024_v58 }
 0x596   : > { %9405 = vrot.lane.b32.xlu1 %v9404_v47, %s12376_s20 }
 0x5b8   : > { %v9311_v41 = vpop.permute.xlu0 %9310 }
 0x5bc   : > { %v9316_v58 = vpop.permute.xlu0 %9315 }
 0x5bd   : > { %v9318_v56 = vunpack.i.h.bf16 %v9316_v58 }
 0x5c0   : > { %v9321_v47 = vpop.permute.xlu0 %9320 }
 0x5c1   : > { %v9326_v17 = vpop.permute.xlu1 %9325  ;;  %v9323_v12 = vunpack.i.h.bf16 %v9321_v47  ;;  %v9322_v7 = vunpack.i.l.bf16 %v9321_v47 }
 0x5c2   : > { %v9328_v27 = vunpack.i.h.bf16 %v9326_v17 }
 0x5c4   : > { %v9331_v10 = vpop.permute.xlu0 %9330 }
 0x5c9   : > { %v9336_v46 = vpop.permute.xlu0 %9335 }
 0x5ca   : > { %v9338_v40 = vunpack.i.h.bf16 %v9336_v46  ;;  %v9337_v18 = vunpack.i.l.bf16 %v9336_v46 }
 0x5cd   : > { %v9341_v43 = vpop.permute.xlu0 %9340 }
 0x5ce   : > { %v9342_v50 = vunpack.i.l.bf16 %v9341_v43 }
 0x5d2   : > { %v8415_v38 = vpop.f32.mrb[56].mxu0 }
 0x5d3   : > { %v6198_v0 = vpop.f32.mrb[57].mxu0 }
 0x5d4   : > { %v9414_v51 = vpack.i.bf16 %v8415_v38, %v6198_v0  ;;  %v11947_v54 = vpop.permute.xlu1 %9345 }
 0x5d6   : > { %9415 = vrot.lane.b32.xlu1 %v9414_v51, %s12377_s17  ;;  %v8408_v61 = vpop.f32.mrb[62].mxu1 }
 0x5d7   : > { %v6111_v8 = vpop.f32.mrb[63].mxu1 }
 0x5d8   : > { %v9399_v45 = vpack.i.bf16 %v8408_v61, %v6111_v8  ;;  %v11951_v19 = vpop.permute.xlu0 %9350  ;;  %v9317_v61 = vunpack.i.l.bf16 %v9316_v58  ;;  %v9313_v8 = vunpack.i.h.bf16 %v9311_v41 }
 0x5da   : > { %9400 = vrot.lane.b32.xlu0 %v9399_v45, %s12376_s20  ;;  %v8422_v55 = vpop.f32.mrb[64].mxu1  ;;  %s12378_s20 = smov 96   ;;  %v9312_v45 = vunpack.i.l.bf16 %v9311_v41  ;;  %v7231_v14 = vsel %vm552_vm0, %v11806_v23, %v9313_v8 }
 0x5db   : > { %v8429_v9 = vpop.f32.mrb[58].mxu0  ;;  %v6285_v20 = vpop.f32.mrb[65].mxu1 }
 0x5dc   : > { %v9409_v49 = vpack.i.bf16 %v8422_v55, %v6285_v20  ;;  %v6372_v15 = vpop.f32.mrb[59].mxu0  ;;  %v11957_v44 = vpop.permute.xlu0 %9360  ;;  %v9333_v20 = vunpack.i.h.bf16 %v9331_v10 }
 0x5dd   : > { %v9424_v25 = vpack.i.bf16 %v8429_v9, %v6372_v15  ;;  %v9327_v9 = vunpack.i.l.bf16 %v9326_v17  ;;  %v7233_v15 = vsel %vm552_vm0, %v11812_v48, %v9318_v56  ;;  %v9362_v2 = vunpack.i.l.bf16 %v11957_v44 }
 0x5de   : > { %9410 = vrot.lane.b32.xlu0 %v9409_v49, %s12377_s17  ;;  %v8436_v6 = vpop.f32.mrb[66].mxu1  ;;  %v9332_v49 = vunpack.i.l.bf16 %v9331_v10 }
 0x5df   : > { %9425 = vrot.lane.b32.xlu1 %v9424_v25, %s12378_s20  ;;  %v8443_v36 = vpop.f32.mrb[60].mxu0  ;;  %v6459_v26 = vpop.f32.mrb[67].mxu1  ;;  %v7232_v25 = vsel %vm552_vm0, %v11814_v59, %v9317_v61  ;;  %v7235_v59 = vsel %vm609_vm2, %v7231_v14, %v9328_v27 }
 0x5e0   : > { %v9419_v11 = vpack.i.bf16 %v8436_v6, %v6459_v26  ;;  %v6546_v1 = vpop.f32.mrb[61].mxu0  ;;  %v11949_v63 = vpop.permute.xlu1 %9355  ;;  %v7236_v26 = vsel %vm609_vm2, %v7232_v25, %v9322_v7 }
 0x5e1   : > { %v9434_v32 = vpack.i.bf16 %v8443_v36, %v6546_v1  ;;  %v11961_v51 = vpop.permute.xlu0 %9370  ;;  %v7230_v36 = vsel %vm552_vm0, %v11809_v31, %v9312_v45  ;;  %v7241_v29 = vsel %vm7238_vm3, %v7236_v26, %v9332_v49  ;;  %v9347_v31 = vunpack.i.l.bf16 %v11947_v54 }
 0x5e2   : > { %9420 = vrot.lane.b32.xlu0 %v9419_v11, %s12378_s20  ;;  %v8450_v22 = vpop.f32.mrb[68].mxu1  ;;  %v7237_v11 = vsel %vm609_vm2, %v7233_v15, %v9323_v12  ;;  %v7234_v48 = vsel %vm609_vm2, %v7230_v36, %v9327_v9  ;;  %v9358_v37 = vunpack.i.h.bf16 %v11949_v63 }
 0x5e3   : > { %v8457_v62 = vpop.f32.mrb[62].mxu0  ;;  %v6633_v39 = vpop.f32.mrb[69].mxu1  ;;  %v7242_v23 = vsel %vm7238_vm3, %v7237_v11, %v9333_v20  ;;  %v7239_v24 = vsel %vm7238_vm3, %v7234_v48, %v9337_v18 }
 0x5e4   : > { %v9429_v13 = vpack.i.bf16 %v8450_v22, %v6633_v39  ;;  %v6720_v30 = vpop.f32.mrb[63].mxu0  ;;  %v9348_v22 = vunpack.i.h.bf16 %v11947_v54  ;;  %v9353_v39 = vunpack.i.h.bf16 %v11951_v19 }
 0x5e5   : > { %v9439_v21 = vpack.i.bf16 %v8457_v62, %v6720_v30  ;;  %v7240_v62 = vsel %vm7238_vm3, %v7235_v59, %v9338_v40 }
 0x5e6   : > { %9430 = vrot.lane.b32.xlu1 %v9429_v13, %s12379_s12  ;;  %v8464_v33 = vpop.f32.mrb[70].mxu1  ;;  %v9352_v13 = vunpack.i.l.bf16 %v11951_v19 }
 0x5e7   : > { %v8471_v16 = vpop.f32.mrb[64].mxu0  ;;  %v6807_v60 = vpop.f32.mrb[71].mxu1 }
 0x5e8   : > { %v9449_v35 = vpack.i.bf16 %v8464_v33, %v6807_v60  ;;  %v6894_v53 = vpop.f32.mrb[65].mxu0  ;;  %v11953_v3 = vpop.permute.xlu1 %9365  ;;  %v9357_v33 = vunpack.i.l.bf16 %v11949_v63 }
 0x5e9   : > { %v9444_v52 = vpack.i.bf16 %v8471_v16, %v6894_v53  ;;  %v7246_v16 = vsel %vm7243_vm4, %v7241_v29, %v9342_v50  ;;  %v9372_v53 = vunpack.i.l.bf16 %v11961_v51 }
 0x5ea   : > { %9435 = vrot.lane.b32.xlu1 %v9434_v32, %s12379_s12  ;;  %9450 = vrot.lane.b32.xlu0 %v9449_v35, %s9783_s14  ;;  %v8478_v34 = vpop.f32.mrb[72].mxu1  ;;  %v9343_v32 = vunpack.i.h.bf16 %v9341_v43  ;;  %v9373_v35 = vunpack.i.h.bf16 %v11961_v51  ;;  %v7251_v41 = vsel %vm7248_vm5, %v7246_v16, %v9352_v13  ;;  %s9719_s12 = sshll.u32 %s9795_s26, 4  ;;  %s9720_s12 = int_to_ptr.vmem [resolvable:$false] %s9719_s12 }
 0x5eb   : > { %v6981_v42 = vpop.f32.mrb[73].mxu1  ;;  %v11965_v28 = vpop.permute.xlu0 %9380  ;;  %v7256_v17 = vsel %vm7253_vm6, %v7251_v41, %v9362_v2 }
 0x5ec   : > { %v9454_v4 = vpack.i.bf16 %v8478_v34, %v6981_v42  ;;  %v7247_v60 = vsel %vm7243_vm4, %v7242_v23, %v9343_v32  ;;  %v7245_v34 = vsel %vm7243_vm4, %v7240_v62, %v9348_v22  ;;  %v9368_v42 = vunpack.i.h.bf16 %v11953_v3 }
 0x5ed   : > { %v7252_v58 = vsel %vm7248_vm5, %v7247_v60, %v9353_v39  ;;  %v9383_v47 = vunpack.i.h.bf16 %v11965_v28  ;;  %v9382_v10 = vunpack.i.l.bf16 %v11965_v28  ;;  %v7250_v43 = vsel %vm7248_vm5, %v7245_v34, %v9358_v37 }
 0x5ee   : > { %9440 = vrot.lane.b32.xlu1 %v9439_v21, %s9783_s14  ;;  %v9363_v21 = vunpack.i.h.bf16 %v11957_v44  ;;  %v7261_v19 = vsel %vm7258_vm7, %v7256_v17, %v9372_v53  ;;  %v7255_v28 = vsel %vm7253_vm6, %v7250_v43, %v9368_v42  ;;  %s243_s14 = sand.u32 1, %s9769_s22  }
 0x5ef   : > { %v7266_v12 = vsel %vm7263_vm8, %v7261_v19, %v9382_v10  ;;  %s7495_s18 = sshll.u32 %s243_s14, 5  ;;  %s12091_s9 = scalar_lea.sflag [#allocation3], %s243_s14 }
 0x5f0   : > { %v11955_v38 = vpop.permute.xlu1 %9375  ;;  %v7257_v46 = vsel %vm7253_vm6, %v7252_v58, %v9363_v21  ;;  %s245_s28 = scalar_lea.vmem [#allocation2], %s7495_s18 }
 0x5f1   : > { %v9378_v44 = vunpack.i.h.bf16 %v11955_v38  ;;  %v9377_v51 = vunpack.i.l.bf16 %v11955_v38  ;;  %s7429_s10 = sshll.u32 %s245_s28, 4  ;;  %s12084_s10 = int_to_ptr.vmem [resolvable:$true] %s7429_s10 }
 0x5f2   : > { %9445 = vrot.lane.b32.xlu1 %v9444_v52, %s12380_s15  ;;  %v7244_v52 = vsel %vm7243_vm4, %v7239_v24, %v9347_v31  ;;  %s9715_s25 = scalar_lea.vmem %s12084_s10, 512  ;;  %p9722_p0 = scmp.lt.s32.totalorder %s12084_s10, %s9720_s12 }
 0x5f3   : > { %v11973_v6 = vpop.permute.xlu0 %9390  ;;  %v7249_v54 = vsel %vm7248_vm5, %v7244_v52, %v9357_v33  ;;  %v7260_v40 = vsel %vm7258_vm7, %v7255_v28, %v9378_v44  ;;  %p9716_p11 = scmp.ne.s32.totalorder %s12084_s10, %s9715_s25 }
 0x5f4   : > { %v9393_v38 = vunpack.i.h.bf16 %v11973_v6  ;;  %v9392_v20 = vunpack.i.l.bf16 %v11973_v6 }
 0x5f5   : > { %p9717_p12 = pnand %p9716_p11, %p9870_p5 }
 0x5f6   : > { %9455 = vrot.lane.b32.xlu1 %v9454_v4, %s12380_s15  ;;  %v9367_v4 = vunpack.i.l.bf16 %v11953_v3  ;;  %v7262_v3 = vsel %vm7258_vm7, %v7257_v46, %v9373_v35  ;;  %s9721_s15 = scalar_lea.vmem %s9720_s12, 1024 }
 0x5f7   : > { %v7267_v7 = vsel %vm7263_vm8, %v7262_v3, %v9383_v47  ;;  %p9718_p13 = pneg %p9717_p12  ;;  %p9723_p1 = scmp.lt.s32.totalorder %s9721_s15, %s9715_s25 }
 0x5f8   : > { %v11959_v0 = vpop.permute.xlu1 %9385  ;;  %v7254_v61 = vsel %vm7253_vm6, %v7249_v54, %v9367_v4  ;;  %v7272_v50 = vsel %vm7268_vm9, %v7267_v7, %v9393_v38  ;;  %v7690_v38 = vld [vmem:[%s12137_s4] ss:$0 sm:$0xff] }
 0x5f9   : > { %v9388_v8 = vunpack.i.h.bf16 %v11959_v0  ;;  %v9387_v45 = vunpack.i.l.bf16 %v11959_v0  ;;  %v7259_v0 = vsel %vm7258_vm7, %v7254_v61, %v9377_v51  ;;  %p9724_p2 = por %p9723_p1, %p9722_p0 }
 0x5fb   : > { %v7265_v6 = vsel %vm7263_vm8, %v7260_v40, %v9388_v8  ;;  %p9725_p3 = pnand %p9724_p2, %p9718_p13 }
 0x600   : > { %v11963_v5 = vpop.permute.xlu1 %9395 }
 0x601   : > { %v9398_v27 = vunpack.i.h.bf16 %v11963_v5  ;;  %v9397_v9 = vunpack.i.l.bf16 %v11963_v5  ;;  %v7264_v5 = vsel %vm7263_vm8, %v7259_v0, %v9387_v45 }
 0x603   : > { %v7269_v26 = vsel %vm7268_vm9, %v7264_v5, %v9397_v9  ;;  %v7270_v11 = vsel %vm7268_vm9, %v7265_v6, %v9398_v27 }
 0x608   : > { %v11967_v55 = vpop.permute.xlu1 %9405 }
 0x609   : > { %v9408_v49 = vunpack.i.h.bf16 %v11967_v55  ;;  %v9407_v15 = vunpack.i.l.bf16 %v11967_v55 }
 0x60b   : > { %v7274_v29 = vsel %vm7273_vm10, %v7269_v26, %v9407_v15  ;;  %v7275_v23 = vsel %vm7273_vm10, %v7270_v11, %v9408_v49 }
 0x648   : > { %v11981_v1 = vpop.permute.xlu1 %9415 }
 0x649   : > { %v9418_v18 = vunpack.i.h.bf16 %v11981_v1  ;;  %v9417_v14 = vunpack.i.l.bf16 %v11981_v1  ;;  %v7271_v1 = vsel %vm7268_vm9, %v7266_v12, %v9392_v20 }
 0x64b   : > { %v7279_v31 = vsel %vm7278_vm11, %v7274_v29, %v9417_v14  ;;  %v7280_v24 = vsel %vm7278_vm11, %v7275_v23, %v9418_v18 }
 0x64c   : > { %v11993_v30 = vpop.permute.xlu0 %9400 }
 0x64d   : > { %v9403_v36 = vunpack.i.h.bf16 %v11993_v30  ;;  %v9402_v55 = vunpack.i.l.bf16 %v11993_v30 }
 0x64f   : > { %v7277_v13 = vsel %vm7273_vm10, %v7272_v50, %v9403_v36  ;;  %v7276_v30 = vsel %vm7273_vm10, %v7271_v1, %v9402_v55 }
 0x650   : > { %v12023_v56 = vpop.permute.xlu0 %9410 }
 0x651   : > { %v11999_v57 = vpop.permute.xlu1 %9425  ;;  %v9412_v16 = vunpack.i.l.bf16 %v12023_v56 }
 0x652   : > { %v9428_v48 = vunpack.i.h.bf16 %v11999_v57  ;;  %v9427_v59 = vunpack.i.l.bf16 %v11999_v57  ;;  %v9413_v57 = vunpack.i.h.bf16 %v12023_v56 }
 0x653   : > { %v7281_v19 = vsel %vm7278_vm11, %v7276_v30, %v9412_v16 }
 0x654   : > { %v9421_v32 = vpop.permute.xlu0 %9420  ;;  %v7285_v37 = vsel %vm7283_vm12, %v7280_v24, %v9428_v48  ;;  %v7284_v33 = vsel %vm7283_vm12, %v7279_v31, %v9427_v59  ;;  %v7282_v43 = vsel %vm7278_vm11, %v7277_v13, %v9413_v57 }
 0x655   : > { %v9423_v35 = vunpack.i.h.bf16 %v9421_v32  ;;  %v9422_v53 = vunpack.i.l.bf16 %v9421_v32 }
 0x657   : > { %v7287_v44 = vsel %vm7283_vm12, %v7282_v43, %v9423_v35  ;;  %v7286_v51 = vsel %vm7283_vm12, %v7281_v19, %v9422_v53 }
 0x658   : > { %v12017_v63 = vpop.permute.xlu1 %9430 }
 0x659   : > { %v9433_v52 = vunpack.i.h.bf16 %v12017_v63  ;;  %v9432_v34 = vunpack.i.l.bf16 %v12017_v63 }
 0x65b   : > { %v7291_v8 = vsel %vm7288_vm13, %v7286_v51, %v9432_v34  ;;  %v7292_v45 = vsel %vm7288_vm13, %v7287_v44, %v9433_v52 }
 0x65c   : > { %v9436_v25 = vpop.permute.xlu1 %9435  ;;  %v9451_v60 = vpop.permute.xlu0 %9450 }
 0x65d   : > { %v9438_v62 = vunpack.i.h.bf16 %v9436_v25  ;;  %v9437_v39 = vunpack.i.l.bf16 %v9436_v25  ;;  %v9453_v10 = vunpack.i.h.bf16 %v9451_v60  ;;  %v9452_v17 = vunpack.i.l.bf16 %v9451_v60 }
 0x65f   : > { %v7290_v4 = vsel %vm7288_vm13, %v7285_v37, %v9438_v62  ;;  %v7289_v47 = vsel %vm7288_vm13, %v7284_v33, %v9437_v39  ;;  %v7296_v12 = vsel %vm7293_vm15, %v7291_v8, %v9452_v17  ;;  %v7297_v7 = vsel %vm7293_vm15, %v7292_v45, %v9453_v10 }
 0x660   : > { %v9441_v22 = vpop.permute.xlu1 %9440 }
 0x661   : > { %v9443_v21 = vunpack.i.h.bf16 %v9441_v22  ;;  %v9442_v2 = vunpack.i.l.bf16 %v9441_v22 }
 0x663   : > { %v7294_v46 = vsel %vm7293_vm15, %v7289_v47, %v9442_v2  ;;  %v7295_v54 = vsel %vm7293_vm15, %v7290_v4, %v9443_v21 }
 0x664   : > { %v9446_v42 = vpop.permute.xlu1 %9445 }
 0x665   : > { %v9448_v41 = vunpack.i.h.bf16 %v9446_v42  ;;  %v9447_v58 = vunpack.i.l.bf16 %v9446_v42 }
 0x667   : > { %v7299_v3 = vsel %vm7298_vm14, %v7294_v46, %v9447_v58  ;;  %v7300_v63 = vsel %vm7298_vm14, %v7295_v54, %v9448_v41 }
 0x668   : > { %8511 = vmatprep.mubr.f32.mxu0 %v7299_v3  ;;  %v9456_v56 = vpop.permute.xlu1 %9455 }
 0x669   : > { %v9458_v61 = vunpack.i.h.bf16 %v9456_v56  ;;  %v9457_v28 = vunpack.i.l.bf16 %v9456_v56  ;;  %8512 = vmatmul.mubr.f32.vlgmr.msra.gmra.mrb[66].mxu0 %v7300_v63 }
 0x66b   : > { %v7301_v27 = vsel %vm7298_vm14, %v7296_v12, %v9457_v28  ;;  %v7302_v9 = vsel %vm7298_vm14, %v7297_v7, %v9458_v61 }
 0x66c   : > { %8514 = vmatprep.mubr.f32.mxu0 %v7301_v27 }
 0x66d   : > { %8515 = vmatmul.mubr.f32.gmra.mrb[68].mxu0 %v7302_v9 }
 0x73c   : > { %v8513_v20 = vpop.f32.mrb[66].mxu0 }
 0x73d   : > { %v7398_v49 = vadd.f32 %v8513_v20, %v7690_v38  ;;  %v7392_v15 = vpop.f32.mrb[67].mxu0 }
 0x73e   : > { %v7393_v25 = vadd.f32 %v7690_v38, %v7392_v15 }
 0x73f   : > { %7412 = vst [vmem:[%s245_s28 + $0x8] sm:$0xff] %v7398_v49 }
 0x740   : > { %7411 = vst [vmem:[%s245_s28] sm:$0xff] %v7393_v25  ;;  %v8516_v0 = vpop.f32.mrb[68].mxu0 }
 0x741   : > { %v7408_v40 = vadd.f32 %v8516_v0, %v7690_v38  ;;  %v7402_v18 = vpop.f32.mrb[69].mxu0 }
 0x742   : > { %v7403_v14 = vadd.f32 %v7690_v38, %v7402_v18 }
 0x743   : > { %7414 = vst [vmem:[%s245_s28 + $0x18] sm:$0xff] %v7408_v40 }
 0x744   : > { %7413 = vst [vmem:[%s245_s28 + $0x10] sm:$0xff] %v7403_v14 }
 0x745   : > { %9728 = shalt.err (!%p9725_p3)
}
 0x746   : > { %s9729_s14 = scalar_lea.hbm %s12089_s29, 512  ;;  %s9733_s20 = scalar_lea.hbm %s12139_s6, 1024 }
 0x747   : > { %p9730_p4 = scmp.ne.s32.totalorder %s12089_s29, %s9729_s14  ;;  %p9734_p9 = scmp.lt.u32.totalorder %s12089_s29, %s12139_s6 }
 0x748   : > { %p9735_p10 = scmp.lt.u32.totalorder %s9733_s20, %s9729_s14  ;;  %p9737_p12 = scmp.lt.u32.totalorder %s9729_s14, %s12089_s29 }
 0x749   : > { %p9731_p7 = pnand %p9730_p4, %p9870_p5 }
 0x74a   : > { %p9736_p11 = por %p9735_p10, %p9734_p9 }
 0x74b   : > { %p9732_p8 = pneg %p9731_p7 }
 0x74c   : > { %p9738_p13 = por %p9737_p12, %p9736_p11 }
 0x74e   : > { %p9739_p0 = pnand %p9738_p13, %p9732_p8 }
 0x750   : > { %9742 = shalt.err (!%p9739_p0)
}
 0x751   : > { %s9796_s19 = smov 128  }
 0x752   : > { %8933 = dma.vmem_to_hbm [thread:$0]  (%p9870_p5), %s12084_s10, 512, %s12089_s29, %s12091_s9, %s9796_s19, %s9796_s19, %s9781_s13  }
 0x753 PF: > { %p8939_p1 = scmp.ge.s32.totalorder %s9777_s24, 2  ;;  %s7444_s17 = sand.u32 1, %s9765_s21  }
 0x754   : > { %s7445_s25 = scalar_lea.sflag [#allocation3], %s7444_s17 }
 0x755   : > { %p8936_p2 = pnand %p8939_p1, %p9874_p6 }
 0x757   : > { %9760 = dma.done.wait (!%p8936_p2), %s7445_s25, 512  }
 0x758   : > { %9762 = vsyncadd (!%p8936_p2), %s7445_s25, 4294966784  ;;  %p16_p3 = scmp.ge.s32.totalorder %s9857_s27, 4   ;;  %s12381_s21 = smov %s9769_s22 }
 0x759   : > { %s12382_s22 = smov %s9773_s23  ;;  %s12383_s23 = smov %s9868_s30 }
 0x75a   : > { %s12384_s24 = smov %s9857_s27  ;;  %18 = sbr.rel (!%p16_p3) target bundleno = 3 (0x3), region = 79 }
 0x761   :  { %7450 = vsyncpa [#allocation3], 1 }
 0x762   :  { %7452 = vsyncpa [#allocation3 + $0x1], 1 }

</bundles_post_ra>
